<compile_context>
chip_gen: v7x
topology: tpu7x:2x2x1
jax: 0.10.0
libtpu: 0.0.40
codegen_flags: <defaults>
</compile_context>

<pallas_src>
import jax
import jax.numpy as jnp
from jax.experimental import pallas as pl
from jax.experimental.pallas import tpu as pltpu


def _round_up(x, m):
    return (x + m - 1) // m * m


def _fourier_packed_kernel(t2_ref, wb_ref, out_ref):
    """One (tnr, L) tile of packed Fourier features, L = g * 2F.

    t2_ref:  (tnr, g)    g consecutive time samples per packed row
    wb_ref:  (g + 1, L)  resident constants:
                           row s in [0, g): [sin|cos] coeffs in lanes
                             [s*2F, (s+1)*2F), zeros elsewhere
                           row g: phase bias (0 on sin lanes, pi/2 on cos
                             lanes) so cos(x) == sin(x + pi/2)
    out_ref: (tnr, L)    lane-dense output tile
    """
    g = t2_ref.shape[1]
    # phase[r, s*2F + f] = t[r*g + s] * coeff[f] + bias[f]
    # Rank-g expansion as g broadcast multiply-adds (VPU); sin is the dominant
    # per-element cost, and it runs on fully packed 128-lane vregs.
    acc = t2_ref[:, 0:1] * wb_ref[0:1, :] + wb_ref[g:g + 1, :]
    for s in range(1, g):
        acc = acc + t2_ref[:, s:s + 1] * wb_ref[s:s + 1, :]
    out_ref[...] = jnp.sin(acc).astype(out_ref.dtype)


def fourier_feature_layer(t, sine_coeff, cosine_coeff, *,
                          out_dtype=jnp.float32,
                          target_grid_steps=8,
                          vmem_budget_bytes=8 << 20,
                          min_pallas_bytes=1 << 16):
    """Pallas implementation of FourierFeatureLayer.forward.

    Args:
      t:            (N, 1) time samples
      sine_coeff:   (F, 1)
      cosine_coeff: (F, 1)
      out_dtype:    feature dtype (float32 matches the PyTorch module;
                    bfloat16 halves HBM write traffic if the consumer allows)
      target_grid_steps: desired number of grid steps for big problems
                    (>=2 so v7x megacore has work on both TensorCores)
      vmem_budget_bytes: cap for double-buffered (in + out) tile footprint
      min_pallas_bytes:  below this output size fall back to plain XLA
    Returns:
      (N, 2*F) = cat([sin(t @ sine_coeff.T), cos(t @ cosine_coeff.T)], axis=1)
    """
    N, one = t.shape
    assert one == 1, "t must be a column vector (N, 1)"
    F = sine_coeff.shape[0]
    assert sine_coeff.shape == (F, 1) and cosine_coeff.shape == (F, 1)
    two_f = 2 * F

    t = t.astype(jnp.float32)
    sine_coeff = sine_coeff.astype(jnp.float32)
    cosine_coeff = cosine_coeff.astype(jnp.float32)

    out_bytes = N * two_f * jnp.dtype(out_dtype).itemsize
    if out_bytes < min_pallas_bytes:
        # Tiny problem: pallas_call pipeline setup would dominate.
        return jnp.concatenate(
            [jnp.sin(t * sine_coeff.T), jnp.cos(t * cosine_coeff.T)],
            axis=1).astype(out_dtype)

    # Samples packed per output row.  Full 128-lane density when 2F divides
    # 128 (F=8 -> g=8, L=128); capped so the unrolled madd chain stays short.
    g = max(1, min(16, 128 // two_f))
    L = g * two_f

    # ---- tile sizing -------------------------------------------------------
    sub = max(8, 32 // jnp.dtype(out_dtype).itemsize)   # sublane tile (8 f32 / 16 bf16)
    npr_raw = pl.cdiv(N, g)                             # packed rows needed
    # Double-buffered in + out tile bytes per packed row (lane dim pads to 128).
    row_bytes = 2 * (_round_up(g, 128) * 4 +
                     _round_up(L, 128) * jnp.dtype(out_dtype).itemsize)
    max_tnr = max(sub, (vmem_budget_bytes // row_bytes) // sub * sub)
    if npr_raw <= 256:
        # Small problem: one tile (overhead-dominated regime anyway).
        tnr = _round_up(npr_raw, sub)
    else:
        # ~target_grid_steps steps, each >=128 rows (>=64 KiB output tile):
        # multiple "parallel" steps for v7x megacore + pipelining; v5e/v6e
        # saturate their rooflines well before larger tiles would help.
        tnr = min(max(_round_up(pl.cdiv(npr_raw, target_grid_steps), sub), 128),
                  max_tnr)
    steps = pl.cdiv(npr_raw, tnr)
    # Shrink the tile so padding is bounded by sub*steps rows, not a full tile.
    tnr = _round_up(pl.cdiv(npr_raw, steps), sub)
    npr = tnr * steps
    Np = npr * g                                        # padded sample count

    # ---- operands ----------------------------------------------------------
    t_flat = t.reshape(-1)
    if Np != N:
        t_flat = jnp.pad(t_flat, (0, Np - N))           # zero pad (sliced off later)
    t2 = t_flat.reshape(npr, g)

    # Block-expanded coefficients + phase-shift bias (tiny; built per call —
    # in a real module these would be precomputed once at init).
    coeff = jnp.concatenate([sine_coeff[:, 0], cosine_coeff[:, 0]])          # (2F,)
    w = jnp.kron(jnp.eye(g, dtype=jnp.float32), coeff[None, :])              # (g, L)
    bias = jnp.tile(jnp.concatenate([jnp.zeros((F,), jnp.float32),
                                     jnp.full((F,), jnp.pi / 2, jnp.float32)]),
                    g)                                                       # (L,)
    wb = jnp.concatenate([w, bias[None, :]], axis=0)                         # (g+1, L)

    out_packed = pl.pallas_call(
        _fourier_packed_kernel,
        out_shape=jax.ShapeDtypeStruct((npr, L), out_dtype),
        grid_spec=pltpu.PrefetchScalarGridSpec(
            num_scalar_prefetch=0,
            grid=(steps,),
            in_specs=[
                pl.BlockSpec((tnr, g), lambda i: (i, 0)),      # time samples
                pl.BlockSpec((g + 1, L), lambda i: (0, 0)),    # coeffs+bias (resident)
            ],
            out_specs=pl.BlockSpec((tnr, L), lambda i: (i, 0)),
        ),
        compiler_params=pltpu.CompilerParams(
            dimension_semantics=("parallel",),
            # Guard rail: well above our few-MiB tile footprint, well below
            # v7x's 64 MiB physical VMEM.
            vmem_limit_bytes=32 * 1024 * 1024,
        ),
    )(t2, wb)

    # Row-major order of (npr, g*2F) == row-major order of (Np, 2F): this is
    # layout plumbing only (no transpose / no extra compute pass).  Padded
    # tail rows (sin(bias) garbage) are sliced off here.
    return out_packed.reshape(Np, two_f)[:N]


if __name__ == "__main__":
    key = jax.random.PRNGKey(0)
    k_t, k_s, k_c = jax.random.split(key, 3)

    # Module hyper-params (deterministic synthetic init matching __init__ shapes).
    num_features = 8
    std = 1.0
    N = 4096  # time samples — big enough to exercise the multi-step Pallas path

    t = jax.random.uniform(k_t, (N, 1), dtype=jnp.float32)
    sine_coeff = std * jax.random.normal(k_s, (num_features, 1), dtype=jnp.float32)
    cosine_coeff = std * jax.random.normal(k_c, (num_features, 1), dtype=jnp.float32)

    out = jax.block_until_ready(fourier_feature_layer(t, sine_coeff, cosine_coeff))

    # Correctness vs the pure-JAX reference (matches torch matmul + cat).
    ref = jnp.concatenate(
        [jnp.sin(t @ sine_coeff.T), jnp.cos(t @ cosine_coeff.T)], axis=1)
    assert out.shape == (N, 2 * num_features)
    assert jnp.allclose(out, ref, atol=1e-5, rtol=1e-5)

    # Ragged N (not a multiple of anything nice), forced through Pallas.
    N2 = 300
    t_small = jax.random.uniform(k_t, (N2, 1), dtype=jnp.float32)
    out2 = jax.block_until_ready(
        fourier_feature_layer(t_small, sine_coeff, cosine_coeff,
                              min_pallas_bytes=0))
    ref2 = jnp.concatenate(
        [jnp.sin(t_small @ sine_coeff.T), jnp.cos(t_small @ cosine_coeff.T)],
        axis=1)
    assert out2.shape == (N2, 2 * num_features)
    assert jnp.allclose(out2, ref2, atol=1e-5, rtol=1e-5)

    print("KERNEL_OK")
</pallas_src>

<mosaic_0001>
module attributes {stable_mosaic.version = 11 : i64} {
  func.func @_fourier_packed_kernel(%arg0: i32, %arg1: memref<128x8xf32, #tpu.memory_space<vmem>>, %arg2: memref<9x128xf32, #tpu.memory_space<vmem>>, %arg3: memref<128x128xf32, #tpu.memory_space<vmem>>) attributes {dimension_semantics = [#tpu.dimension_semantics<parallel>], iteration_bounds = array<i64: 4>, scalar_prefetch = 0 : i64, scratch_operands = 0 : i64, tpu.core_type = #tpu.core_type<tc>, window_params = [{transform_indices = @transform_0, window_bounds = array<i64: 128, 8>}, {pipeline_mode = #tpu.pipeline_mode<synchronous>, transform_indices = @transform_1, window_bounds = array<i64: 9, 128>}, {transform_indices = @transform_2, window_bounds = array<i64: 128, 128>}]} {
    %c0 = arith.constant 0 : index
    %c0_0 = arith.constant 0 : index
    %0 = vector.load %arg1[%c0, %c0_0] : memref<128x8xf32, #tpu.memory_space<vmem>>, vector<128x1xf32>
    %c0_1 = arith.constant 0 : index
    %c0_2 = arith.constant 0 : index
    %1 = vector.load %arg2[%c0_1, %c0_2] : memref<9x128xf32, #tpu.memory_space<vmem>>, vector<1x128xf32>
    %2 = vector.broadcast %0 : vector<128x1xf32> to vector<128x128xf32>
    %3 = vector.broadcast %1 : vector<1x128xf32> to vector<128x128xf32>
    %4 = arith.mulf %2, %3 : vector<128x128xf32>
    %c8 = arith.constant 8 : index
    %c0_3 = arith.constant 0 : index
    %5 = vector.load %arg2[%c8, %c0_3] : memref<9x128xf32, #tpu.memory_space<vmem>>, vector<1x128xf32>
    %6 = vector.broadcast %5 : vector<1x128xf32> to vector<128x128xf32>
    %7 = arith.addf %4, %6 : vector<128x128xf32>
    %c0_4 = arith.constant 0 : index
    %c1 = arith.constant 1 : index
    %8 = vector.load %arg1[%c0_4, %c1] : memref<128x8xf32, #tpu.memory_space<vmem>>, vector<128x1xf32>
    %c1_5 = arith.constant 1 : index
    %c0_6 = arith.constant 0 : index
    %9 = vector.load %arg2[%c1_5, %c0_6] : memref<9x128xf32, #tpu.memory_space<vmem>>, vector<1x128xf32>
    %10 = vector.broadcast %8 : vector<128x1xf32> to vector<128x128xf32>
    %11 = vector.broadcast %9 : vector<1x128xf32> to vector<128x128xf32>
    %12 = arith.mulf %10, %11 : vector<128x128xf32>
    %13 = arith.addf %7, %12 : vector<128x128xf32>
    %c0_7 = arith.constant 0 : index
    %c2 = arith.constant 2 : index
    %14 = vector.load %arg1[%c0_7, %c2] : memref<128x8xf32, #tpu.memory_space<vmem>>, vector<128x1xf32>
    %c2_8 = arith.constant 2 : index
    %c0_9 = arith.constant 0 : index
    %15 = vector.load %arg2[%c2_8, %c0_9] : memref<9x128xf32, #tpu.memory_space<vmem>>, vector<1x128xf32>
    %16 = vector.broadcast %14 : vector<128x1xf32> to vector<128x128xf32>
    %17 = vector.broadcast %15 : vector<1x128xf32> to vector<128x128xf32>
    %18 = arith.mulf %16, %17 : vector<128x128xf32>
    %19 = arith.addf %13, %18 : vector<128x128xf32>
    %c0_10 = arith.constant 0 : index
    %c3 = arith.constant 3 : index
    %20 = vector.load %arg1[%c0_10, %c3] : memref<128x8xf32, #tpu.memory_space<vmem>>, vector<128x1xf32>
    %c3_11 = arith.constant 3 : index
    %c0_12 = arith.constant 0 : index
    %21 = vector.load %arg2[%c3_11, %c0_12] : memref<9x128xf32, #tpu.memory_space<vmem>>, vector<1x128xf32>
    %22 = vector.broadcast %20 : vector<128x1xf32> to vector<128x128xf32>
    %23 = vector.broadcast %21 : vector<1x128xf32> to vector<128x128xf32>
    %24 = arith.mulf %22, %23 : vector<128x128xf32>
    %25 = arith.addf %19, %24 : vector<128x128xf32>
    %c0_13 = arith.constant 0 : index
    %c4 = arith.constant 4 : index
    %26 = vector.load %arg1[%c0_13, %c4] : memref<128x8xf32, #tpu.memory_space<vmem>>, vector<128x1xf32>
    %c4_14 = arith.constant 4 : index
    %c0_15 = arith.constant 0 : index
    %27 = vector.load %arg2[%c4_14, %c0_15] : memref<9x128xf32, #tpu.memory_space<vmem>>, vector<1x128xf32>
    %28 = vector.broadcast %26 : vector<128x1xf32> to vector<128x128xf32>
    %29 = vector.broadcast %27 : vector<1x128xf32> to vector<128x128xf32>
    %30 = arith.mulf %28, %29 : vector<128x128xf32>
    %31 = arith.addf %25, %30 : vector<128x128xf32>
    %c0_16 = arith.constant 0 : index
    %c5 = arith.constant 5 : index
    %32 = vector.load %arg1[%c0_16, %c5] : memref<128x8xf32, #tpu.memory_space<vmem>>, vector<128x1xf32>
    %c5_17 = arith.constant 5 : index
    %c0_18 = arith.constant 0 : index
    %33 = vector.load %arg2[%c5_17, %c0_18] : memref<9x128xf32, #tpu.memory_space<vmem>>, vector<1x128xf32>
    %34 = vector.broadcast %32 : vector<128x1xf32> to vector<128x128xf32>
    %35 = vector.broadcast %33 : vector<1x128xf32> to vector<128x128xf32>
    %36 = arith.mulf %34, %35 : vector<128x128xf32>
    %37 = arith.addf %31, %36 : vector<128x128xf32>
    %c0_19 = arith.constant 0 : index
    %c6 = arith.constant 6 : index
    %38 = vector.load %arg1[%c0_19, %c6] : memref<128x8xf32, #tpu.memory_space<vmem>>, vector<128x1xf32>
    %c6_20 = arith.constant 6 : index
    %c0_21 = arith.constant 0 : index
    %39 = vector.load %arg2[%c6_20, %c0_21] : memref<9x128xf32, #tpu.memory_space<vmem>>, vector<1x128xf32>
    %40 = vector.broadcast %38 : vector<128x1xf32> to vector<128x128xf32>
    %41 = vector.broadcast %39 : vector<1x128xf32> to vector<128x128xf32>
    %42 = arith.mulf %40, %41 : vector<128x128xf32>
    %43 = arith.addf %37, %42 : vector<128x128xf32>
    %c0_22 = arith.constant 0 : index
    %c7 = arith.constant 7 : index
    %44 = vector.load %arg1[%c0_22, %c7] : memref<128x8xf32, #tpu.memory_space<vmem>>, vector<128x1xf32>
    %c7_23 = arith.constant 7 : index
    %c0_24 = arith.constant 0 : index
    %45 = vector.load %arg2[%c7_23, %c0_24] : memref<9x128xf32, #tpu.memory_space<vmem>>, vector<1x128xf32>
    %46 = vector.broadcast %44 : vector<128x1xf32> to vector<128x128xf32>
    %47 = vector.broadcast %45 : vector<1x128xf32> to vector<128x128xf32>
    %48 = arith.mulf %46, %47 : vector<128x128xf32>
    %49 = arith.addf %43, %48 : vector<128x128xf32>
    %50 = math.sin %49 : vector<128x128xf32>
    %c0_25 = arith.constant 0 : index
    %c0_26 = arith.constant 0 : index
    %51 = vector.load %arg3[%c0_25, %c0_26] : memref<128x128xf32, #tpu.memory_space<vmem>>, vector<128x128xf32>
    tpu.vector_store %arg3[%c0_25, %c0_26], %50 {strides = array<i32>} : memref<128x128xf32, #tpu.memory_space<vmem>>, vector<128x128xf32>,
    return
  }
  func.func @transform_0(%arg0: i32) -> (i32, i32) {
    %c0_i32 = arith.constant 0 : i32
    %c0_i32_0 = arith.constant 0 : i32
    return %arg0, %c0_i32 : i32, i32
  }
  func.func @transform_1(%arg0: i32) -> (i32, i32) {
    %c0_i32 = arith.constant 0 : i32
    %c0_i32_0 = arith.constant 0 : i32
    %c0_i32_1 = arith.constant 0 : i32
    return %c0_i32, %c0_i32_0 : i32, i32
  }
  func.func @transform_2(%arg0: i32) -> (i32, i32) {
    %c0_i32 = arith.constant 0 : i32
    %c0_i32_0 = arith.constant 0 : i32
    return %arg0, %c0_i32 : i32, i32
  }
}

</mosaic_0001>

<bundles_post_ra>
// kernel: tpu_custom_call.1
= control target key start
LH: loop header
LB: loop body
LE: loop exit
PB: predicated region body
PF: predicated region fallthrough
CT: control target
= control target key end

     0   :  { %7 = vsyncpa [#allocation3], 0  ;;  %s5063_s0 = inlined_call_operand.vmem [shape: f32[512,8], index: 0, kind: input, shape index: {}]   ;;  %s5064_s1 = inlined_call_operand.vmem [shape: f32[9,128], index: 1, kind: input, shape index: {}]   ;;  %s5065_s2 = inlined_call_operand.hbm [shape: f32[512,128], index: 2, kind: output, shape index: {}]  }
   0x1   :  { %9 = vsyncpa [#allocation3 + $0x1], 0  ;;  %s3130_s9 = smov 0   ;;  %s3132_s10 = smov 0  }
   0x2   :  { %s3134_s11 = smov 0   ;;  %s3136_s12 = smov 0  }
   0x3 LB: > { %s3151_s13 = sadd.s32 4294967295, %s3096_s12   ;;  %s2746_s14 = sadd.s32 4294967294, %s3096_s12   ;;  %s3096_s12 = sphi %s3136_s12, %s5099_s12   ;;  %s3092_s11 = sphi %s3134_s11, %s5098_s11   ;;  %s3088_s10 = sphi %s3132_s10, %s5097_s10   ;;  %s3084_s9 = sphi %s3130_s9, %s5096_s9  }
   0x4   : > { %s3155_s15 = sadd.s32 1, %s3096_s12   ;;  %s69_s16 = sadd.s32 1, %s3092_s11 }
   0x5   : > { %s66_s17 = ssub.s32 %s3096_s12, %s3155_s15  ;;  %p79_p0 = scmp.ne.s32.totalorder %s3092_s11, %s3088_s10 }
   0x6   : > { %p67_p1 = scmp.eq.s32.totalorder %s66_s17, 0  ;;  %p80_p2 = scmp.eq.s32.totalorder %s3151_s13, 3 }
   0x7   : > { %p85_p3 = scmp.ne.s32.totalorder %s3088_s10, %s3084_s9  ;;  %p86_p4 = scmp.eq.s32.totalorder %s2746_s14, 3 }
   0x8   : > { %s3166_s18 = scalar_select %p67_p1, %s3092_s11, %s69_s16  }
   0x9   : > { %p3168_p5 = por %p80_p2, %p79_p0  ;;  %p3172_p6 = por %p86_p4, %p85_p3 }
   0xa   : > { %p2749_p7 = scmp.ge.s32.totalorder %s3096_s12, 1  ;;  %p116_p8 = scmp.lt.s32.totalorder %s3096_s12, 5 }
   0xc   : > { %p117_p9 = pnand %p2749_p7, %p116_p8 }
   0xd   : > { %s2751_s21 = sshll.u32 (!%p117_p9), %s3151_s13, 4  ;;  %v3098_v0 = vmov (!%p117_p9), 0   ;;  %v3099_v17 = vmov (!%p117_p9), 1   ;;  %v3100_v18 = vmov (!%p117_p9), 2   ;;  %v3101_v19 = vmov (!%p117_p9), 3   ;;  %s2831_s6 = sshll.u32 (!%p117_p9), %s3151_s13, 11 }
   0xe   : > { %120 = sbr.rel (%p117_p9) target bundleno = 830 (0x33e), region = 28  ;;  %2952 = vset.pattern.permute.xlu1 (!%p117_p9), %v3098_v0  ;;  %2951 = vset.pattern.permute.xlu0 (!%p117_p9), %v3098_v0  ;;  %p139_p10 = scmp.lt.s32.totalorder (!%p117_p9), %s2751_s21, 63  ;;  %v3279_v20 = vld [vmem:[%s5064_s1] ss:$0 sm:$0xff] (!%p117_p9)  ;;  %v3284_v21 = vld [vmem:[%s5064_s1 + $0x8] ss:$0 sm:$0xff] (!%p117_p9) }
   0xf   : > { %v3102_v23 = vmov (!%p117_p9), 4   ;;  %v3103_v63 = vmov (!%p117_p9), 5   ;;  %s5014_s16 = scalar_lea.hbm (!%p117_p9), %s5065_s2, %s2831_s6 }
  0x15   : > { %s5101_s21 = smov (!%p139_p10, %s2751_s21), 63 }
  0x16   : > { %s2752_s22 = sshll.u32 %s5101_s21, 3  ;;  %s3112_s21 = smov [#allocation2]  }
  0x17   : > { %s142_s25 = scalar_lea.vmem %s5063_s0, %s2752_s22  ;;  %s3038_s22 = sshll.u32 %s3112_s21, 4  ;;  %s3039_s22 = int_to_ptr.vmem [resolvable:$false] %s3038_s22 }
  0x18   : > { %v3182_v1 = vld [vmem:[%s142_s25 + $0x10] sm:$0xff]  ;;  %v3184_v2 = vld [vmem:[%s142_s25] sm:$0xff]  ;;  %v3188_v3 = vld [vmem:[%s142_s25 + $0x18] sm:$0xff]  ;;  %s3040_s23 = scalar_lea.vmem %s3039_s22, 4096 }
  0x19   : > { %174 = vperm.xlu1 %2952, %v3182_v1   ;;  %164 = vperm.xlu0 %2951, %v3184_v2   ;;  %v3190_v4 = vld [vmem:[%s142_s25 + $0x8] sm:$0xff]  ;;  %v3196_v6 = vld [vmem:[%s142_s25 + $0x20] sm:$0xff]  ;;  %v3200_v7 = vld [vmem:[%s142_s25 + $0x38] sm:$0xff] }
  0x1a   : > { %v3194_v5 = vld [vmem:[%s142_s25 + $0x28] sm:$0xff]  ;;  %v3202_v8 = vld [vmem:[%s142_s25 + $0x30] sm:$0xff]  ;;  %v3208_v10 = vld [vmem:[%s142_s25 + $0x40] sm:$0xff] }
  0x1b   : > { %v3206_v9 = vld [vmem:[%s142_s25 + $0x48] sm:$0xff]  ;;  %v3212_v11 = vld [vmem:[%s142_s25 + $0x58] sm:$0xff]  ;;  %v3214_v12 = vld [vmem:[%s142_s25 + $0x50] sm:$0xff] }
  0x1c   : > { %v3218_v13 = vld [vmem:[%s142_s25 + $0x68] sm:$0xff]  ;;  %v3220_v14 = vld [vmem:[%s142_s25 + $0x60] sm:$0xff]  ;;  %v3224_v15 = vld [vmem:[%s142_s25 + $0x78] sm:$0xff] }
  0x1d   : > { %179 = vperm.xlu1 %2952, %v3188_v3   ;;  %169 = vperm.xlu0 %2951, %v3190_v4   ;;  %v3226_v16 = vld [vmem:[%s142_s25 + $0x70] sm:$0xff]  ;;  %s135_s25 = sand.u32 1, %s3088_s10  }
  0x1e   : > { %s2750_s26 = sshll.u32 %s135_s25, 7  ;;  %s5022_s13 = scalar_lea.sflag [#allocation3], %s135_s25 }
  0x1f   : > { %s3935_s27 = scalar_lea.vmem [#allocation2], %s2750_s26 }
  0x20   : > { %s2684_s7 = sshll.u32 %s3935_s27, 4  ;;  %s5016_s7 = int_to_ptr.vmem [resolvable:$true] %s2684_s7 }
  0x21   : > { %189 = vperm.xlu1 %2952, %v3194_v5   ;;  %184 = vperm.xlu0 %2951, %v3196_v6   ;;  %s3034_s17 = scalar_lea.vmem %s5016_s7, 2048  ;;  %p3041_p0 = scmp.lt.s32.totalorder %s5016_s7, %s3039_s22 }
  0x22   : > { %p3035_p11 = scmp.ne.s32.totalorder %s5016_s7, %s3034_s17  ;;  %p3042_p1 = scmp.lt.s32.totalorder %s3040_s23, %s3034_s17 }
  0x24   : > { %p3036_p12 = pnand %p3035_p11, %p3168_p5  ;;  %p3043_p2 = por %p3042_p1, %p3041_p0 }
  0x25   : > { %199 = vperm.xlu1 %2952, %v3200_v7   ;;  %194 = vperm.xlu0 %2951, %v3202_v8  }
  0x26   : > { %p3037_p13 = pneg %p3036_p12 }
  0x28   : > { %p3044_p3 = pnand %p3043_p2, %p3037_p13 }
  0x29   : > { %209 = vperm.xlu1 %2952, %v3206_v9   ;;  %204 = vperm.xlu0 %2951, %v3208_v10  }
  0x2d   : > { %219 = vperm.xlu1 %2952, %v3212_v11   ;;  %214 = vperm.xlu0 %2951, %v3214_v12  }
  0x31   : > { %229 = vperm.xlu1 %2952, %v3218_v13   ;;  %224 = vperm.xlu0 %2951, %v3220_v14  }
  0x35   : > { %239 = vperm.xlu1 %2952, %v3224_v15   ;;  %234 = vperm.xlu0 %2951, %v3226_v16  }
  0x39   : > { %2954 = vset.pattern.permute.xlu1 %v3099_v17  ;;  %2953 = vset.pattern.permute.xlu0 %v3099_v17 }
  0x3a   : > { %289 = vperm.xlu1 %2954, %v3190_v4   ;;  %285 = vperm.xlu0 %2953, %v3184_v2  }
  0x3e   : > { %293 = vperm.xlu1 %2954, %v3182_v1   ;;  %297 = vperm.xlu0 %2953, %v3188_v3  }
  0x42   : > { %301 = vperm.xlu1 %2954, %v3196_v6   ;;  %305 = vperm.xlu0 %2953, %v3194_v5  }
  0x46   : > { %309 = vperm.xlu1 %2954, %v3202_v8   ;;  %313 = vperm.xlu0 %2953, %v3200_v7  }
  0x4a   : > { %317 = vperm.xlu1 %2954, %v3208_v10   ;;  %321 = vperm.xlu0 %2953, %v3206_v9  }
  0x4e   : > { %325 = vperm.xlu1 %2954, %v3214_v12   ;;  %329 = vperm.xlu0 %2953, %v3212_v11  }
  0x52   : > { %333 = vperm.xlu1 %2954, %v3220_v14   ;;  %337 = vperm.xlu0 %2953, %v3218_v13  }
  0x56   : > { %341 = vperm.xlu1 %2954, %v3226_v16   ;;  %345 = vperm.xlu0 %2953, %v3224_v15  }
  0x5a   : > { %2955 = vset.pattern.permute.xlu1 %v3100_v18  ;;  %2956 = vset.pattern.permute.xlu0 %v3100_v18  ;;  %v3349_v18 = vld [vmem:[%s5064_s1 + $0x1] ss:$0 sm:$0xff] }
  0x5b   : > { %386 = vperm.xlu1 %2955, %v3184_v2   ;;  %390 = vperm.xlu0 %2956, %v3190_v4  }
  0x5f   : > { %394 = vperm.xlu1 %2955, %v3182_v1   ;;  %402 = vperm.xlu0 %2956, %v3196_v6  }
  0x63   : > { %398 = vperm.xlu1 %2955, %v3188_v3   ;;  %410 = vperm.xlu0 %2956, %v3202_v8  }
  0x67   : > { %406 = vperm.xlu1 %2955, %v3194_v5   ;;  %418 = vperm.xlu0 %2956, %v3208_v10  }
  0x6b   : > { %414 = vperm.xlu1 %2955, %v3200_v7   ;;  %426 = vperm.xlu0 %2956, %v3214_v12  }
  0x6f   : > { %422 = vperm.xlu1 %2955, %v3206_v9   ;;  %434 = vperm.xlu0 %2956, %v3220_v14  }
  0x73   : > { %430 = vperm.xlu1 %2955, %v3212_v11   ;;  %442 = vperm.xlu0 %2956, %v3226_v16  }
  0x77   : > { %438 = vperm.xlu1 %2955, %v3218_v13   ;;  %2957 = vset.pattern.permute.xlu0 %v3101_v19 }
  0x78   : > { %487 = vperm.xlu0 %2957, %v3184_v2  }
  0x7b   : > { %446 = vperm.xlu1 %2955, %v3224_v15  }
  0x7c   : > { %499 = vperm.xlu0 %2957, %v3188_v3  }
  0x7f   : > { %2958 = vset.pattern.permute.xlu1 %v3101_v19 }
  0x80   : > { %491 = vperm.xlu1 %2958, %v3190_v4   ;;  %507 = vperm.xlu0 %2957, %v3194_v5  }
  0x84   : > { %495 = vperm.xlu1 %2958, %v3182_v1   ;;  %515 = vperm.xlu0 %2957, %v3200_v7  }
  0x88   : > { %503 = vperm.xlu1 %2958, %v3196_v6   ;;  %523 = vperm.xlu0 %2957, %v3206_v9  }
  0x8c   : > { %511 = vperm.xlu1 %2958, %v3202_v8   ;;  %531 = vperm.xlu0 %2957, %v3212_v11  }
  0x90   : > { %519 = vperm.xlu1 %2958, %v3208_v10   ;;  %539 = vperm.xlu0 %2957, %v3218_v13  }
  0x94   : > { %527 = vperm.xlu1 %2958, %v3214_v12   ;;  %547 = vperm.xlu0 %2957, %v3224_v15  }
  0x98   : > { %v175_v22 = vpop.permute.xlu1 %174  ;;  %535 = vperm.xlu1 %2958, %v3220_v14   ;;  %2960 = vset.pattern.permute.xlu0 %v3102_v23  ;;  %v3287_v24 = vpop.permute.xlu0 %164 }
  0x99   : > { %v248_v25 = vmul.f32 %v3279_v20, %v175_v22  ;;  %592 = vperm.xlu0 %2960, %v3190_v4  }
  0x9b   : > { %v3292_v26 = vadd.f32 %v3284_v21, %v248_v25 }
  0x9c   : > { %v3294_v27 = vpop.permute.xlu1 %179  ;;  %543 = vperm.xlu1 %2958, %v3226_v16   ;;  %v170_v28 = vpop.permute.xlu0 %169 }
  0x9d   : > { %v247_v29 = vmul.f32 %v3279_v20, %v170_v28  ;;  %604 = vperm.xlu0 %2960, %v3196_v6  }
  0x9f   : > { %v268_v30 = vadd.f32 %v3284_v21, %v247_v29 }
  0xa0   : > { %v3300_v31 = vpop.permute.xlu1 %189  ;;  %2959 = vset.pattern.permute.xlu1 %v3102_v23  ;;  %v185_v32 = vpop.permute.xlu0 %184 }
  0xa1   : > { %v250_v33 = vmul.f32 %v3279_v20, %v185_v32  ;;  %588 = vperm.xlu1 %2959, %v3184_v2   ;;  %612 = vperm.xlu0 %2960, %v3202_v8  }
  0xa3   : > { %v271_v34 = vadd.f32 %v3284_v21, %v250_v33 }
  0xa4   : > { %v200_v35 = vpop.permute.xlu1 %199  ;;  %v195_v36 = vpop.permute.xlu0 %194 }
  0xa5   : > { %v253_v37 = vmul.f32 %v3279_v20, %v200_v35  ;;  %v252_v38 = vmul.f32 %v3279_v20, %v195_v36  ;;  %596 = vperm.xlu1 %2959, %v3182_v1   ;;  %620 = vperm.xlu0 %2960, %v3208_v10  }
  0xa7   : > { %v3311_v39 = vadd.f32 %v3284_v21, %v253_v37  ;;  %v273_v40 = vadd.f32 %v3284_v21, %v252_v38 }
  0xa8   : > { %v210_v41 = vpop.permute.xlu1 %209  ;;  %v205_v42 = vpop.permute.xlu0 %204 }
  0xa9   : > { %v255_v43 = vmul.f32 %v3279_v20, %v210_v41  ;;  %v254_v44 = vmul.f32 %v3279_v20, %v205_v42  ;;  %600 = vperm.xlu1 %2959, %v3188_v3   ;;  %628 = vperm.xlu0 %2960, %v3214_v12  }
  0xab   : > { %v3319_v45 = vadd.f32 %v3284_v21, %v255_v43  ;;  %v275_v46 = vadd.f32 %v3284_v21, %v254_v44 }
  0xac   : > { %v220_v47 = vpop.permute.xlu1 %219  ;;  %v215_v48 = vpop.permute.xlu0 %214 }
  0xad   : > { %v257_v49 = vmul.f32 %v3279_v20, %v220_v47  ;;  %v256_v50 = vmul.f32 %v3279_v20, %v215_v48  ;;  %608 = vperm.xlu1 %2959, %v3194_v5   ;;  %636 = vperm.xlu0 %2960, %v3220_v14  }
  0xaf   : > { %v3327_v51 = vadd.f32 %v3284_v21, %v257_v49  ;;  %v277_v52 = vadd.f32 %v3284_v21, %v256_v50 }
  0xb0   : > { %v230_v53 = vpop.permute.xlu1 %229  ;;  %v225_v54 = vpop.permute.xlu0 %224 }
  0xb1   : > { %v259_v55 = vmul.f32 %v3279_v20, %v230_v53  ;;  %v258_v56 = vmul.f32 %v3279_v20, %v225_v54  ;;  %616 = vperm.xlu1 %2959, %v3200_v7   ;;  %644 = vperm.xlu0 %2960, %v3226_v16  }
  0xb3   : > { %v3335_v57 = vadd.f32 %v3284_v21, %v259_v55  ;;  %v279_v58 = vadd.f32 %v3284_v21, %v258_v56 }
  0xb4   : > { %v240_v59 = vpop.permute.xlu1 %239  ;;  %v235_v60 = vpop.permute.xlu0 %234 }
  0xb5   : > { %v261_v61 = vmul.f32 %v3279_v20, %v240_v59  ;;  %v260_v62 = vmul.f32 %v3279_v20, %v235_v60  ;;  %624 = vperm.xlu1 %2959, %v3206_v9   ;;  %2961 = vset.pattern.permute.xlu0 %v3103_v63 }
  0xb6   : > { %689 = vperm.xlu0 %2961, %v3184_v2  }
  0xb7   : > { %v3343_v0 = vadd.f32 %v3284_v21, %v261_v61  ;;  %v281_v17 = vadd.f32 %v3284_v21, %v260_v62 }
  0xb9   : > { %v290_v19 = vpop.permute.xlu1 %289  ;;  %632 = vperm.xlu1 %2959, %v3212_v11   ;;  %v3352_v22 = vpop.permute.xlu0 %285 }
  0xba   : > { %v353_v23 = vmul.f32 %v3349_v18, %v290_v19  ;;  %701 = vperm.xlu0 %2961, %v3188_v3  }
  0xbc   : > { %v369_v25 = vadd.f32 %v353_v23, %v268_v30 }
  0xbd   : > { %v294_v28 = vpop.permute.xlu1 %293  ;;  %640 = vperm.xlu1 %2959, %v3218_v13   ;;  %v3357_v29 = vpop.permute.xlu0 %297 }
  0xbe   : > { %v354_v32 = vmul.f32 %v3349_v18, %v294_v28  ;;  %709 = vperm.xlu0 %2961, %v3194_v5   ;;  %v3104_v28 = vmov 6  }
  0xc0   : > { %v3362_v33 = vadd.f32 %v354_v32, %v3292_v26 }
  0xc1   : > { %v302_v35 = vpop.permute.xlu1 %301  ;;  %648 = vperm.xlu1 %2959, %v3224_v15   ;;  %v3365_v36 = vpop.permute.xlu0 %305 }
  0xc2   : > { %v356_v37 = vmul.f32 %v3349_v18, %v302_v35  ;;  %717 = vperm.xlu0 %2961, %v3200_v7  }
  0xc4   : > { %v372_v30 = vadd.f32 %v356_v37, %v271_v34 }
  0xc5   : > { %v310_v38 = vpop.permute.xlu1 %309  ;;  %2962 = vset.pattern.permute.xlu1 %v3103_v63  ;;  %v314_v41 = vpop.permute.xlu0 %313 }
  0xc6   : > { %v358_v42 = vmul.f32 %v3349_v18, %v310_v38  ;;  %v359_v43 = vmul.f32 %v3349_v18, %v314_v41  ;;  %693 = vperm.xlu1 %2962, %v3190_v4   ;;  %725 = vperm.xlu0 %2961, %v3206_v9  }
  0xc8   : > { %v374_v26 = vadd.f32 %v358_v42, %v273_v40  ;;  %v3374_v44 = vadd.f32 %v359_v43, %v3311_v39 }
  0xc9   : > { %v318_v47 = vpop.permute.xlu1 %317  ;;  %v322_v48 = vpop.permute.xlu0 %321 }
  0xca   : > { %v360_v49 = vmul.f32 %v3349_v18, %v318_v47  ;;  %v361_v34 = vmul.f32 %v3349_v18, %v322_v48  ;;  %697 = vperm.xlu1 %2962, %v3182_v1   ;;  %733 = vperm.xlu0 %2961, %v3212_v11  }
  0xcc   : > { %v376_v50 = vadd.f32 %v360_v49, %v275_v46  ;;  %v3381_v53 = vadd.f32 %v361_v34, %v3319_v45 }
  0xcd   : > { %v326_v54 = vpop.permute.xlu1 %325  ;;  %v330_v55 = vpop.permute.xlu0 %329 }
  0xce   : > { %v362_v40 = vmul.f32 %v3349_v18, %v326_v54  ;;  %v363_v39 = vmul.f32 %v3349_v18, %v330_v55  ;;  %705 = vperm.xlu1 %2962, %v3196_v6   ;;  %741 = vperm.xlu0 %2961, %v3218_v13  }
  0xd0   : > { %v378_v56 = vadd.f32 %v362_v40, %v277_v52  ;;  %v3388_v59 = vadd.f32 %v363_v39, %v3327_v51 }
  0xd1   : > { %v334_v60 = vpop.permute.xlu1 %333  ;;  %v338_v61 = vpop.permute.xlu0 %337 }
  0xd2   : > { %v364_v46 = vmul.f32 %v3349_v18, %v334_v60  ;;  %v365_v45 = vmul.f32 %v3349_v18, %v338_v61  ;;  %713 = vperm.xlu1 %2962, %v3202_v8   ;;  %749 = vperm.xlu0 %2961, %v3224_v15  }
  0xd4   : > { %v380_v62 = vadd.f32 %v364_v46, %v279_v58  ;;  %v3395_v63 = vadd.f32 %v365_v45, %v3335_v57  ;;  %v3407_v57 = vld [vmem:[%s5064_s1 + $0x2] ss:$0 sm:$0xff] }
  0xd5   : > { %v342_v19 = vpop.permute.xlu1 %341  ;;  %v346_v23 = vpop.permute.xlu0 %345 }
  0xd6   : > { %v366_v52 = vmul.f32 %v3349_v18, %v342_v19  ;;  %v367_v51 = vmul.f32 %v3349_v18, %v346_v23  ;;  %721 = vperm.xlu1 %2962, %v3208_v10   ;;  %2964 = vset.pattern.permute.xlu0 %v3104_v28 }
  0xd7   : > { %794 = vperm.xlu0 %2964, %v3190_v4  }
  0xd8   : > { %v382_v32 = vadd.f32 %v366_v52, %v281_v17  ;;  %v3402_v35 = vadd.f32 %v367_v51, %v3343_v0 }
  0xda   : > { %729 = vperm.xlu1 %2962, %v3214_v12   ;;  %v3410_v58 = vpop.permute.xlu1 %386  ;;  %v391_v37 = vpop.permute.xlu0 %390 }
  0xdb   : > { %v454_v38 = vmul.f32 %v3407_v57, %v391_v37  ;;  %806 = vperm.xlu0 %2964, %v3196_v6  }
  0xdd   : > { %v3414_v41 = vadd.f32 %v454_v38, %v369_v25 }
  0xde   : > { %737 = vperm.xlu1 %2962, %v3220_v14   ;;  %v395_v0 = vpop.permute.xlu1 %394  ;;  %v403_v17 = vpop.permute.xlu0 %402 }
  0xdf   : > { %v455_v42 = vmul.f32 %v3407_v57, %v395_v0  ;;  %v457_v43 = vmul.f32 %v3407_v57, %v403_v17  ;;  %814 = vperm.xlu0 %2964, %v3202_v8   ;;  %v3105_v0 = vmov 7   ;;  %v249_v17 = vmul.f32 %v3279_v20, %v3294_v27 }
  0xe0   : > { %v251_v27 = vmul.f32 %v3279_v20, %v3300_v31 }
  0xe1   : > { %v3421_v47 = vadd.f32 %v455_v42, %v3362_v33  ;;  %v3423_v48 = vadd.f32 %v457_v43, %v372_v30 }
  0xe2   : > { %745 = vperm.xlu1 %2962, %v3226_v16   ;;  %v399_v49 = vpop.permute.xlu1 %398  ;;  %v411_v25 = vpop.permute.xlu0 %410 }
  0xe3   : > { %v459_v34 = vmul.f32 %v3407_v57, %v411_v25  ;;  %822 = vperm.xlu0 %2964, %v3208_v10  }
  0xe5   : > { %v3428_v54 = vadd.f32 %v459_v34, %v374_v26 }
  0xe6   : > { %2963 = vset.pattern.permute.xlu1 %v3104_v28  ;;  %v407_v55 = vpop.permute.xlu1 %406  ;;  %v419_v40 = vpop.permute.xlu0 %418 }
  0xe7   : > { %v461_v39 = vmul.f32 %v3407_v57, %v419_v40  ;;  %790 = vperm.xlu1 %2963, %v3184_v2   ;;  %830 = vperm.xlu0 %2964, %v3214_v12   ;;  %v270_v40 = vadd.f32 %v3284_v21, %v249_v17 }
  0xe9   : > { %v3433_v33 = vadd.f32 %v461_v39, %v376_v50 }
  0xea   : > { %v415_v30 = vpop.permute.xlu1 %414  ;;  %v427_v60 = vpop.permute.xlu0 %426 }
  0xeb   : > { %v460_v61 = vmul.f32 %v3407_v57, %v415_v30  ;;  %v463_v46 = vmul.f32 %v3407_v57, %v427_v60  ;;  %798 = vperm.xlu1 %2963, %v3182_v1   ;;  %838 = vperm.xlu0 %2964, %v3220_v14   ;;  %v3475_v30 = vld [vmem:[%s5064_s1 + $0x3] ss:$0 sm:$0xff] }
  0xed   : > { %v476_v26 = vadd.f32 %v460_v61, %v3374_v44  ;;  %v3440_v45 = vadd.f32 %v463_v46, %v378_v56 }
  0xee   : > { %v423_v19 = vpop.permute.xlu1 %422  ;;  %v435_v23 = vpop.permute.xlu0 %434 }
  0xef   : > { %v462_v52 = vmul.f32 %v3407_v57, %v423_v19  ;;  %v465_v50 = vmul.f32 %v3407_v57, %v435_v23  ;;  %802 = vperm.xlu1 %2963, %v3188_v3   ;;  %846 = vperm.xlu0 %2964, %v3226_v16  }
  0xf1   : > { %v478_v51 = vadd.f32 %v462_v52, %v3381_v53  ;;  %v3447_v28 = vadd.f32 %v465_v50, %v380_v62  ;;  %v355_v62 = vmul.f32 %v3349_v18, %v3357_v29  ;;  %v357_v29 = vmul.f32 %v3349_v18, %v3365_v36 }
  0xf2   : > { %v431_v37 = vpop.permute.xlu1 %430  ;;  %v443_v38 = vpop.permute.xlu0 %442 }
  0xf3   : > { %v464_v44 = vmul.f32 %v3407_v57, %v431_v37  ;;  %v467_v56 = vmul.f32 %v3407_v57, %v443_v38  ;;  %810 = vperm.xlu1 %2963, %v3194_v5   ;;  %2965 = vset.pattern.permute.xlu0 %v3105_v0 }
  0xf4   : > { %891 = vperm.xlu0 %2965, %v3184_v2   ;;  %v456_v2 = vmul.f32 %v3407_v57, %v399_v49  ;;  %v272_v49 = vadd.f32 %v3284_v21, %v251_v27 }
  0xf5   : > { %v480_v42 = vadd.f32 %v464_v44, %v3388_v59  ;;  %v3456_v53 = vadd.f32 %v467_v56, %v382_v32  ;;  %v371_v32 = vadd.f32 %v355_v62, %v270_v40 }
  0xf6   : > { %v439_v43 = vpop.permute.xlu1 %438  ;;  %v373_v46 = vadd.f32 %v357_v29, %v272_v49 }
  0xf7   : > { %v466_v25 = vmul.f32 %v3407_v57, %v439_v43  ;;  %818 = vperm.xlu1 %2963, %v3200_v7   ;;  %v3462_v34 = vpop.permute.xlu0 %487 }
  0xf8   : > { %903 = vperm.xlu0 %2965, %v3188_v3   ;;  %v472_v3 = vadd.f32 %v456_v2, %v371_v32 }
  0xf9   : > { %v482_v59 = vadd.f32 %v466_v25, %v3395_v63  ;;  %v458_v63 = vmul.f32 %v3407_v57, %v407_v55 }
  0xfa   : > { %v447_v39 = vpop.permute.xlu1 %446 }
  0xfb   : > { %v468_v60 = vmul.f32 %v3407_v57, %v447_v39  ;;  %826 = vperm.xlu1 %2963, %v3206_v9   ;;  %v500_v31 = vpop.permute.xlu0 %499  ;;  %v474_v50 = vadd.f32 %v458_v63, %v373_v46  ;;  %v453_v46 = vmul.f32 %v3407_v57, %v3410_v58 }
  0xfc   : > { %v557_v61 = vmul.f32 %v3475_v30, %v500_v31  ;;  %911 = vperm.xlu0 %2965, %v3194_v5  }
  0xfd   : > { %v484_v36 = vadd.f32 %v468_v60, %v3402_v35 }
  0xfe   : > { %v3484_v19 = vadd.f32 %v557_v61, %v472_v3 }
  0xff   : > { %834 = vperm.xlu1 %2963, %v3212_v11   ;;  %v492_v23 = vpop.permute.xlu1 %491  ;;  %v508_v52 = vpop.permute.xlu0 %507 }
 0x100   : > { %v555_v37 = vmul.f32 %v3475_v30, %v492_v23  ;;  %v559_v38 = vmul.f32 %v3475_v30, %v508_v52  ;;  %919 = vperm.xlu0 %2965, %v3200_v7  }
 0x102   : > { %v571_v55 = vadd.f32 %v555_v37, %v3414_v41  ;;  %v3491_v44 = vadd.f32 %v559_v38, %v474_v50 }
 0x103   : > { %842 = vperm.xlu1 %2963, %v3218_v13   ;;  %v496_v5 = vpop.permute.xlu1 %495  ;;  %v516_v35 = vpop.permute.xlu0 %515 }
 0x104   : > { %v556_v56 = vmul.f32 %v3475_v30, %v496_v5  ;;  %v561_v17 = vmul.f32 %v3475_v30, %v516_v35  ;;  %927 = vperm.xlu0 %2965, %v3206_v9  }
 0x106   : > { %v3498_v62 = vadd.f32 %v556_v56, %v3421_v47  ;;  %v3500_v43 = vadd.f32 %v561_v17, %v476_v26 }
 0x107   : > { %850 = vperm.xlu1 %2963, %v3224_v15   ;;  %v504_v7 = vpop.permute.xlu1 %503  ;;  %v524_v41 = vpop.permute.xlu0 %523 }
 0x108   : > { %v558_v25 = vmul.f32 %v3475_v30, %v504_v7  ;;  %v563_v40 = vmul.f32 %v3475_v30, %v524_v41  ;;  %935 = vperm.xlu0 %2965, %v3212_v11  }
 0x10a   : > { %v574_v27 = vadd.f32 %v558_v25, %v3423_v48  ;;  %v3507_v2 = vadd.f32 %v563_v40, %v478_v51 }
 0x10b   : > { %2966 = vset.pattern.permute.xlu1 %v3105_v0  ;;  %v512_v9 = vpop.permute.xlu1 %511  ;;  %v532_v47 = vpop.permute.xlu0 %531 }
 0x10c   : > { %v560_v26 = vmul.f32 %v3475_v30, %v512_v9  ;;  %v565_v32 = vmul.f32 %v3475_v30, %v532_v47  ;;  %895 = vperm.xlu1 %2966, %v3190_v4   ;;  %943 = vperm.xlu0 %2965, %v3218_v13  }
 0x10e   : > { %v576_v29 = vadd.f32 %v560_v26, %v3428_v54  ;;  %v3514_v39 = vadd.f32 %v565_v32, %v480_v42 }
 0x10f   : > { %v520_v11 = vpop.permute.xlu1 %519  ;;  %v540_v60 = vpop.permute.xlu0 %539 }
 0x110   : > { %v562_v48 = vmul.f32 %v3475_v30, %v520_v11  ;;  %v567_v51 = vmul.f32 %v3475_v30, %v540_v60  ;;  %899 = vperm.xlu1 %2966, %v3182_v1   ;;  %951 = vperm.xlu0 %2965, %v3224_v15   ;;  %v3532_v1 = vld [vmem:[%s5064_s1 + $0x4] ss:$0 sm:$0xff]  ;;  %v246_v15 = vmul.f32 %v3279_v20, %v3287_v24 }
 0x112   : > { %v578_v0 = vadd.f32 %v562_v48, %v3433_v33  ;;  %v3521_v31 = vadd.f32 %v567_v51, %v482_v59 }
 0x113   : > { %v528_v4 = vpop.permute.xlu1 %527  ;;  %v548_v13 = vpop.permute.xlu0 %547 }
 0x114   : > { %v564_v54 = vmul.f32 %v3475_v30, %v528_v4  ;;  %v569_v42 = vmul.f32 %v3475_v30, %v548_v13  ;;  %907 = vperm.xlu1 %2966, %v3196_v6   ;;  %v352_v6 = vmul.f32 %v3349_v18, %v3352_v22  ;;  %v554_v18 = vmul.f32 %v3475_v30, %v3462_v34 }
 0x116   : > { %v580_v49 = vadd.f32 %v564_v54, %v3440_v45  ;;  %v3527_v3 = vadd.f32 %v569_v42, %v484_v36  ;;  %v267_v36 = vadd.f32 %v3284_v21, %v246_v15 }
 0x117   : > { %v536_v33 = vpop.permute.xlu1 %535 }
 0x118   : > { %v566_v59 = vmul.f32 %v3475_v30, %v536_v33  ;;  %915 = vperm.xlu1 %2966, %v3202_v8   ;;  %v593_v63 = vpop.permute.xlu0 %592  ;;  %v368_v52 = vadd.f32 %v352_v6, %v267_v36 }
 0x119   : > { %v656_v45 = vmul.f32 %v3532_v1, %v593_v63 }
 0x11a   : > { %v582_v61 = vadd.f32 %v566_v59, %v3447_v28  ;;  %v469_v21 = vadd.f32 %v453_v46, %v368_v52 }
 0x11b   : > { %v3545_v23 = vadd.f32 %v656_v45, %v571_v55  ;;  %v544_v20 = vpop.permute.xlu1 %543 }
 0x11c   : > { %v568_v24 = vmul.f32 %v3475_v30, %v544_v20  ;;  %923 = vperm.xlu1 %2966, %v3208_v10   ;;  %v605_v8 = vpop.permute.xlu0 %604  ;;  %v570_v37 = vadd.f32 %v554_v18, %v469_v21 }
 0x11d   : > { %v659_v22 = vmul.f32 %v3532_v1, %v605_v8 }
 0x11e   : > { %v584_v28 = vadd.f32 %v568_v24, %v3456_v53 }
 0x11f   : > { %v3553_v50 = vadd.f32 %v659_v22, %v574_v27 }
 0x120   : > { %931 = vperm.xlu1 %2966, %v3214_v12   ;;  %v589_v57 = vpop.permute.xlu1 %588  ;;  %v613_v58 = vpop.permute.xlu0 %612 }
 0x121   : > { %v655_v38 = vmul.f32 %v3532_v1, %v589_v57  ;;  %v661_v10 = vmul.f32 %v3532_v1, %v613_v58 }
 0x123   : > { %v3558_v55 = vadd.f32 %v655_v38, %v570_v37  ;;  %v3560_v5 = vadd.f32 %v661_v10, %v576_v29 }
 0x124   : > { %939 = vperm.xlu1 %2966, %v3220_v14   ;;  %v597_v34 = vpop.permute.xlu1 %596  ;;  %v621_v53 = vpop.permute.xlu0 %620 }
 0x125   : > { %v657_v30 = vmul.f32 %v3532_v1, %v597_v34  ;;  %v663_v35 = vmul.f32 %v3532_v1, %v621_v53 }
 0x127   : > { %v673_v12 = vadd.f32 %v657_v30, %v3498_v62  ;;  %v3566_v56 = vadd.f32 %v663_v35, %v578_v0 }
 0x128   : > { %947 = vperm.xlu1 %2966, %v3226_v16   ;;  %v601_v17 = vpop.permute.xlu1 %600  ;;  %v629_v7 = vpop.permute.xlu0 %628 }
 0x129   : > { %v658_v41 = vmul.f32 %v3532_v1, %v601_v17  ;;  %v665_v25 = vmul.f32 %v3532_v1, %v629_v7 }
 0x12b   : > { %v3572_v14 = vadd.f32 %v658_v41, %v3484_v19  ;;  %v3574_v40 = vadd.f32 %v665_v25, %v580_v49  ;;  %v3631_v25 = vld [vmem:[%s5064_s1 + $0x6] ss:$0 sm:$0xff] }
 0x12c   : > { %v609_v27 = vpop.permute.xlu1 %608  ;;  %v637_v9 = vpop.permute.xlu0 %636 }
 0x12d   : > { %v660_v47 = vmul.f32 %v3532_v1, %v609_v27  ;;  %v667_v62 = vmul.f32 %v3532_v1, %v637_v9 }
 0x12f   : > { %v676_v26 = vadd.f32 %v660_v47, %v3491_v44  ;;  %v3579_v16 = vadd.f32 %v667_v62, %v582_v61 }
 0x130   : > { %v617_v32 = vpop.permute.xlu1 %616  ;;  %v645_v29 = vpop.permute.xlu0 %644 }
 0x131   : > { %v662_v11 = vmul.f32 %v3532_v1, %v617_v32  ;;  %v669_v60 = vmul.f32 %v3532_v1, %v645_v29 }
 0x133   : > { %v678_v19 = vadd.f32 %v662_v11, %v3500_v43  ;;  %v3584_v48 = vadd.f32 %v669_v60, %v584_v28  ;;  %v3597_v43 = vld [vmem:[%s5064_s1 + $0x5] ss:$0 sm:$0xff] }
 0x134   : > { %v625_v51 = vpop.permute.xlu1 %624 }
 0x135   : > { %v664_v0 = vmul.f32 %v3532_v1, %v625_v51  ;;  %v3587_v4 = vpop.permute.xlu0 %689 }
 0x137   : > { %v680_v13 = vadd.f32 %v664_v0, %v3507_v2 }
 0x138   : > { %v633_v44 = vpop.permute.xlu1 %632 }
 0x139   : > { %v666_v54 = vmul.f32 %v3532_v1, %v633_v44  ;;  %v3591_v42 = vpop.permute.xlu0 %701 }
 0x13b   : > { %v682_v49 = vadd.f32 %v666_v54, %v3514_v39 }
 0x13c   : > { %v641_v15 = vpop.permute.xlu1 %640 }
 0x13d   : > { %v668_v33 = vmul.f32 %v3532_v1, %v641_v15  ;;  %v710_v59 = vpop.permute.xlu0 %709 }
 0x13e   : > { %v761_v63 = vmul.f32 %v3597_v43, %v710_v59 }
 0x13f   : > { %v684_v2 = vadd.f32 %v668_v33, %v3521_v31 }
 0x140   : > { %v3602_v6 = vadd.f32 %v761_v63, %v676_v26  ;;  %v649_v45 = vpop.permute.xlu1 %648 }
 0x141   : > { %v670_v61 = vmul.f32 %v3532_v1, %v649_v45  ;;  %v718_v36 = vpop.permute.xlu0 %717 }
 0x142   : > { %v763_v39 = vmul.f32 %v3597_v43, %v718_v36 }
 0x143   : > { %v686_v46 = vadd.f32 %v670_v61, %v3527_v3 }
 0x144   : > { %v3607_v20 = vadd.f32 %v763_v39, %v678_v19 }
 0x145   : > { %v694_v24 = vpop.permute.xlu1 %693  ;;  %v726_v8 = vpop.permute.xlu0 %725 }
 0x146   : > { %v757_v52 = vmul.f32 %v3597_v43, %v694_v24  ;;  %v765_v18 = vmul.f32 %v3597_v43, %v726_v8 }
 0x148   : > { %v773_v31 = vadd.f32 %v757_v52, %v3545_v23  ;;  %v3612_v22 = vadd.f32 %v765_v18, %v680_v13 }
 0x149   : > { %v698_v28 = vpop.permute.xlu1 %697  ;;  %v734_v21 = vpop.permute.xlu0 %733 }
 0x14a   : > { %v758_v1 = vmul.f32 %v3597_v43, %v698_v28  ;;  %v767_v57 = vmul.f32 %v3597_v43, %v734_v21 }
 0x14c   : > { %v774_v58 = vadd.f32 %v758_v1, %v673_v12  ;;  %v3616_v3 = vadd.f32 %v767_v57, %v682_v49  ;;  %v3671_v57 = vld [vmem:[%s5064_s1 + $0x7] ss:$0 sm:$0xff] }
 0x14d   : > { %v706_v37 = vpop.permute.xlu1 %705  ;;  %v742_v38 = vpop.permute.xlu0 %741 }
 0x14e   : > { %v760_v10 = vmul.f32 %v3597_v43, %v706_v37  ;;  %v769_v34 = vmul.f32 %v3597_v43, %v742_v38  ;;  %v759_v37 = vmul.f32 %v3597_v43, %v3591_v42 }
 0x150   : > { %v776_v53 = vadd.f32 %v760_v10, %v3553_v50  ;;  %v3621_v23 = vadd.f32 %v769_v34, %v684_v2 }
 0x151   : > { %v714_v30 = vpop.permute.xlu1 %713  ;;  %v750_v35 = vpop.permute.xlu0 %749 }
 0x152   : > { %v762_v17 = vmul.f32 %v3597_v43, %v714_v30  ;;  %v771_v7 = vmul.f32 %v3597_v43, %v750_v35  ;;  %v775_v35 = vadd.f32 %v759_v37, %v3572_v14 }
 0x154   : > { %v778_v12 = vadd.f32 %v762_v17, %v3560_v5  ;;  %v3626_v41 = vadd.f32 %v771_v7, %v686_v46 }
 0x155   : > { %v722_v27 = vpop.permute.xlu1 %721 }
 0x156   : > { %v764_v50 = vmul.f32 %v3597_v43, %v722_v27  ;;  %v795_v9 = vpop.permute.xlu0 %794 }
 0x157   : > { %v858_v47 = vmul.f32 %v3631_v25, %v795_v9 }
 0x158   : > { %v780_v62 = vadd.f32 %v764_v50, %v3566_v56 }
 0x159   : > { %v3636_v26 = vadd.f32 %v858_v47, %v773_v31  ;;  %v730_v32 = vpop.permute.xlu1 %729 }
 0x15a   : > { %v766_v5 = vmul.f32 %v3597_v43, %v730_v32  ;;  %v807_v29 = vpop.permute.xlu0 %806 }
 0x15b   : > { %v861_v11 = vmul.f32 %v3631_v25, %v807_v29 }
 0x15c   : > { %v782_v60 = vadd.f32 %v766_v5, %v3574_v40 }
 0x15d   : > { %v3641_v19 = vadd.f32 %v861_v11, %v776_v53  ;;  %v738_v51 = vpop.permute.xlu1 %737 }
 0x15e   : > { %v768_v0 = vmul.f32 %v3597_v43, %v738_v51  ;;  %v815_v13 = vpop.permute.xlu0 %814 }
 0x15f   : > { %v863_v44 = vmul.f32 %v3631_v25, %v815_v13 }
 0x160   : > { %v784_v56 = vadd.f32 %v768_v0, %v3579_v16 }
 0x161   : > { %v3646_v54 = vadd.f32 %v863_v44, %v778_v12  ;;  %v746_v49 = vpop.permute.xlu1 %745 }
 0x162   : > { %v770_v15 = vmul.f32 %v3597_v43, %v746_v49  ;;  %v823_v33 = vpop.permute.xlu0 %822 }
 0x163   : > { %v865_v59 = vmul.f32 %v3631_v25, %v823_v33 }
 0x164   : > { %v786_v40 = vadd.f32 %v770_v15, %v3584_v48  ;;  %v756_v48 = vmul.f32 %v3597_v43, %v3587_v4 }
 0x165   : > { %v3651_v63 = vadd.f32 %v865_v59, %v780_v62 }
 0x166   : > { %v791_v2 = vpop.permute.xlu1 %790  ;;  %v831_v45 = vpop.permute.xlu0 %830 }
 0x167   : > { %v867_v61 = vmul.f32 %v3631_v25, %v831_v45  ;;  %v857_v21 = vmul.f32 %v3631_v25, %v791_v2 }
 0x169   : > { %v3654_v36 = vadd.f32 %v867_v61, %v782_v60  ;;  %v3106_v61 = vmov 683565275  }
 0x16a   : > { %v799_v39 = vpop.permute.xlu1 %798  ;;  %v839_v16 = vpop.permute.xlu0 %838 }
 0x16b   : > { %v859_v46 = vmul.f32 %v3631_v25, %v799_v39  ;;  %v869_v24 = vmul.f32 %v3631_v25, %v839_v16  ;;  %v3107_v16 = vmov 2475754826  }
 0x16d   : > { %v3658_v8 = vadd.f32 %v859_v46, %v774_v58  ;;  %v3660_v52 = vadd.f32 %v869_v24, %v784_v56  ;;  %v772_v58 = vadd.f32 %v756_v48, %v3558_v55  ;;  %v3108_v48 = vmov 2131351028  }
 0x16e   : > { %v847_v18 = vpop.permute.xlu0 %846  ;;  %v803_v31 = vpop.permute.xlu1 %802 }
 0x16f   : > { %v871_v28 = vmul.f32 %v3631_v25, %v847_v18  ;;  %v873_v4 = vadd.f32 %v857_v21, %v772_v58  ;;  %v860_v34 = vmul.f32 %v3631_v25, %v803_v31  ;;  %v3109_v31 = vmov 2102212464  }
 0x170   : > { %v3110_v21 = vmov 920167782  }
 0x171   : > { %v3666_v1 = vadd.f32 %v871_v28, %v786_v40  ;;  %v876_v27 = vadd.f32 %v860_v34, %v775_v35 }
 0x172   : > { %v811_v53 = vpop.permute.xlu1 %810 }
 0x173   : > { %v892_v38 = vpop.permute.xlu0 %891  ;;  %v862_v7 = vmul.f32 %v3631_v25, %v811_v53  ;;  %v3111_v53 = vmov 1326507024  }
 0x174   : > { %v958_v10 = vmul.f32 %v3671_v57, %v892_v38 }
 0x175   : > { %v878_v62 = vadd.f32 %v862_v7, %v3602_v6 }
 0x176   : > { %v3678_v30 = vadd.f32 %v958_v10, %v873_v4 }
 0x177   : > { %v904_v17 = vpop.permute.xlu0 %903 }
 0x178   : > { %v990_v12 = vand.u32 2147483647, %v3678_v30  ;;  %v993_v55 = vand.u32 2139095040, %v3678_v30  ;;  %v961_v42 = vmul.f32 %v3671_v57, %v904_v17  ;;  %vm992_vm13 = vcmp.lt.s32.totalorder %v3678_v30, 0 }
 0x17a   : > { %v994_v43 = vshrl.u32 %v993_v55, 23  ;;  %v997_v50 = vand.u32 8388607, %v990_v12  ;;  %v3687_v9 = vadd.f32 %v961_v42, %v876_v27  ;;  %vm3815_vm14 = vcmp.le.f32.partialorder %v990_v12, 0.7853982 }
 0x17b   : > { %v912_v47 = vpop.permute.xlu0 %911 }
 0x17c   : > { %v2762_v14 = vadd.s32 4294967169, %v994_v43  ;;  %v963_v32 = vmul.f32 %v3671_v57, %v912_v47  ;;  %v1302_v5 = vand.u32 2147483647, %v3687_v9  ;;  %v1305_v29 = vand.u32 2139095040, %v3687_v9 }
 0x17d   : > { %v998_v51 = vor.u32 8388608, %v997_v50  ;;  %vm1304_vm15 = vcmp.lt.s32.totalorder %v3687_v9, 0 }
 0x17e   : > { %v1000_v11 = vadd.s32 1, %v2762_v14  ;;  %v3693_v60 = vadd.f32 %v963_v32, %v878_v62  ;;  %v1306_v0 = vshrl.u32 %v1305_v29, 23  ;;  %v1309_v13 = vand.u32 8388607, %v1302_v5 }
 0x17f   : > { %v3698_v33 = vshll.u32 %v998_v51, 8 }
 0x180   : > { %vm1001_vm0 = vcmp.gt.s32.totalorder %v1000_v11, 0  ;;  %v1513_v44 = vand.u32 2139095040, %v3693_v60  ;;  %v2774_v6 = vadd.s32 4294967169, %v1306_v0  ;;  %v1310_v59 = vor.u32 8388608, %v1309_v13 }
 0x181   : > { %v1002_v56 = vsel %vm1001_vm0, %v1000_v11, 0  ;;  %v1510_v40 = vand.u32 2147483647, %v3693_v60 }
 0x182   : > { %v1003_v49 = vshrl.u32 %v1002_v56, 5  ;;  %v1004_v15 = vand.u32 31, %v1002_v56  ;;  %v1514_v2 = vshrl.u32 %v1513_v44, 23  ;;  %v1312_v24 = vadd.s32 1, %v2774_v6 }
 0x184   : > { %v1005_v45 = vsub.s32 32, %v1004_v15  ;;  %v1007_v39 = vshll.u32 %v3106_v61, %v1004_v15  ;;  %v1010_v46 = vshll.u32 %v3107_v16, %v1004_v15  ;;  %v1013_v18 = vshll.u32 %v3108_v48, %v1004_v15 }
 0x185   : > { %v1016_v28 = vshll.u32 %v3109_v31, %v1004_v15  ;;  %v1019_v58 = vshll.u32 %v3110_v21, %v1004_v15  ;;  %vm1022_vm1 = vcmp.lt.s32.totalorder %v1003_v49, 1  ;;  %vm1023_vm2 = vcmp.lt.s32.totalorder %v1003_v49, 2 }
 0x186   : > { %v1008_v37 = vshrl.u32 %v3107_v16, %v1005_v45  ;;  %v1011_v38 = vshrl.u32 %v3108_v48, %v1005_v45  ;;  %v1014_v4 = vshrl.u32 %v3109_v31, %v1005_v45  ;;  %v1006_v10 = vshrl.u32 %v3106_v61, %v1005_v45 }
 0x187   : > { %v1017_v34 = vshrl.u32 %v3110_v21, %v1005_v45  ;;  %v1020_v35 = vshrl.u32 %v3111_v53, %v1005_v45  ;;  %vm1024_vm3 = vcmp.lt.s32.totalorder %v1003_v49, 3  ;;  %vm1313_vm4 = vcmp.gt.s32.totalorder %v1312_v24, 0 }
 0x188   : > { %v1009_v17 = vor.u32 %v1008_v37, %v1007_v39  ;;  %v1012_v7 = vor.u32 %v1011_v38, %v1010_v46  ;;  %v1015_v55 = vor.u32 %v1014_v4, %v1013_v18  ;;  %vm1025_vm5 = vcmp.lt.s32.totalorder %v1003_v49, 4 }
 0x189   : > { %v1018_v27 = vor.u32 %v1017_v34, %v1016_v28  ;;  %v1021_v42 = vor.u32 %v1020_v35, %v1019_v58  ;;  %v1314_v43 = vsel %vm1313_vm4, %v1312_v24, 0  ;;  %v3723_v45 = vshll.u32 %v1310_v59, 8 }
 0x18a   : > { %v1026_v50 = vsel %vm1022_vm1, %v1006_v10, %v1009_v17  ;;  %v1027_v47 = vsel %vm1025_vm5, %v1015_v55, 2102212464  ;;  %v1030_v62 = vsel %vm1022_vm1, %v1009_v17, %v1012_v7  ;;  %v1034_v14 = vsel %vm1022_vm1, %v1012_v7, %v1015_v55 }
 0x18b   : > { %v1028_v32 = vsel %vm1024_vm3, %v1012_v7, %v1027_v47  ;;  %v1031_v29 = vsel %vm1025_vm5, %v1018_v27, 920167782  ;;  %v1035_v11 = vsel %vm1025_vm5, %v1021_v42, 1326507024  ;;  %v3716_v51 = vshrl.u32 %v1314_v43, 5 }
 0x18c   : > { %v1029_v0 = vsel %vm1023_vm2, %v1026_v50, %v1028_v32  ;;  %v1032_v13 = vsel %vm1024_vm3, %v1015_v55, %v1031_v29  ;;  %v1036_v44 = vsel %vm1024_vm3, %v1018_v27, %v1035_v11  ;;  %v1316_v56 = vand.u32 31, %v1314_v43  ;;  %v819_v55 = vpop.permute.xlu1 %818 }
 0x18d   : > { %v1033_v6 = vsel %vm1023_vm2, %v1030_v62, %v1032_v13  ;;  %v1037_v15 = vsel %vm1023_vm2, %v1034_v14, %v1036_v44  ;;  %v1045_v28 = vmul.u32 %v3698_v33, %v1029_v0  ;;  %v2782_v37 = vadd.s32 4294967169, %v1514_v2 }
 0x18e   : > { %v3726_v39 = vmul.u32.u64.low %v3698_v33, %v1037_v15  ;;  %v3727_v46 = vmul.u32.u64.high %v3698_v33, %v1037_v15, %v3726_v39  ;;  %v3730_v24 = vmul.u32.u64.low %v3698_v33, %v1033_v6  ;;  %v3731_v18 = vmul.u32.u64.high %v3698_v33, %v1033_v6, %v3730_v24 }
 0x18f   : > { %v1317_v58 = vsub.s32 32, %v1316_v56  ;;  %v3737_v38 = vand.u32 8388607, %v1510_v40  ;;  %v1319_v49 = vshll.u32 %v3106_v61, %v1316_v56  ;;  %v1322_v59 = vshll.u32 %v3107_v16, %v1316_v56 }
 0x190   : > { %v1325_v4 = vshll.u32 %v3108_v48, %v1316_v56  ;;  %vm1334_vm6 = vcmp.lt.s32.totalorder %v3716_v51, 1  ;;  %v1328_v2 = vshll.u32 %v3109_v31, %v1316_v56  ;;  %vm1047_vm7 = vc.u32 %v3727_v46, %v3730_v24 }
 0x191   : > { %v1320_v10 = vshrl.u32 %v3107_v16, %v1317_v58  ;;  %v1323_v34 = vshrl.u32 %v3108_v48, %v1317_v58  ;;  %v1326_v33 = vshrl.u32 %v3109_v31, %v1317_v58  ;;  %v1048_v35 = vadd.s32 1, %v3731_v18 }
 0x192   : > { %v1329_v17 = vshrl.u32 %v3110_v21, %v1317_v58  ;;  %v1331_v7 = vshll.u32 %v3110_v21, %v1316_v56  ;;  %v1332_v50 = vshrl.u32 %v3111_v53, %v1317_v58  ;;  %vm1335_vm8 = vcmp.lt.s32.totalorder %v3716_v51, 2 }
 0x193   : > { %v1321_v27 = vor.u32 %v1320_v10, %v1319_v49  ;;  %v1324_v42 = vor.u32 %v1323_v34, %v1322_v59  ;;  %v1327_v43 = vor.u32 %v1326_v33, %v1325_v4  ;;  %v1049_v47 = vsel %vm1047_vm7, %v1048_v35, %v3731_v18  ;;  %v827_v33 = vpop.permute.xlu1 %826 }
 0x194   : > { %v1330_v62 = vor.u32 %v1329_v17, %v1328_v2  ;;  %vm1337_vm9 = vcmp.lt.s32.totalorder %v3716_v51, 4  ;;  %v1050_v14 = vadd.s32 %v1049_v47, %v1045_v28  ;;  %v1318_v32 = vshrl.u32 %v3106_v61, %v1317_v58  ;;  %v920_v17 = vpop.permute.xlu0 %919 }
 0x195   : > { %v1333_v29 = vor.u32 %v1332_v50, %v1331_v7  ;;  %v1339_v11 = vsel %vm1337_vm9, %v1327_v43, 2102212464  ;;  %vm1336_vm10 = vcmp.lt.s32.totalorder %v3716_v51, 3  ;;  %v1342_v0 = vsel %vm1334_vm6, %v1321_v27, %v1324_v42 }
 0x196   : > { %v1343_v13 = vsel %vm1337_vm9, %v1330_v62, 920167782  ;;  %v1346_v44 = vsel %vm1334_vm6, %v1324_v42, %v1327_v43  ;;  %v1051_v56 = vadd.s32 536870912, %v1050_v14  ;;  %v1338_v6 = vsel %vm1334_vm6, %v1318_v32, %v1321_v27 }
 0x197   : > { %v1344_v15 = vsel %vm1336_vm10, %v1327_v43, %v1343_v13  ;;  %v1347_v39 = vsel %vm1337_vm9, %v1333_v29, 1326507024  ;;  %v1340_v18 = vsel %vm1336_vm10, %v1324_v42, %v1339_v11  ;;  %v1520_v49 = vadd.s32 1, %v2782_v37 }
 0x198   : > { %v1345_v28 = vsel %vm1335_vm8, %v1342_v0, %v1344_v15  ;;  %v1348_v58 = vsel %vm1336_vm10, %v1330_v62, %v1347_v39  ;;  %v1052_v59 = vshrl.u32 %v1051_v56, 30  ;;  %v1341_v37 = vsel %vm1335_vm8, %v1338_v6, %v1340_v18 }
 0x199   : > { %v1349_v4 = vsel %vm1335_vm8, %v1346_v44, %v1348_v58  ;;  %v3769_v10 = vmul.u32.u64.low %v3723_v45, %v1345_v28  ;;  %v3770_v34 = vmul.u32.u64.high %v3723_v45, %v1345_v28, %v3769_v10  ;;  %vm1521_vm11 = vcmp.gt.s32.totalorder %v1520_v49, 0  ;;  %v928_v44 = vpop.permute.xlu0 %927 }
 0x19a   : > { %v3774_v2 = vmul.u32.u64.low %v3723_v45, %v1349_v4  ;;  %v3775_v35 = vmul.u32.u64.high %v3723_v45, %v1349_v4, %v3774_v2  ;;  %v1053_v7 = vshll.u32 %v1052_v59, 30  ;;  %v1522_v27 = vsel %vm1521_vm11, %v1520_v49, 0 }
 0x19b   : > { %v864_v42 = vmul.f32 %v3631_v25, %v819_v55  ;;  %v866_v43 = vmul.f32 %v3631_v25, %v827_v33  ;;  %v1524_v50 = vand.u32 31, %v1522_v27  ;;  %v1360_v62 = vadd.s32 1, %v3770_v34 }
 0x19c   : > { %v3781_v47 = vsub.s32 %v1050_v14, %v1053_v7  ;;  %v1518_v32 = vor.u32 8388608, %v3737_v38  ;;  %v1357_v29 = vmul.u32 %v3723_v45, %v1341_v37  ;;  %vm1359_vm12 = vc.u32 %v3775_v35, %v3769_v10 }
 0x19d   : > { %v1525_v11 = vsub.s32 32, %v1524_v50  ;;  %v1361_v0 = vsel %vm1359_vm12, %v1360_v62, %v3770_v34  ;;  %v880_v55 = vadd.f32 %v864_v42, %v3607_v20  ;;  %v3793_v13 = vadd.f32 %v866_v43, %v3612_v22 }
 0x19e   : > { %v1056_v51 = vsub.s32 0, %v3781_v47  ;;  %v1362_v14 = vadd.s32 %v1361_v0, %v1357_v29  ;;  %v1046_v45 = vadd.s32 %v3730_v24, %v3727_v46  ;;  %v1076_v56 = vsub.s32 4, %v1052_v59 }
 0x19f   : > { %v3798_v6 = vshll.u32 %v1518_v32, 8  ;;  %v1528_v39 = vshrl.u32 %v3107_v16, %v1525_v11  ;;  %v1531_v18 = vshrl.u32 %v3108_v48, %v1525_v11  ;;  %v965_v20 = vmul.f32 %v3671_v57, %v920_v17 }
 0x1a0   : > { %v2763_v38 = vmin.u32 %v1056_v51, %v3781_v47  ;;  %v1363_v15 = vadd.s32 536870912, %v1362_v14  ;;  %v1523_v58 = vshrl.u32 %v1522_v27, 5  ;;  %v1534_v22 = vshrl.u32 %v3109_v31, %v1525_v11 }
 0x1a1   : > { %v3805_v49 = vmul.f32 %v3671_v57, %v928_v44  ;;  %v1527_v24 = vshll.u32 %v3106_v61, %v1524_v50  ;;  %v1530_v4 = vshll.u32 %v3107_v16, %v1524_v50  ;;  %v1537_v34 = vshrl.u32 %v3110_v21, %v1525_v11 }
 0x1a2   : > { %v1058_v28 = vclz %v2763_v38  ;;  %v1364_v46 = vshrl.u32 %v1363_v15, 30  ;;  %v1533_v2 = vshll.u32 %v3108_v48, %v1524_v50  ;;  %v1536_v7 = vshll.u32 %v3109_v31, %v1524_v50 }
 0x1a3   : > { %v1540_v17 = vshrl.u32 %v3111_v53, %v1525_v11  ;;  %v1077_v27 = vsel %vm992_vm13, %v1076_v56, %v1052_v59  ;;  %v1529_v43 = vor.u32 %v1528_v39, %v1527_v24  ;;  %v1532_v62 = vor.u32 %v1531_v18, %v1530_v4 }
 0x1a4   : > { %v2764_v33 = vadd.s32 4294967294, %v1058_v28  ;;  %v1365_v42 = vshll.u32 %v1364_v46, 30  ;;  %v1535_v32 = vor.u32 %v1534_v22, %v1533_v2  ;;  %v1538_v29 = vor.u32 %v1537_v34, %v1536_v7 }
 0x1a5   : > { %v1539_v51 = vshll.u32 %v3110_v21, %v1524_v50  ;;  %v1388_v12 = vsub.s32 4, %v1364_v46  ;;  %vm1542_vm1 = vcmp.lt.s32.totalorder %v1523_v58, 1  ;;  %vm1544_vm2 = vcmp.lt.s32.totalorder %v1523_v58, 3 }
 0x1a6   : > { %vm2765_vm0 = vcmp.lt.s32.totalorder %v2764_v33, 0  ;;  %v3823_v44 = vsub.s32 %v1362_v14, %v1365_v42  ;;  %vm1545_vm3 = vcmp.lt.s32.totalorder %v1523_v58, 4  ;;  %v1550_v39 = vsel %vm1542_vm1, %v1529_v43, %v1532_v62 }
 0x1a7   : > { %v1061_v0 = vsel %vm2765_vm0, 0, %v2764_v33  ;;  %v1541_v28 = vor.u32 %v1540_v17, %v1539_v51  ;;  %v1547_v50 = vsel %vm1545_vm3, %v1535_v32, 2102212464  ;;  %v1551_v14 = vsel %vm1545_vm3, %v1538_v29, 920167782 }
 0x1a8   : > { %v1062_v38 = vsub.s32 32, %v1061_v0  ;;  %v1066_v15 = vsub.s32 4294967266, %v1061_v0  ;;  %v1063_v59 = vshll.u32 %v3781_v47, %v1061_v0  ;;  %v1368_v56 = vsub.s32 0, %v3823_v44 }
 0x1a9   : > { %vm3832_vm4 = vcmp.le.f32.partialorder %v1302_v5, 0.7853982  ;;  %v1526_v47 = vshrl.u32 %v3106_v61, %v1525_v11  ;;  %vm1543_vm5 = vcmp.lt.s32.totalorder %v1523_v58, 2  ;;  %v1552_v34 = vsel %vm1544_vm2, %v1535_v32, %v1551_v14 }
 0x1aa   : > { %v1064_v18 = vshrl.u32 %v1046_v45, %v1062_v38  ;;  %v1067_v22 = vadd.s32 127, %v1066_v15  ;;  %v2775_v4 = vmin.u32 %v1368_v56, %v3823_v44  ;;  %v1553_v2 = vsel %vm1543_vm5, %v1550_v39, %v1552_v34 }
 0x1ab   : > { %v3840_v7 = vadd.f32 %v965_v20, %v880_v55  ;;  %v1546_v42 = vsel %vm1542_vm1, %v1526_v47, %v1529_v43  ;;  %v1548_v5 = vsel %vm1544_vm2, %v1532_v62, %v1547_v50  ;;  %v1554_v51 = vsel %vm1542_vm1, %v1532_v62, %v1535_v32 }
 0x1ac   : > { %v1065_v33 = vor.u32 %v1064_v18, %v1063_v59  ;;  %v1068_v45 = vshll.u32 %v1067_v22, 23  ;;  %v1370_v17 = vclz %v2775_v4  ;;  %v1079_v11 = vsel %vm3815_vm14, 0, %v1077_v27 }
 0x1ad   : > { %v1389_v38 = vsel %vm1304_vm15, %v1388_v12, %v1364_v46  ;;  %v1555_v15 = vsel %vm1545_vm3, %v1541_v28, 1326507024  ;;  %v3852_v20 = vmul.u32.u64.low %v3798_v6, %v1553_v2  ;;  %v3853_v56 = vmul.u32.u64.high %v3798_v6, %v1553_v2, %v3852_v20 }
 0x1ae   : > { %v1069_v0 = vor.u32 4788187, %v1068_v45  ;;  %v2776_v59 = vadd.s32 4294967294, %v1370_v17  ;;  %v1556_v55 = vsel %vm1544_vm2, %v1538_v29, %v1555_v15  ;;  %v1072_v39 = vcvt.s32.f32 %v1065_v33 }
 0x1af   : > { %v1549_v62 = vsel %vm1543_vm5, %v1546_v42, %v1548_v5  ;;  %v1557_v32 = vsel %vm1543_vm5, %v1554_v51, %v1556_v55  ;;  %v1721_v46 = vand.u32 2139095040, %v3840_v7  ;;  %v1358_v29 = vadd.s32 %v3769_v10, %v3775_v35 }
 0x1b0   : > { %v1070_v43 = vand.u32 2147483647, %v1069_v0  ;;  %vm2777_vm6 = vcmp.lt.s32.totalorder %v2776_v59, 0  ;;  %v3858_v27 = vmul.u32.u64.low %v3798_v6, %v1557_v32  ;;  %v3859_v18 = vmul.u32.u64.high %v3798_v6, %v1557_v32, %v3858_v27 }
 0x1b1   : > { %v1373_v28 = vsel %vm2777_vm6, 0, %v2776_v59  ;;  %v1718_v22 = vand.u32 2147483647, %v3840_v7  ;;  %v1083_v50 = vadd.s32 3, %v1079_v11  ;;  %v1568_v58 = vadd.s32 1, %v3853_v56 }
 0x1b2   : > { %v1073_v12 = vmul.f32 %v1072_v39, %v1070_v43  ;;  %v1374_v14 = vsub.s32 32, %v1373_v28  ;;  %v1378_v4 = vsub.s32 4294967266, %v1373_v28  ;;  %v1391_v34 = vsel %vm3832_vm4, 0, %v1389_v38  ;;  %v835_v39 = vpop.permute.xlu1 %834 }
 0x1b3   : > { %v1565_v33 = vmul.u32 %v3798_v6, %v1549_v62  ;;  %v1722_v45 = vshrl.u32 %v1721_v46, 23  ;;  %v1375_v2 = vshll.u32 %v3823_v44, %v1373_v28  ;;  %vm1567_vm7 = vc.u32 %v3859_v18, %v3852_v20 }
 0x1b4   : > { %v1074_v47 = vxor.u32 2147483648, %v1073_v12  ;;  %v1376_v17 = vshrl.u32 %v1358_v29, %v1374_v14  ;;  %v1379_v42 = vadd.s32 127, %v1378_v4  ;;  %v1569_v35 = vsel %vm1567_vm7, %v1568_v58, %v3853_v56 }
 0x1b5   : > { %v2790_v5 = vadd.s32 4294967169, %v1722_v45  ;;  %v1725_v51 = vand.u32 8388607, %v1718_v22  ;;  %v1570_v44 = vadd.s32 %v1569_v35, %v1565_v33  ;;  %v3881_v15 = vadd.f32 %v3805_v49, %v3793_v13 }
 0x1b6   : > { %v1075_v10 = vsel %vm992_vm13, %v1074_v47, %v1073_v12  ;;  %v1377_v0 = vor.u32 %v1376_v17, %v1375_v2  ;;  %v1380_v11 = vshll.u32 %v1379_v42, 23  ;;  %v1084_v56 = vand.u32 3, %v1083_v50 }
 0x1b7   : > { %v1078_v6 = vsel %vm3815_vm14, %v3678_v30, %v1075_v10  ;;  %v1728_v38 = vadd.s32 1, %v2790_v5  ;;  %v1571_v55 = vadd.s32 536870912, %v1570_v44  ;;  %v1395_v43 = vadd.s32 3, %v1391_v34 }
 0x1b8   : > { %2967 = vcosq.f32 %v1078_v6  ;;  %v1381_v59 = vor.u32 4788187, %v1380_v11  ;;  %v1726_v62 = vor.u32 8388608, %v1725_v51  ;;  %v1384_v37 = vcvt.s32.f32 %v1377_v0 }
 0x1b9   : > { %2969 = vsinq.f32 %v1078_v6  ;;  %vm1729_vm8 = vcmp.gt.s32.totalorder %v1728_v38, 0  ;;  %v3883_v27 = vshrl.u32 %v1571_v55, 30  ;;  %v1929_v29 = vand.u32 2139095040, %v3881_v15 }
 0x1ba   : > { %v1382_v32 = vand.u32 2147483647, %v1381_v59  ;;  %v1730_v46 = vsel %vm1729_vm8, %v1728_v38, 0  ;;  %v3888_v49 = vmul.f32 %v3631_v25, %v835_v39  ;;  %vm1085_vm9 = vcmp.lt.s32.totalorder %v1084_v56, 2 }
 0x1bb   : > { %v1732_v12 = vand.u32 31, %v1730_v46  ;;  %v1573_v13 = vshll.u32 %v3883_v27, 30  ;;  %vm1086_vm10 = vcmp.eq.s32.totalorder %v1084_v56, 0  ;;  %vm1089_vm11 = vcmp.eq.s32.totalorder %v1084_v56, 2 }
 0x1bc   : > { %v1385_v28 = vmul.f32 %v1384_v37, %v1382_v32  ;;  %v3890_v50 = vand.u32 3, %v1395_v43  ;;  %vm1082_vm12 = vweird.f32 %v3678_v30  ;;  %v3894_v58 = vadd.s32 %v3852_v20, %v3859_v18 }
 0x1bd   : > { %v1733_v14 = vsub.s32 32, %v1732_v12  ;;  %v3896_v47 = vsub.s32 %v1570_v44, %v1573_v13  ;;  %v3898_v34 = vshll.u32 %v1726_v62, 8  ;;  %v3901_v33 = vshrl.u32 %v1730_v46, 5 }
 0x1be   : > { %v1386_v4 = vxor.u32 2147483648, %v1385_v28  ;;  %v1926_v2 = vand.u32 2147483647, %v3881_v15  ;;  %v1930_v17 = vshrl.u32 %v1929_v29, 23  ;;  %v1735_v51 = vshll.u32 %v3106_v61, %v1732_v12 }
 0x1bf   : > { %v1736_v45 = vshrl.u32 %v3107_v16, %v1733_v14  ;;  %v1576_v10 = vsub.s32 0, %v3896_v47  ;;  %v1739_v20 = vshrl.u32 %v3108_v48, %v1733_v14  ;;  %v1742_v18 = vshrl.u32 %v3109_v31, %v1733_v14 }
 0x1c0   : > { %v1387_v42 = vsel %vm1304_vm15, %v1386_v4, %v1385_v28  ;;  %v1738_v6 = vshll.u32 %v3107_v16, %v1732_v12  ;;  %v1745_v0 = vshrl.u32 %v3110_v21, %v1733_v14  ;;  %v1741_v59 = vshll.u32 %v3108_v48, %v1732_v12 }
 0x1c1   : > { %v1390_v5 = vsel %vm3832_vm4, %v3687_v9, %v1387_v42  ;;  %v2783_v38 = vmin.u32 %v1576_v10, %v3896_v47  ;;  %v1737_v43 = vor.u32 %v1736_v45, %v1735_v51  ;;  %v1744_v24 = vshll.u32 %v3109_v31, %v1732_v12 }
 0x1c2   : > { %v2968_v35 = vpop.eup %2967  ;;  %2971 = vcosq.f32 %v1390_v5  ;;  %v1740_v32 = vor.u32 %v1739_v20, %v1738_v6  ;;  %v1743_v37 = vor.u32 %v1742_v18, %v1741_v59  ;;  %vm1512_vm13 = vcmp.lt.s32.totalorder %v3693_v60, 0 }
 0x1c3   : > { %v2970_v11 = vpop.eup %2969  ;;  %v1090_v44 = vxor.u32 2147483648, %v2968_v35  ;;  %2973 = vsinq.f32 %v1390_v5  ;;  %v1578_v62 = vclz %v2783_v38  ;;  %v1746_v29 = vor.u32 %v1745_v0, %v1744_v24 }
 0x1c4   : > { %v1087_v55 = vxor.u32 2147483648, %v2970_v11  ;;  %v1747_v28 = vshll.u32 %v3110_v21, %v1732_v12  ;;  %v1748_v13 = vshrl.u32 %v3111_v53, %v1733_v14  ;;  %vm1401_vm14 = vcmp.eq.s32.totalorder %v3890_v50, 2 }
 0x1c5   : > { %v1091_v39 = vsel %vm1089_vm11, %v1090_v44, %v2970_v11  ;;  %v2784_v45 = vadd.s32 4294967294, %v1578_v62  ;;  %v1596_v42 = vsub.s32 4, %v3883_v27  ;;  %v1734_v10 = vshrl.u32 %v3106_v61, %v1733_v14 }
 0x1c6   : > { %v1088_v46 = vsel %vm1086_vm10, %v2968_v35, %v1087_v55  ;;  %vm1398_vm15 = vcmp.eq.s32.totalorder %v3890_v50, 0  ;;  %v1749_v18 = vor.u32 %v1748_v13, %v1747_v28  ;;  %vm1750_vm0 = vcmp.lt.s32.totalorder %v3901_v33, 1 }
 0x1c7   : > { %v1092_v4 = vsel %vm1085_vm9, %v1088_v46, %v1091_v39  ;;  %vm1753_vm1 = vcmp.lt.s32.totalorder %v3901_v33, 4  ;;  %vm1397_vm2 = vcmp.lt.s32.totalorder %v3890_v50, 2  ;;  %vm3941_vm3 = vcmp.le.f32.partialorder %v1510_v40, 0.7853982 }
 0x1c8   : > { %v1093_v20 = vsel %vm1082_vm12, nan, %v1092_v4  ;;  %vm2785_vm4 = vcmp.lt.s32.totalorder %v2784_v45, 0  ;;  %vm1751_vm5 = vcmp.lt.s32.totalorder %v3901_v33, 2  ;;  %vm1752_vm6 = vcmp.lt.s32.totalorder %v3901_v33, 3 }
 0x1c9   : > { %2654 = vst [vmem:[%s3935_s27] sm:$0xff] %v1093_v20  ;;  %v1755_v30 = vsel %vm1753_vm1, %v1743_v37, 2102212464  ;;  %vm1394_vm7 = vweird.f32 %v3687_v9  ;;  %v1581_v12 = vsel %vm2785_vm4, 0, %v2784_v45  ;;  %v1754_v14 = vsel %vm1750_vm0, %v1734_v10, %v1737_v43 }
 0x1ca   : > { %v1758_v40 = vsel %vm1750_vm0, %v1737_v43, %v1740_v32  ;;  %v1759_v35 = vsel %vm1753_vm1, %v1746_v29, 920167782  ;;  %v1582_v5 = vsub.s32 32, %v1581_v12  ;;  %v1586_v51 = vsub.s32 4294967266, %v1581_v12 }
 0x1cb   : > { %v1756_v6 = vsel %vm1752_vm6, %v1740_v32, %v1755_v30  ;;  %v1762_v0 = vsel %vm1750_vm0, %v1740_v32, %v1743_v37  ;;  %v1583_v11 = vshll.u32 %v3896_v47, %v1581_v12  ;;  %v1760_v44 = vsel %vm1752_vm6, %v1743_v37, %v1759_v35 }
 0x1cc   : > { %v1763_v38 = vsel %vm1753_vm1, %v1749_v18, 1326507024  ;;  %v2798_v59 = vadd.s32 4294967169, %v1930_v17  ;;  %v2972_v55 = vpop.eup %2971  ;;  %v1584_v43 = vshrl.u32 %v3894_v58, %v1582_v5  ;;  %v1587_v24 = vadd.s32 127, %v1586_v51 }
 0x1cd   : > { %v1761_v39 = vsel %vm1751_vm5, %v1758_v40, %v1760_v44  ;;  %v1764_v62 = vsel %vm1752_vm6, %v1746_v29, %v1763_v38  ;;  %v2974_v32 = vpop.eup %2973  ;;  %v1402_v46 = vxor.u32 2147483648, %v2972_v55  ;;  %v1597_v4 = vsel %vm1512_vm13, %v1596_v42, %v3883_v27 }
 0x1ce   : > { %v1765_v47 = vsel %vm1751_vm5, %v1762_v0, %v1764_v62  ;;  %v3973_v37 = vmul.u32.u64.low %v3898_v34, %v1761_v39  ;;  %v3974_v28 = vmul.u32.u64.high %v3898_v34, %v1761_v39, %v3973_v37  ;;  %v1399_v17 = vxor.u32 2147483648, %v2974_v32 }
 0x1cf   : > { %v1585_v13 = vor.u32 %v1584_v43, %v1583_v11  ;;  %v1588_v58 = vshll.u32 %v1587_v24, 23  ;;  %v1403_v29 = vsel %vm1401_vm14, %v1402_v46, %v2974_v32  ;;  %v1936_v20 = vadd.s32 1, %v2798_v59  ;;  %v843_v46 = vpop.permute.xlu1 %842 }
 0x1d0   : > { %v3983_v45 = vmul.u32.u64.low %v3898_v34, %v1765_v47  ;;  %v3984_v10 = vmul.u32.u64.high %v3898_v34, %v1765_v47, %v3983_v45  ;;  %v1400_v18 = vsel %vm1398_vm15, %v2972_v55, %v1399_v17  ;;  %v1757_v12 = vsel %vm1751_vm5, %v1754_v14, %v1756_v6 }
 0x1d1   : > { %v1589_v30 = vor.u32 4788187, %v1588_v58  ;;  %v1933_v40 = vand.u32 8388607, %v1926_v2  ;;  %v1404_v27 = vsel %vm1397_vm2, %v1400_v18, %v1403_v29  ;;  %v1599_v42 = vsel %vm3941_vm3, 0, %v1597_v4  ;;  %v936_v18 = vpop.permute.xlu0 %935 }
 0x1d2   : > { %v1776_v35 = vadd.s32 1, %v3974_v28  ;;  %vm1937_vm8 = vcmp.gt.s32.totalorder %v1936_v20, 0  ;;  %v1405_v5 = vsel %vm1394_vm7, nan, %v1404_v27  ;;  %v1592_v0 = vcvt.s32.f32 %v1585_v13 }
 0x1d3   : > { %v1590_v51 = vand.u32 2147483647, %v1589_v30  ;;  %v1938_v11 = vsel %vm1937_vm8, %v1936_v20, 0  ;;  %2657 = vst [vmem:[%s3935_s27 + $0x18] sm:$0xff] %v1405_v5  ;;  %v1773_v33 = vmul.u32 %v3898_v34, %v1757_v12  ;;  %vm1775_vm9 = vc.u32 %v3984_v10, %v3973_v37 }
 0x1d4   : > { %v1940_v50 = vand.u32 31, %v1938_v11  ;;  %v1603_v6 = vadd.s32 3, %v1599_v42  ;;  %v884_v44 = vadd.f32 %v3888_v49, %v3616_v3  ;;  %v1777_v38 = vsel %vm1775_vm9, %v1776_v35, %v3974_v28 }
 0x1d5   : > { %v1593_v14 = vmul.f32 %v1592_v0, %v1590_v51  ;;  %v1778_v59 = vadd.s32 %v1777_v38, %v1773_v33  ;;  %v1934_v9 = vor.u32 8388608, %v1933_v40  ;;  %v4006_v55 = vshrl.u32 %v1938_v11, 5  ;;  %v4036_v11 = vpop.permute.xlu1 %850 }
 0x1d6   : > { %v1941_v43 = vsub.s32 32, %v1940_v50  ;;  %v1943_v39 = vshll.u32 %v3106_v61, %v1940_v50  ;;  %v1946_v34 = vshll.u32 %v3107_v16, %v1940_v50  ;;  %v1949_v62 = vshll.u32 %v3108_v48, %v1940_v50 }
 0x1d7   : > { %v1594_v24 = vxor.u32 2147483648, %v1593_v14  ;;  %v1779_v32 = vadd.s32 536870912, %v1778_v59  ;;  %v1952_v49 = vshll.u32 %v3109_v31, %v1940_v50  ;;  %v4023_v30 = vmul.f32 %v3631_v25, %v843_v46 }
 0x1d8   : > { %v1944_v47 = vshrl.u32 %v3107_v16, %v1941_v43  ;;  %v1947_v3 = vshrl.u32 %v3108_v48, %v1941_v43  ;;  %v1950_v17 = vshrl.u32 %v3109_v31, %v1941_v43  ;;  %v1953_v13 = vshrl.u32 %v3110_v21, %v1941_v43 }
 0x1d9   : > { %v1595_v28 = vsel %vm1512_vm13, %v1594_v24, %v1593_v14  ;;  %v1956_v58 = vshrl.u32 %v3111_v53, %v1941_v43  ;;  %v1780_v29 = vshrl.u32 %v1779_v32, 30  ;;  %v1955_v40 = vshll.u32 %v3110_v21, %v1940_v50 }
 0x1da   : > { %v1598_v4 = vsel %vm3941_vm3, %v3693_v60, %v1595_v28  ;;  %v1945_v45 = vor.u32 %v1944_v47, %v1943_v39  ;;  %v1948_v20 = vor.u32 %v1947_v3, %v1946_v34  ;;  %v1954_v12 = vor.u32 %v1953_v13, %v1952_v49  ;;  %v896_v28 = vpop.permute.xlu1 %895 }
 0x1db   : > { %2975 = vcosq.f32 %v1598_v4  ;;  %vm1720_vm10 = vcmp.lt.s32.totalorder %v3840_v7, 0  ;;  %v1781_v27 = vshll.u32 %v1780_v29, 30  ;;  %v1951_v42 = vor.u32 %v1950_v17, %v1949_v62 }
 0x1dc   : > { %2977 = vsinq.f32 %v1598_v4  ;;  %v1604_v35 = vand.u32 3, %v1603_v6  ;;  %v1957_v5 = vor.u32 %v1956_v58, %v1955_v40  ;;  %vm1958_vm11 = vcmp.lt.s32.totalorder %v4006_v55, 1 }
 0x1dd   : > { %v969_v56 = vmul.f32 %v3671_v57, %v936_v18  ;;  %v4029_v51 = vsub.s32 %v1778_v59, %v1781_v27  ;;  %vm1961_vm12 = vcmp.lt.s32.totalorder %v4006_v55, 4  ;;  %v1966_v25 = vsel %vm1958_vm11, %v1945_v45, %v1948_v20 }
 0x1de   : > { %v4034_v0 = vshll.u32 %v1934_v9, 8  ;;  %v1942_v33 = vshrl.u32 %v3106_v61, %v1941_v43  ;;  %vm1959_vm13 = vcmp.lt.s32.totalorder %v4006_v55, 2  ;;  %vm1960_vm14 = vcmp.lt.s32.totalorder %v4006_v55, 3 }
 0x1df   : > { %v1967_v50 = vsel %vm1961_vm12, %v1954_v12, 920167782  ;;  %v1784_v14 = vsub.s32 0, %v4029_v51  ;;  %v1963_v6 = vsel %vm1961_vm12, %v1951_v42, 2102212464  ;;  %v1970_v59 = vsel %vm1958_vm11, %v1948_v20, %v1951_v42 }
 0x1e0   : > { %v1968_v38 = vsel %vm1960_vm14, %v1951_v42, %v1967_v50  ;;  %v1804_v24 = vsub.s32 4, %v1780_v29  ;;  %v1971_v39 = vsel %vm1961_vm12, %v1957_v5, 1326507024  ;;  %v4046_v34 = vadd.f32 %v969_v56, %v884_v44 }
 0x1e1   : > { %v1969_v9 = vsel %vm1959_vm13, %v1966_v25, %v1968_v38  ;;  %vm1602_vm15 = vweird.f32 %v3693_v60  ;;  %vm4051_vm0 = vcmp.le.f32.partialorder %v1718_v22, 0.7853982  ;;  %v2791_v62 = vmin.u32 %v1784_v14, %v4029_v51 }
 0x1e2   : > { %v1962_v32 = vsel %vm1958_vm11, %v1942_v33, %v1945_v45  ;;  %v1972_v46 = vsel %vm1960_vm14, %v1954_v12, %v1971_v39  ;;  %v1964_v47 = vsel %vm1960_vm14, %v1948_v20, %v1963_v6  ;;  %vm1605_vm1 = vcmp.lt.s32.totalorder %v1604_v35, 2 }
 0x1e3   : > { %v1973_v3 = vsel %vm1959_vm13, %v1970_v59, %v1972_v46  ;;  %v4061_v44 = vmul.u32.u64.low %v4034_v0, %v1969_v9  ;;  %v4062_v49 = vmul.u32.u64.high %v4034_v0, %v1969_v9, %v4061_v44  ;;  %vm1606_vm2 = vcmp.eq.s32.totalorder %v1604_v35, 0 }
 0x1e4   : > { %vm1609_vm3 = vcmp.eq.s32.totalorder %v1604_v35, 2  ;;  %v1786_v22 = vclz %v2791_v62  ;;  %v1805_v13 = vsel %vm1720_vm10, %v1804_v24, %v1780_v29  ;;  %v2137_v45 = vand.u32 2139095040, %v4046_v34 }
 0x1e5   : > { %v2976_v17 = vpop.eup %2975  ;;  %v4067_v58 = vmul.u32.u64.low %v4034_v0, %v1973_v3  ;;  %v4068_v4 = vmul.u32.u64.high %v4034_v0, %v1973_v3, %v4067_v58  ;;  %v1965_v40 = vsel %vm1959_vm13, %v1962_v32, %v1964_v47  ;;  %v2134_v27 = vand.u32 2147483647, %v4046_v34 }
 0x1e6   : > { %v2978_v20 = vpop.eup %2977  ;;  %v1610_v18 = vxor.u32 2147483648, %v2976_v17  ;;  %v2792_v12 = vadd.s32 4294967294, %v1786_v22  ;;  %v1984_v5 = vadd.s32 1, %v4062_v49  ;;  %v2138_v56 = vshrl.u32 %v2137_v45, 23 }
 0x1e7   : > { %v1607_v42 = vxor.u32 2147483648, %v2978_v20  ;;  %v959_v29 = vmul.f32 %v3671_v57, %v896_v28  ;;  %v1774_v33 = vadd.s32 %v3973_v37, %v3984_v10  ;;  %v1807_v50 = vsel %vm4051_vm0, 0, %v1805_v13  ;;  %v944_v13 = vpop.permute.xlu0 %943 }
 0x1e8   : > { %v1611_v25 = vsel %vm1609_vm3, %v1610_v18, %v2978_v20  ;;  %vm2793_vm4 = vcmp.lt.s32.totalorder %v2792_v12, 0  ;;  %v1981_v6 = vmul.u32 %v4034_v0, %v1965_v40  ;;  %vm1983_vm5 = vc.u32 %v4068_v4, %v4061_v44 }
 0x1e9   : > { %v1608_v55 = vsel %vm1606_vm2, %v2976_v17, %v1607_v42  ;;  %v1789_v14 = vsel %vm2793_vm4, 0, %v2792_v12  ;;  %v2141_v9 = vand.u32 8388607, %v2134_v27  ;;  %v1985_v10 = vsel %vm1983_vm5, %v1984_v5, %v4062_v49 }
 0x1ea   : > { %v1612_v38 = vsel %vm1605_vm1, %v1608_v55, %v1611_v25  ;;  %v1790_v59 = vsub.s32 32, %v1789_v14  ;;  %v1794_v24 = vsub.s32 4294967266, %v1789_v14  ;;  %v2806_v39 = vadd.s32 4294967169, %v2138_v56 }
 0x1eb   : > { %v1613_v37 = vsel %vm1602_vm15, nan, %v1612_v38  ;;  %v4091_v62 = vadd.f32 %v959_v29, %v3636_v26  ;;  %v1791_v0 = vshll.u32 %v4029_v51, %v1789_v14  ;;  %v1986_v46 = vadd.s32 %v1985_v10, %v1981_v6 }
 0x1ec   : > { %2659 = vst [vmem:[%s3935_s27 + $0x28] sm:$0xff] %v1613_v37  ;;  %v1792_v32 = vshrl.u32 %v1774_v33, %v1790_v59  ;;  %v1795_v35 = vadd.s32 127, %v1794_v24  ;;  %v1811_v47 = vadd.s32 3, %v1807_v50  ;;  %v2144_v3 = vadd.s32 1, %v2806_v39 }
 0x1ed   : > { %v1987_v17 = vadd.s32 536870912, %v1986_v46  ;;  %v4097_v60 = vadd.f32 %v4023_v30, %v3621_v23  ;;  %v2142_v49 = vor.u32 8388608, %v2141_v9  ;;  %v1097_v51 = vand.u32 2139095040, %v4091_v62 }
 0x1ee   : > { %v1793_v22 = vor.u32 %v1792_v32, %v1791_v0  ;;  %v1796_v28 = vshll.u32 %v1795_v35, 23  ;;  %vm2145_vm6 = vcmp.gt.s32.totalorder %v2144_v3, 0  ;;  %v4100_v20 = vand.u32 3, %v1811_v47 }
 0x1ef   : > { %v1988_v58 = vshrl.u32 %v1987_v17, 30  ;;  %v2146_v45 = vsel %vm2145_vm6, %v2144_v3, 0  ;;  %vm1928_vm7 = vcmp.lt.s32.totalorder %v3881_v15, 0  ;;  %v4104_v12 = vmul.f32 %v3671_v57, %v944_v13 }
 0x1f0   : > { %v1797_v26 = vor.u32 4788187, %v1796_v28  ;;  %v2148_v18 = vand.u32 31, %v2146_v45  ;;  %v1800_v42 = vcvt.s32.f32 %v1793_v22  ;;  %vm4108_vm8 = vcmp.le.f32.partialorder %v1926_v2, 0.7853982 }
 0x1f1   : > { %v4113_v30 = vadd.s32 %v4061_v44, %v4068_v4  ;;  %v1989_v5 = vshll.u32 %v1988_v58, 30  ;;  %v2012_v56 = vsub.s32 4, %v1988_v58  ;;  %v4115_v25 = vshll.u32 %v2142_v49, 8 }
 0x1f2   : > { %v1798_v40 = vand.u32 2147483647, %v1797_v26  ;;  %v2149_v29 = vsub.s32 32, %v2148_v18  ;;  %v1094_v33 = vand.u32 2147483647, %v4091_v62  ;;  %v2147_v55 = vshrl.u32 %v2146_v45, 5 }
 0x1f3   : > { %v4118_v50 = vsub.s32 %v1986_v46, %v1989_v5  ;;  %v1098_v14 = vshrl.u32 %v1097_v51, 23  ;;  %v2151_v2 = vshll.u32 %v3106_v61, %v2148_v18  ;;  %v2154_v38 = vshll.u32 %v3107_v16, %v2148_v18 }
 0x1f4   : > { %v1801_v57 = vmul.f32 %v1800_v42, %v1798_v40  ;;  %v2152_v6 = vshrl.u32 %v3107_v16, %v2149_v29  ;;  %v2155_v44 = vshrl.u32 %v3108_v48, %v2149_v29  ;;  %v2157_v24 = vshll.u32 %v3108_v48, %v2148_v18 }
 0x1f5   : > { %v1992_v59 = vsub.s32 0, %v4118_v50  ;;  %v2158_v9 = vshrl.u32 %v3109_v31, %v2149_v29  ;;  %v2013_v37 = vsel %vm1928_vm7, %v2012_v56, %v1988_v58  ;;  %v2160_v39 = vshll.u32 %v3109_v31, %v2148_v18 }
 0x1f6   : > { %v1802_v4 = vxor.u32 2147483648, %v1801_v57  ;;  %v2153_v10 = vor.u32 %v2152_v6, %v2151_v2  ;;  %v2161_v0 = vshrl.u32 %v3110_v21, %v2149_v29  ;;  %v2156_v46 = vor.u32 %v2155_v44, %v2154_v38 }
 0x1f7   : > { %v2799_v35 = vmin.u32 %v1992_v59, %v4118_v50  ;;  %v2163_v47 = vshll.u32 %v3110_v21, %v2148_v18  ;;  %v2159_v22 = vor.u32 %v2158_v9, %v2157_v24  ;;  %v2164_v17 = vshrl.u32 %v3111_v53, %v2149_v29 }
 0x1f8   : > { %v1803_v32 = vsel %vm1720_vm10, %v1802_v4, %v1801_v57  ;;  %v2162_v28 = vor.u32 %v2161_v0, %v2160_v39  ;;  %v2766_v49 = vadd.s32 4294967169, %v1098_v14  ;;  %v4141_v26 = vand.u32 8388607, %v1094_v33 }
 0x1f9   : > { %v1806_v3 = vsel %vm4051_vm0, %v3840_v7, %v1803_v32  ;;  %v1994_v13 = vclz %v2799_v35  ;;  %v2015_v58 = vsel %vm4108_vm8, 0, %v2013_v37  ;;  %v2150_v45 = vshrl.u32 %v3106_v61, %v2149_v29 }
 0x1fa   : > { %2979 = vcosq.f32 %v1806_v3  ;;  %v2165_v51 = vor.u32 %v2164_v17, %v2163_v47  ;;  %vm2166_vm9 = vcmp.lt.s32.totalorder %v2147_v55, 1  ;;  %vm2168_vm10 = vcmp.lt.s32.totalorder %v2147_v55, 3 }
 0x1fb   : > { %2981 = vsinq.f32 %v1806_v3  ;;  %v2800_v43 = vadd.s32 4294967294, %v1994_v13  ;;  %vm2169_vm11 = vcmp.lt.s32.totalorder %v2147_v55, 4  ;;  %v2174_v40 = vsel %vm2166_vm9, %v2153_v10, %v2156_v46 }
 0x1fc   : > { %v2171_v18 = vsel %vm2169_vm11, %v2159_v22, 2102212464  ;;  %v2175_v42 = vsel %vm2169_vm11, %v2162_v28, 920167782  ;;  %v2178_v5 = vsel %vm2166_vm9, %v2156_v46, %v2159_v22  ;;  %vm2167_vm13 = vcmp.lt.s32.totalorder %v2147_v55, 2 }
 0x1fd   : > { %vm2801_vm12 = vcmp.lt.s32.totalorder %v2800_v43, 0  ;;  %v2176_v56 = vsel %vm2168_vm10, %v2159_v22, %v2175_v42  ;;  %v2179_v57 = vsel %vm2169_vm11, %v2165_v51, 1326507024  ;;  %v2170_v2 = vsel %vm2166_vm9, %v2150_v45, %v2153_v10 }
 0x1fe   : > { %v1997_v14 = vsel %vm2801_vm12, 0, %v2800_v43  ;;  %v2177_v6 = vsel %vm2167_vm13, %v2174_v40, %v2176_v56  ;;  %v2180_v29 = vsel %vm2168_vm10, %v2162_v28, %v2179_v57  ;;  %vm1813_vm14 = vcmp.lt.s32.totalorder %v4100_v20, 2 }
 0x1ff   : > { %v1998_v38 = vsub.s32 32, %v1997_v14  ;;  %v2002_v44 = vsub.s32 4294967266, %v1997_v14  ;;  %v2172_v4 = vsel %vm2168_vm10, %v2156_v46, %v2171_v18  ;;  %v2181_v59 = vsel %vm2167_vm13, %v2178_v5, %v2180_v29 }
 0x200   : > { %vm1810_vm15 = vweird.f32 %v3840_v7  ;;  %v4154_v24 = vmul.u32.u64.low %v4115_v25, %v2181_v59  ;;  %v4155_v9 = vmul.u32.u64.high %v4115_v25, %v2181_v59, %v4154_v24  ;;  %v1999_v39 = vshll.u32 %v4118_v50, %v1997_v14 }
 0x201   : > { %v4158_v37 = vmul.u32.u64.low %v4115_v25, %v2177_v6  ;;  %v4159_v10 = vmul.u32.u64.high %v4115_v25, %v2177_v6, %v4158_v37  ;;  %v2000_v0 = vshrl.u32 %v4113_v30, %v1998_v38  ;;  %v2003_v32 = vadd.s32 127, %v2002_v44 }
 0x202   : > { %v1104_v35 = vadd.s32 1, %v2766_v49  ;;  %vm1814_vm0 = vcmp.eq.s32.totalorder %v4100_v20, 0  ;;  %vm1817_vm1 = vcmp.eq.s32.totalorder %v4100_v20, 2  ;;  %v2173_v46 = vsel %vm2167_vm13, %v2170_v2, %v2172_v4 }
 0x203   : > { %v4169_v47 = vadd.f32 %v4104_v12, %v4097_v60  ;;  %v2001_v22 = vor.u32 %v2000_v0, %v1999_v39  ;;  %v2004_v28 = vshll.u32 %v2003_v32, 23  ;;  %v1102_v17 = vor.u32 8388608, %v4141_v26 }
 0x204   : > { %v2980_v3 = vpop.eup %2979  ;;  %vm1105_vm2 = vcmp.gt.s32.totalorder %v1104_v35, 0  ;;  %v2019_v13 = vadd.s32 3, %v2015_v58  ;;  %vm2191_vm3 = vc.u32 %v4155_v9, %v4158_v37  ;;  %v2192_v49 = vadd.s32 1, %v4159_v10 }
 0x205   : > { %v2982_v50 = vpop.eup %2981  ;;  %v1818_v30 = vxor.u32 2147483648, %v2980_v3  ;;  %v2005_v45 = vor.u32 4788187, %v2004_v28  ;;  %v2189_v51 = vmul.u32 %v4115_v25, %v2173_v46  ;;  %v1106_v60 = vsel %vm1105_vm2, %v1104_v35, 0 }
 0x206   : > { %v1815_v55 = vxor.u32 2147483648, %v2982_v50  ;;  %v2193_v43 = vsel %vm2191_vm3, %v2192_v49, %v4159_v10  ;;  %v1108_v26 = vand.u32 31, %v1106_v60  ;;  %v2342_v18 = vand.u32 2147483647, %v4169_v47 }
 0x207   : > { %v1819_v12 = vsel %vm1817_vm1, %v1818_v30, %v2982_v50  ;;  %v2006_v40 = vand.u32 2147483647, %v2005_v45  ;;  %v2008_v42 = vcvt.s32.f32 %v2001_v22  ;;  %v2194_v5 = vadd.s32 %v2193_v43, %v2189_v51 }
 0x208   : > { %v1816_v58 = vsel %vm1814_vm0, %v2980_v3, %v1815_v55  ;;  %v4184_v25 = vand.u32 3, %v2019_v13  ;;  %v1109_v57 = vsub.s32 32, %v1108_v26  ;;  %v2345_v14 = vand.u32 2139095040, %v4169_v47 }
 0x209   : > { %v1820_v56 = vsel %vm1813_vm14, %v1816_v58, %v1819_v12  ;;  %v2009_v6 = vmul.f32 %v2008_v42, %v2006_v40  ;;  %vm2136_vm4 = vcmp.lt.s32.totalorder %v4046_v34, 0  ;;  %v2195_v29 = vadd.s32 536870912, %v2194_v5 }
 0x20a   : > { %v1821_v2 = vsel %vm1810_vm15, nan, %v1820_v56  ;;  %v1111_v38 = vshll.u32 %v3106_v61, %v1108_v26  ;;  %v1112_v44 = vshrl.u32 %v3107_v16, %v1109_v57  ;;  %v1114_v20 = vshll.u32 %v3107_v16, %v1108_v26 }
 0x20b   : > { %2661 = vst [vmem:[%s3935_s27 + $0x38] sm:$0xff] %v1821_v2  ;;  %v1115_v4 = vshrl.u32 %v3108_v48, %v1109_v57  ;;  %v1118_v59 = vshrl.u32 %v3109_v31, %v1109_v57  ;;  %v2010_v24 = vxor.u32 2147483648, %v2009_v6  ;;  %v2196_v10 = vshrl.u32 %v2195_v29, 30 }
 0x20c   : > { %v1117_v7 = vshll.u32 %v3108_v48, %v1108_v26  ;;  %v1121_v39 = vshrl.u32 %v3110_v21, %v1109_v57  ;;  %v1107_v0 = vshrl.u32 %v1106_v60, 5  ;;  %v1113_v32 = vor.u32 %v1112_v44, %v1111_v38 }
 0x20d   : > { %v1116_v35 = vor.u32 %v1115_v4, %v1114_v20  ;;  %v1120_v46 = vshll.u32 %v3109_v31, %v1108_v26  ;;  %v2011_v3 = vsel %vm1928_vm7, %v2010_v24, %v2009_v6  ;;  %v2197_v22 = vshll.u32 %v2196_v10, 30 }
 0x20e   : > { %v1119_v28 = vor.u32 %v1118_v59, %v1117_v7  ;;  %v1123_v50 = vshll.u32 %v3110_v21, %v1108_v26  ;;  %v2014_v30 = vsel %vm4108_vm8, %v3881_v15, %v2011_v3  ;;  %v2220_v13 = vsub.s32 4, %v2196_v10 }
 0x20f   : > { %v1122_v49 = vor.u32 %v1121_v39, %v1120_v46  ;;  %v1124_v55 = vshrl.u32 %v3111_v53, %v1109_v57  ;;  %2983 = vcosq.f32 %v2014_v30  ;;  %v4206_v45 = vsub.s32 %v2194_v5, %v2197_v22 }
 0x210   : > { %v4208_v51 = vshll.u32 %v1102_v17, 8  ;;  %v2346_v60 = vshrl.u32 %v2345_v14, 23  ;;  %2985 = vsinq.f32 %v2014_v30  ;;  %v1110_v12 = vshrl.u32 %v3106_v61, %v1109_v57 }
 0x211   : > { %v1125_v43 = vor.u32 %v1124_v55, %v1123_v50  ;;  %vm1129_vm5 = vcmp.lt.s32.totalorder %v1107_v0, 4  ;;  %v2200_v26 = vsub.s32 0, %v4206_v45  ;;  %vm1126_vm6 = vcmp.lt.s32.totalorder %v1107_v0, 1 }
 0x212   : > { %vm1127_vm7 = vcmp.lt.s32.totalorder %v1107_v0, 2  ;;  %v1131_v23 = vsel %vm1129_vm5, %v1119_v28, 2102212464  ;;  %v2221_v58 = vsel %vm2136_vm4, %v2220_v13, %v2196_v10  ;;  %vm1128_vm8 = vcmp.lt.s32.totalorder %v1107_v0, 3 }
 0x213   : > { %v1134_v40 = vsel %vm1126_vm6, %v1113_v32, %v1116_v35  ;;  %v1135_v42 = vsel %vm1129_vm5, %v1122_v49, 920167782  ;;  %v2807_v17 = vmin.u32 %v2200_v26, %v4206_v45  ;;  %v1130_v5 = vsel %vm1126_vm6, %v1110_v12, %v1113_v32 }
 0x214   : > { %v1132_v56 = vsel %vm1128_vm8, %v1116_v35, %v1131_v23  ;;  %v1136_v57 = vsel %vm1128_vm8, %v1119_v28, %v1135_v42  ;;  %v1138_v2 = vsel %vm1126_vm6, %v1116_v35, %v1119_v28  ;;  %v1139_v6 = vsel %vm1129_vm5, %v1125_v43, 1326507024 }
 0x215   : > { %v1137_v14 = vsel %vm1127_vm7, %v1134_v40, %v1136_v57  ;;  %v2814_v29 = vadd.s32 4294967169, %v2346_v60  ;;  %vm2021_vm9 = vcmp.lt.s32.totalorder %v4184_v25, 2  ;;  %vm2022_vm10 = vcmp.eq.s32.totalorder %v4184_v25, 0 }
 0x216   : > { %vm4222_vm11 = vcmp.le.f32.partialorder %v2134_v27, 0.7853982  ;;  %v2202_v44 = vclz %v2807_v17  ;;  %v1140_v4 = vsel %vm1128_vm8, %v1122_v49, %v1139_v6  ;;  %v1133_v7 = vsel %vm1127_vm7, %v1130_v5, %v1132_v56 }
 0x217   : > { %v2223_v20 = vsel %vm4222_vm11, 0, %v2221_v58  ;;  %v4230_v59 = vmul.u32.u64.low %v4208_v51, %v1137_v14  ;;  %v4231_v24 = vmul.u32.u64.high %v4208_v51, %v1137_v14, %v4230_v59  ;;  %v1141_v39 = vsel %vm1127_vm7, %v1138_v2, %v1140_v4  ;;  %v3031_v14 = vld [vmem:[%s5064_s1 + $0x6] ss:$0 sm:$0xff] }
 0x218   : > { %v2808_v10 = vadd.s32 4294967294, %v2202_v44  ;;  %v2352_v27 = vadd.s32 1, %v2814_v29  ;;  %vm2025_vm12 = vcmp.eq.s32.totalorder %v4184_v25, 2  ;;  %v2349_v46 = vand.u32 8388607, %v2342_v18 }
 0x219   : > { %v4238_v32 = vmul.u32.u64.low %v4208_v51, %v1141_v39  ;;  %v4239_v35 = vmul.u32.u64.high %v4208_v51, %v1141_v39, %v4238_v32  ;;  %v2984_v3 = vpop.eup %2983  ;;  %v2190_v22 = vadd.s32 %v4158_v37, %v4155_v9  ;;  %v2227_v28 = vadd.s32 3, %v2223_v20 }
 0x21a   : > { %vm2809_vm13 = vcmp.lt.s32.totalorder %v2808_v10, 0  ;;  %vm2353_vm14 = vcmp.gt.s32.totalorder %v2352_v27, 0  ;;  %v2986_v50 = vpop.eup %2985  ;;  %v2026_v0 = vxor.u32 2147483648, %v2984_v3  ;;  %v1149_v13 = vmul.u32 %v4208_v51, %v1133_v7 }
 0x21b   : > { %v2205_v30 = vsel %vm2809_vm13, 0, %v2808_v10  ;;  %v1152_v49 = vadd.s32 1, %v4231_v24  ;;  %v2023_v55 = vxor.u32 2147483648, %v2986_v50  ;;  %v2354_v43 = vsel %vm2353_vm14, %v2352_v27, 0 }
 0x21c   : > { %v2206_v60 = vsub.s32 32, %v2205_v30  ;;  %v2210_v12 = vsub.s32 4294967266, %v2205_v30  ;;  %v2027_v26 = vsel %vm2025_vm12, %v2026_v0, %v2986_v50  ;;  %v2207_v9 = vshll.u32 %v4206_v45, %v2205_v30  ;;  %v900_v50 = vpop.permute.xlu1 %899  ;;  %v952_v0 = vpop.permute.xlu0 %951 }
 0x21d   : > { %vm1151_vm15 = vc.u32 %v4239_v35, %v4230_v59  ;;  %v2350_v37 = vor.u32 8388608, %v2349_v46  ;;  %v2024_v23 = vsel %vm2022_vm10, %v2984_v3, %v2023_v55  ;;  %vm2018_vm0 = vweird.f32 %v3881_v15 }
 0x21e   : > { %v2208_v51 = vshrl.u32 %v2190_v22, %v2206_v60  ;;  %v2211_v58 = vadd.s32 127, %v2210_v12  ;;  %v1153_v40 = vsel %vm1151_vm15, %v1152_v49, %v4231_v24  ;;  %v2028_v42 = vsel %vm2021_vm9, %v2024_v23, %v2027_v26  ;;  %v4287_v23 = vld [vmem:[%s5064_s1 + $0x7] ss:$0 sm:$0xff] }
 0x21f   : > { %v1154_v17 = vadd.s32 %v1153_v40, %v1149_v13  ;;  %v2356_v5 = vand.u32 31, %v2354_v43  ;;  %v2029_v56 = vsel %vm2018_vm0, nan, %v2028_v42  ;;  %v872_v2 = vmul.f32 %v3031_v14, %v4036_v11 }
 0x220   : > { %v2209_v45 = vor.u32 %v2208_v51, %v2207_v9  ;;  %v2212_v57 = vshll.u32 %v2211_v58, 23  ;;  %2663 = vst [vmem:[%s3935_s27 + $0x48] sm:$0xff] %v2029_v56  ;;  %v4263_v20 = vand.u32 3, %v2227_v28  ;;  %v4265_v15 = vshrl.u32 %v2354_v43, 5 }
 0x221   : > { %v1155_v6 = vadd.s32 536870912, %v1154_v17  ;;  %v2357_v29 = vsub.s32 32, %v2356_v5  ;;  %v4267_v25 = vshll.u32 %v2350_v37, 8  ;;  %v2368_v11 = vshll.u32 %v3109_v31, %v2356_v5 }
 0x222   : > { %v2213_v44 = vor.u32 4788187, %v2212_v57  ;;  %v2216_v4 = vcvt.s32.f32 %v2209_v45  ;;  %v2359_v3 = vshll.u32 %v3106_v61, %v2356_v5  ;;  %v2362_v22 = vshll.u32 %v3107_v16, %v2356_v5 }
 0x223   : > { %v4269_v24 = vshrl.u32 %v1155_v6, 30  ;;  %v2360_v10 = vshrl.u32 %v3107_v16, %v2357_v29  ;;  %v2363_v7 = vshrl.u32 %v3108_v48, %v2357_v29  ;;  %v2366_v27 = vshrl.u32 %v3109_v31, %v2357_v29 }
 0x224   : > { %v2214_v39 = vand.u32 2147483647, %v2213_v44  ;;  %v2369_v32 = vshrl.u32 %v3110_v21, %v2357_v29  ;;  %v2365_v28 = vshll.u32 %v3108_v48, %v2356_v5  ;;  %v2371_v49 = vshll.u32 %v3110_v21, %v2356_v5 }
 0x225   : > { %v1157_v46 = vshll.u32 %v4269_v24, 30  ;;  %v2372_v55 = vshrl.u32 %v3111_v53, %v2357_v29  ;;  %v2361_v12 = vor.u32 %v2360_v10, %v2359_v3  ;;  %v2364_v43 = vor.u32 %v2363_v7, %v2362_v22 }
 0x226   : > { %v2217_v30 = vmul.f32 %v2216_v4, %v2214_v39  ;;  %v2370_v13 = vor.u32 %v2369_v32, %v2368_v11  ;;  %v2367_v26 = vor.u32 %v2366_v27, %v2365_v28  ;;  %v960_v51 = vmul.f32 %v4287_v23, %v900_v50 }
 0x227   : > { %v4282_v60 = vsub.s32 %v1154_v17, %v1157_v46  ;;  %v2373_v37 = vor.u32 %v2372_v55, %v2371_v49  ;;  %v973_v58 = vmul.f32 %v4287_v23, %v952_v0  ;;  %vm2374_vm1 = vcmp.lt.s32.totalorder %v4265_v15, 1 }
 0x228   : > { %v2218_v9 = vxor.u32 2147483648, %v2217_v30  ;;  %vm2375_vm2 = vcmp.lt.s32.totalorder %v4265_v15, 2  ;;  %vm2377_vm3 = vcmp.lt.s32.totalorder %v4265_v15, 4  ;;  %v2358_v17 = vshrl.u32 %v3106_v61, %v2357_v29 }
 0x229   : > { %v1160_v40 = vsub.s32 0, %v4282_v60  ;;  %vm2376_vm5 = vcmp.lt.s32.totalorder %v4265_v15, 3  ;;  %v2383_v5 = vsel %vm2377_vm3, %v2370_v13, 920167782  ;;  %v2379_v57 = vsel %vm2377_vm3, %v2367_v26, 2102212464 }
 0x22a   : > { %v2219_v42 = vsel %vm2136_vm4, %v2218_v9, %v2217_v30  ;;  %v2382_v14 = vsel %vm2374_vm1, %v2361_v12, %v2364_v43  ;;  %v2384_v6 = vsel %vm2376_vm5, %v2367_v26, %v2383_v5  ;;  %v2386_v29 = vsel %vm2374_vm1, %v2364_v43, %v2367_v26 }
 0x22b   : > { %v2222_v56 = vsel %vm4222_vm11, %v4046_v34, %v2219_v42  ;;  %v2767_v45 = vmin.u32 %v1160_v40, %v4282_v60  ;;  %v2387_v44 = vsel %vm2377_vm3, %v2373_v37, 1326507024  ;;  %v1180_v10 = vsub.s32 4, %v4269_v24 }
 0x22c   : > { %2987 = vcosq.f32 %v2222_v56  ;;  %v2378_v38 = vsel %vm2374_vm1, %v2358_v17, %v2361_v12  ;;  %v2380_v7 = vsel %vm2376_vm5, %v2364_v43, %v2379_v57  ;;  %v2385_v39 = vsel %vm2375_vm2, %v2382_v14, %v2384_v6 }
 0x22d   : > { %2989 = vsinq.f32 %v2222_v56  ;;  %v1162_v4 = vclz %v2767_v45  ;;  %v2388_v27 = vsel %vm2376_vm5, %v2370_v13, %v2387_v44  ;;  %v4319_v11 = vadd.f32 %v960_v51, %v3658_v8 }
 0x22e   : > { %v2389_v46 = vsel %vm2375_vm2, %v2386_v29, %v2388_v27  ;;  %v4324_v3 = vmul.u32.u64.low %v4267_v25, %v2385_v39  ;;  %v4325_v22 = vmul.u32.u64.high %v4267_v25, %v2385_v39, %v4324_v3  ;;  %v888_v28 = vadd.f32 %v872_v2, %v3626_v41 }
 0x22f   : > { %v2768_v32 = vadd.s32 4294967294, %v1162_v4  ;;  %vm1096_vm4 = vcmp.lt.s32.totalorder %v4091_v62, 0  ;;  %v4331_v50 = vmul.u32.u64.low %v4267_v25, %v2389_v46  ;;  %v4332_v0 = vmul.u32.u64.high %v4267_v25, %v2389_v46, %v4331_v50 }
 0x230   : > { %vm4336_vm6 = vcmp.le.f32.partialorder %v1094_v33, 0.7853982  ;;  %v2381_v30 = vsel %vm2375_vm2, %v2378_v38, %v2380_v7  ;;  %v1201_v13 = vand.u32 2139095040, %v4319_v11  ;;  %vm2229_vm8 = vcmp.lt.s32.totalorder %v4263_v20, 2 }
 0x231   : > { %vm2769_vm7 = vcmp.lt.s32.totalorder %v2768_v32, 0  ;;  %v1150_v41 = vadd.s32 %v4230_v59, %v4239_v35  ;;  %v1181_v49 = vsel %vm1096_vm4, %v1180_v10, %v4269_v24  ;;  %v1198_v33 = vand.u32 2147483647, %v4319_v11 }
 0x232   : > { %v1165_v2 = vsel %vm2769_vm7, 0, %v2768_v32  ;;  %vm2226_vm9 = vweird.f32 %v4046_v34  ;;  %v2400_v15 = vadd.s32 1, %v4325_v22  ;;  %v4352_v43 = vadd.f32 %v973_v58, %v888_v28  ;;  %v908_v28 = vpop.permute.xlu1 %907 }
 0x233   : > { %v1166_v55 = vsub.s32 32, %v1165_v2  ;;  %v1170_v12 = vsub.s32 4294967266, %v1165_v2  ;;  %vm2233_vm10 = vcmp.eq.s32.totalorder %v4263_v20, 2  ;;  %v2397_v26 = vmul.u32 %v4267_v25, %v2381_v30 }
 0x234   : > { %vm2399_vm11 = vc.u32 %v4332_v0, %v4324_v3  ;;  %v1202_v59 = vshrl.u32 %v1201_v13, 23  ;;  %v1167_v35 = vshll.u32 %v4282_v60, %v1165_v2  ;;  %v1183_v40 = vsel %vm4336_vm6, 0, %v1181_v49 }
 0x235   : > { %v1168_v24 = vshrl.u32 %v1150_v41, %v1166_v55  ;;  %v1171_v9 = vadd.s32 127, %v1170_v12  ;;  %v2401_v37 = vsel %vm2399_vm11, %v2400_v15, %v4325_v22  ;;  %v1205_v17 = vand.u32 8388607, %v1198_v33 }
 0x236   : > { %v2988_v51 = vpop.eup %2987  ;;  %v2402_v58 = vadd.s32 %v2401_v37, %v2397_v26  ;;  %v2770_v42 = vadd.s32 4294967169, %v1202_v59  ;;  %v2550_v57 = vand.u32 2147483647, %v4352_v43  ;;  %v2553_v29 = vand.u32 2139095040, %v4352_v43 }
 0x237   : > { %v2990_v25 = vpop.eup %2989  ;;  %v2234_v5 = vxor.u32 2147483648, %v2988_v51  ;;  %v1169_v56 = vor.u32 %v1168_v24, %v1167_v35  ;;  %v1172_v45 = vshll.u32 %v1171_v9, 23  ;;  %vm2230_vm12 = vcmp.eq.s32.totalorder %v4263_v20, 0 }
 0x238   : > { %v2231_v60 = vxor.u32 2147483648, %v2990_v25  ;;  %v2403_v14 = vadd.s32 536870912, %v2402_v58  ;;  %v1208_v6 = vadd.s32 1, %v2770_v42  ;;  %v1187_v10 = vadd.s32 3, %v1183_v40 }
 0x239   : > { %v2235_v44 = vsel %vm2233_vm10, %v2234_v5, %v2990_v25  ;;  %v1173_v4 = vor.u32 4788187, %v1172_v45  ;;  %v1206_v39 = vor.u32 8388608, %v1205_v17  ;;  %v1176_v46 = vcvt.s32.f32 %v1169_v56 }
 0x23a   : > { %v2232_v38 = vsel %vm2230_vm12, %v2988_v51, %v2231_v60  ;;  %v2404_v7 = vshrl.u32 %v2403_v14, 30  ;;  %vm1209_vm13 = vcmp.gt.s32.totalorder %v1208_v6, 0  ;;  %v2554_v13 = vshrl.u32 %v2553_v29, 23 }
 0x23b   : > { %v2236_v27 = vsel %vm2229_vm8, %v2232_v38, %v2235_v44  ;;  %v1174_v32 = vand.u32 2147483647, %v1173_v4  ;;  %v1210_v22 = vsel %vm1209_vm13, %v1208_v6, 0  ;;  %v4375_v41 = vand.u32 8388607, %v2550_v57 }
 0x23c   : > { %v2237_v50 = vsel %vm2226_vm9, nan, %v2236_v27  ;;  %v2405_v30 = vshll.u32 %v2404_v7, 30  ;;  %vm2344_vm14 = vcmp.lt.s32.totalorder %v4169_v47, 0  ;;  %v1212_v49 = vand.u32 31, %v1210_v22 }
 0x23d   : > { %2665 = vst [vmem:[%s3935_s27 + $0x58] sm:$0xff] %v2237_v50  ;;  %v1177_v2 = vmul.f32 %v1176_v46, %v1174_v32  ;;  %v4379_v20 = vand.u32 3, %v1187_v10  ;;  %v2398_v55 = vadd.s32 %v4324_v3, %v4332_v0  ;;  %v4386_v34 = vmul.f32 %v4287_v23, %v908_v28 }
 0x23e   : > { %v4383_v12 = vsub.s32 %v2402_v58, %v2405_v30  ;;  %v2428_v26 = vsub.s32 4, %v2404_v7  ;;  %v4388_v59 = vshrl.u32 %v1210_v22, 5  ;;  %v1213_v35 = vsub.s32 32, %v1212_v49 }
 0x23f   : > { %v1178_v15 = vxor.u32 2147483648, %v1177_v2  ;;  %v4391_v9 = vshll.u32 %v1206_v39, 8  ;;  %v2822_v37 = vadd.s32 4294967169, %v2554_v13  ;;  %v2558_v51 = vor.u32 8388608, %v4375_v41 }
 0x240   : > { %v2408_v24 = vsub.s32 0, %v4383_v12  ;;  %v1215_v0 = vshll.u32 %v3106_v61, %v1212_v49  ;;  %v1216_v40 = vshrl.u32 %v3107_v16, %v1213_v35  ;;  %v1219_v58 = vshrl.u32 %v3108_v48, %v1213_v35 }
 0x241   : > { %v1179_v3 = vsel %vm1096_vm4, %v1178_v15, %v1177_v2  ;;  %v1218_v25 = vshll.u32 %v3107_v16, %v1212_v49  ;;  %v1222_v5 = vshrl.u32 %v3109_v31, %v1213_v35  ;;  %v4407_v56 = vsel %vm2344_vm14, %v2428_v26, %v2404_v7 }
 0x242   : > { %v1182_v42 = vsel %vm4336_vm6, %v4091_v62, %v1179_v3  ;;  %v2815_v17 = vmin.u32 %v2408_v24, %v4383_v12  ;;  %v1221_v45 = vshll.u32 %v3108_v48, %v1212_v49  ;;  %vm1230_vm15 = vcmp.lt.s32.totalorder %v4388_v59, 1 }
 0x243   : > { %2991 = vcosq.f32 %v1182_v42  ;;  %v1217_v14 = vor.u32 %v1216_v40, %v1215_v0  ;;  %v1220_v8 = vor.u32 %v1219_v58, %v1218_v25  ;;  %v1214_v6 = vshrl.u32 %v3106_v61, %v1213_v35 }
 0x244   : > { %2993 = vsinq.f32 %v1182_v42  ;;  %v2410_v60 = vclz %v2815_v17  ;;  %v1223_v29 = vor.u32 %v1222_v5, %v1221_v45  ;;  %v1224_v44 = vshll.u32 %v3109_v31, %v1212_v49 }
 0x245   : > { %v1225_v4 = vshrl.u32 %v3110_v21, %v1213_v35  ;;  %vm4416_vm0 = vcmp.le.f32.partialorder %v2342_v18, 0.7853982  ;;  %v1227_v7 = vshll.u32 %v3110_v21, %v1212_v49  ;;  %v1228_v39 = vshrl.u32 %v3111_v53, %v1213_v35 }
 0x246   : > { %v2816_v38 = vadd.s32 4294967294, %v2410_v60  ;;  %vm1233_vm1 = vcmp.lt.s32.totalorder %v4388_v59, 4  ;;  %vm1193_vm2 = vcmp.eq.s32.totalorder %v4379_v20, 2  ;;  %vm1231_vm3 = vcmp.lt.s32.totalorder %v4388_v59, 2 }
 0x247   : > { %v1226_v27 = vor.u32 %v1225_v4, %v1224_v44  ;;  %vm1232_vm5 = vcmp.lt.s32.totalorder %v4388_v59, 3  ;;  %v1235_v18 = vsel %vm1233_vm1, %v1223_v29, 2102212464  ;;  %vm1190_vm4 = vcmp.eq.s32.totalorder %v4379_v20, 0 }
 0x248   : > { %vm2817_vm6 = vcmp.lt.s32.totalorder %v2816_v38, 0  ;;  %v1229_v32 = vor.u32 %v1228_v39, %v1227_v7  ;;  %v1234_v46 = vsel %vm1230_vm15, %v1214_v6, %v1217_v14  ;;  %v1238_v22 = vsel %vm1230_vm15, %v1217_v14, %v1220_v8 }
 0x249   : > { %vm1189_vm7 = vcmp.lt.s32.totalorder %v4379_v20, 2  ;;  %v2413_v28 = vsel %vm2817_vm6, 0, %v2816_v38  ;;  %v1236_v50 = vsel %vm1232_vm5, %v1220_v8, %v1235_v18  ;;  %v1239_v30 = vsel %vm1233_vm1, %v1226_v27, 920167782 }
 0x24a   : > { %v2560_v13 = vadd.s32 1, %v2822_v37  ;;  %vm1186_vm8 = vweird.f32 %v4091_v62  ;;  %v2414_v2 = vsub.s32 32, %v2413_v28  ;;  %v2418_v49 = vsub.s32 4294967266, %v2413_v28 }
 0x24b   : > { %v1240_v15 = vsel %vm1232_vm5, %v1223_v29, %v1239_v30  ;;  %v1242_v26 = vsel %vm1230_vm15, %v1220_v8, %v1223_v29  ;;  %v2415_v35 = vshll.u32 %v4383_v12, %v2413_v28  ;;  %v1243_v3 = vsel %vm1233_vm1, %v1229_v32, 1326507024 }
 0x24c   : > { %v1241_v24 = vsel %vm1231_vm3, %v1238_v22, %v1240_v15  ;;  %vm2561_vm9 = vcmp.gt.s32.totalorder %v2560_v13, 0  ;;  %v2416_v37 = vshrl.u32 %v2398_v55, %v2414_v2  ;;  %v2419_v0 = vadd.s32 127, %v2418_v49 }
 0x24d   : > { %v1244_v40 = vsel %vm1232_vm5, %v1226_v27, %v1243_v3  ;;  %v2562_v58 = vsel %vm2561_vm9, %v2560_v13, 0  ;;  %v2992_v42 = vpop.eup %2991  ;;  %v1237_v17 = vsel %vm1231_vm3, %v1234_v46, %v1236_v50  ;;  %v2431_v29 = vsel %vm4416_vm0, 0, %v4407_v56 }
 0x24e   : > { %v1245_v12 = vsel %vm1231_vm3, %v1242_v26, %v1244_v40  ;;  %v4455_v25 = vmul.u32.u64.low %v4391_v9, %v1241_v24  ;;  %v4456_v5 = vmul.u32.u64.high %v4391_v9, %v1241_v24, %v4455_v25  ;;  %v2994_v45 = vpop.eup %2993  ;;  %v1194_v60 = vxor.u32 2147483648, %v2992_v42 }
 0x24f   : > { %v2417_v55 = vor.u32 %v2416_v37, %v2415_v35  ;;  %v2420_v14 = vshll.u32 %v2419_v0, 23  ;;  %v2564_v8 = vand.u32 31, %v2562_v58  ;;  %v1191_v6 = vxor.u32 2147483648, %v2994_v45 }
 0x250   : > { %v4463_v44 = vmul.u32.u64.low %v4391_v9, %v1245_v12  ;;  %v4464_v4 = vmul.u32.u64.high %v4391_v9, %v1245_v12, %v4463_v44  ;;  %v1195_v59 = vsel %vm1193_vm2, %v1194_v60, %v2994_v45  ;;  %v1253_v7 = vmul.u32 %v4391_v9, %v1237_v17 }
 0x251   : > { %v2421_v38 = vor.u32 4788187, %v2420_v14  ;;  %v2565_v39 = vsub.s32 32, %v2564_v8  ;;  %v1192_v27 = vsel %vm1190_vm4, %v2992_v42, %v1191_v6  ;;  %v2424_v18 = vcvt.s32.f32 %v2417_v55 }
 0x252   : > { %v1256_v32 = vadd.s32 1, %v4456_v5  ;;  %v4472_v46 = vshrl.u32 %v2562_v58, 5  ;;  %v1196_v56 = vsel %vm1189_vm7, %v1192_v27, %v1195_v59  ;;  %v2567_v28 = vshll.u32 %v3106_v61, %v2564_v8 }
 0x253   : > { %v2422_v22 = vand.u32 2147483647, %v2421_v38  ;;  %v2568_v50 = vshrl.u32 %v3107_v16, %v2565_v39  ;;  %v1197_v9 = vsel %vm1186_vm8, nan, %v1196_v56  ;;  %vm1255_vm10 = vc.u32 %v4464_v4, %v4455_v25 }
 0x254   : > { %v2570_v30 = vshll.u32 %v3107_v16, %v2564_v8  ;;  %v2571_v13 = vshrl.u32 %v3108_v48, %v2565_v39  ;;  %2655 = vst [vmem:[%s3935_s27 + $0x8] sm:$0xff] %v1197_v9  ;;  %v1257_v20 = vsel %vm1255_vm10, %v1256_v32, %v4456_v5  ;;  %v2573_v15 = vshll.u32 %v3108_v48, %v2564_v8 }
 0x255   : > { %v2425_v2 = vmul.f32 %v2424_v18, %v2422_v22  ;;  %v2569_v49 = vor.u32 %v2568_v50, %v2567_v28  ;;  %v1258_v26 = vadd.s32 %v1257_v20, %v1253_v7  ;;  %v2574_v24 = vshrl.u32 %v3109_v31, %v2565_v39 }
 0x256   : > { %v2572_v35 = vor.u32 %v2571_v13, %v2570_v30  ;;  %v2576_v62 = vshll.u32 %v3109_v31, %v2564_v8  ;;  %v2577_v37 = vshrl.u32 %v3110_v21, %v2565_v39  ;;  %v2579_v0 = vshll.u32 %v3110_v21, %v2564_v8 }
 0x257   : > { %v2426_v3 = vxor.u32 2147483648, %v2425_v2  ;;  %v2580_v40 = vshrl.u32 %v3111_v53, %v2565_v39  ;;  %v1259_v58 = vadd.s32 536870912, %v1258_v26  ;;  %v2575_v42 = vor.u32 %v2574_v24, %v2573_v15 }
 0x258   : > { %v2598_v17 = vshll.u32 %v2558_v51, 8  ;;  %v4496_v12 = vadd.f32 %v4386_v34, %v3641_v19  ;;  %v2435_v45 = vadd.s32 3, %v2431_v29  ;;  %v2578_v60 = vor.u32 %v2577_v37, %v2576_v62  ;;  %v916_v62 = vpop.permute.xlu1 %915 }
 0x259   : > { %v2427_v5 = vsel %vm2344_vm14, %v2426_v3, %v2425_v2  ;;  %v2581_v55 = vor.u32 %v2580_v40, %v2579_v0  ;;  %v1260_v8 = vshrl.u32 %v1259_v58, 30  ;;  %vm2582_vm11 = vcmp.lt.s32.totalorder %v4472_v46, 1 }
 0x25a   : > { %v2430_v14 = vsel %vm4416_vm0, %v4169_v47, %v2427_v5  ;;  %vm2585_vm12 = vcmp.lt.s32.totalorder %v4472_v46, 4  ;;  %v2566_v41 = vshrl.u32 %v3106_v61, %v2565_v39  ;;  %v2590_v19 = vsel %vm2582_vm11, %v2569_v49, %v2572_v35 }
 0x25b   : > { %2995 = vcosq.f32 %v2430_v14  ;;  %v2591_v34 = vsel %vm2585_vm12, %v2578_v60, 920167782  ;;  %v1261_v51 = vshll.u32 %v1260_v8, 30  ;;  %vm2584_vm13 = vcmp.lt.s32.totalorder %v4472_v46, 3 }
 0x25c   : > { %2997 = vsinq.f32 %v2430_v14  ;;  %v2587_v6 = vsel %vm2585_vm12, %v2575_v42, 2102212464  ;;  %vm2583_vm14 = vcmp.lt.s32.totalorder %v4472_v46, 2  ;;  %v2592_v29 = vsel %vm2584_vm13, %v2575_v42, %v2591_v34 }
 0x25d   : > { %v2594_v10 = vsel %vm2582_vm11, %v2572_v35, %v2575_v42  ;;  %v2595_v44 = vsel %vm2585_vm12, %v2581_v55, 1326507024  ;;  %v4508_v59 = vsub.s32 %v1258_v26, %v1261_v51  ;;  %v2586_v38 = vsel %vm2582_vm11, %v2566_v41, %v2569_v49 }
 0x25e   : > { %v2593_v7 = vsel %vm2583_vm14, %v2590_v19, %v2592_v29  ;;  %v2596_v27 = vsel %vm2584_vm13, %v2578_v60, %v2595_v44  ;;  %v2588_v39 = vsel %vm2584_vm13, %v2572_v35, %v2587_v6  ;;  %v2436_v22 = vand.u32 3, %v2435_v45 }
 0x25f   : > { %v2597_v18 = vsel %vm2583_vm14, %v2594_v10, %v2596_v27  ;;  %v4514_v32 = vmul.u32.u64.low %v2598_v17, %v2593_v7  ;;  %v4515_v56 = vmul.u32.u64.high %v2598_v17, %v2593_v7, %v4514_v32  ;;  %v1264_v28 = vsub.s32 0, %v4508_v59 }
 0x260   : > { %v4518_v50 = vmul.u32.u64.low %v2598_v17, %v2597_v18  ;;  %v4519_v9 = vmul.u32.u64.high %v2598_v17, %v2597_v18, %v4518_v50  ;;  %v1284_v30 = vsub.s32 4, %v1260_v8  ;;  %v1409_v13 = vand.u32 2139095040, %v4496_v12 }
 0x261   : > { %vm2434_vm15 = vweird.f32 %v4169_v47  ;;  %v2771_v2 = vmin.u32 %v1264_v28, %v4508_v59  ;;  %v2589_v20 = vsel %vm2583_vm14, %v2586_v38, %v2588_v39  ;;  %v1406_v49 = vand.u32 2147483647, %v4496_v12 }
 0x262   : > { %vm4529_vm0 = vcmp.le.f32.partialorder %v1198_v33, 0.7853982  ;;  %vm1200_vm1 = vcmp.lt.s32.totalorder %v4319_v11, 0  ;;  %v2608_v26 = vadd.s32 1, %v4515_v56  ;;  %v1410_v35 = vshrl.u32 %v1409_v13, 23 }
 0x263   : > { %vm2437_vm2 = vcmp.lt.s32.totalorder %v2436_v22, 2  ;;  %vm2438_vm3 = vcmp.eq.s32.totalorder %v2436_v22, 0  ;;  %vm2441_vm5 = vcmp.eq.s32.totalorder %v2436_v22, 2  ;;  %v1266_v24 = vclz %v2771_v2 }
 0x264   : > { %v1285_v3 = vsel %vm1200_vm1, %v1284_v30, %v1260_v8  ;;  %v2605_v37 = vmul.u32 %v2598_v17, %v2589_v20  ;;  %vm2607_vm4 = vc.u32 %v4519_v9, %v4514_v32  ;;  %v2778_v33 = vadd.s32 4294967169, %v1410_v35 }
 0x265   : > { %v2996_v46 = vpop.eup %2995  ;;  %v2772_v58 = vadd.s32 4294967294, %v1266_v24  ;;  %v2609_v42 = vsel %vm2607_vm4, %v2608_v26, %v4515_v56  ;;  %v1413_v5 = vand.u32 8388607, %v1406_v49  ;;  %v964_v14 = vmul.f32 %v4287_v23, %v916_v62 }
 0x266   : > { %v2998_v0 = vpop.eup %2997  ;;  %v2442_v40 = vxor.u32 2147483648, %v2996_v46  ;;  %v2610_v60 = vadd.s32 %v2609_v42, %v2605_v37  ;;  %v1416_v55 = vadd.s32 1, %v2778_v33  ;;  %v1254_v17 = vadd.s32 %v4455_v25, %v4464_v4 }
 0x267   : > { %v2439_v45 = vxor.u32 2147483648, %v2998_v0  ;;  %vm2773_vm6 = vcmp.lt.s32.totalorder %v2772_v58, 0  ;;  %v1287_v8 = vsel %vm4529_vm0, 0, %v1285_v3  ;;  %v1414_v44 = vor.u32 8388608, %v1413_v5 }
 0x268   : > { %v2443_v41 = vsel %vm2441_vm5, %v2442_v40, %v2998_v0  ;;  %v1269_v34 = vsel %vm2773_vm6, 0, %v2772_v58  ;;  %v2611_v51 = vadd.s32 536870912, %v2610_v60  ;;  %vm1417_vm7 = vcmp.gt.s32.totalorder %v1416_v55, 0 }
 0x269   : > { %v2440_v19 = vsel %vm2438_vm3, %v2996_v46, %v2439_v45  ;;  %v1270_v29 = vsub.s32 32, %v1269_v34  ;;  %v1274_v10 = vsub.s32 4294967266, %v1269_v34  ;;  %v1418_v25 = vsel %vm1417_vm7, %v1416_v55, 0 }
 0x26a   : > { %v2444_v6 = vsel %vm2437_vm2, %v2440_v19, %v2443_v41  ;;  %v4551_v7 = vshrl.u32 %v2611_v51, 30  ;;  %v4554_v4 = vadd.f32 %v964_v14, %v3646_v54  ;;  %v1271_v27 = vshll.u32 %v4508_v59, %v1269_v34 }
 0x26b   : > { %v2445_v38 = vsel %vm2434_vm15, nan, %v2444_v6  ;;  %v1272_v39 = vshrl.u32 %v1254_v17, %v1270_v29  ;;  %v1275_v18 = vadd.s32 127, %v1274_v10  ;;  %v1420_v56 = vand.u32 31, %v1418_v25 }
 0x26c   : > { %2667 = vst [vmem:[%s3935_s27 + $0x68] sm:$0xff] %v2445_v38  ;;  %v2613_v22 = vshll.u32 %v4551_v7, 30  ;;  %v4559_v13 = vadd.s32 3, %v1287_v8  ;;  %v2606_v47 = vadd.s32 %v4514_v32, %v4519_v9  ;;  %v4562_v26 = vshrl.u32 %v1418_v25, 5 }
 0x26d   : > { %v1273_v28 = vor.u32 %v1272_v39, %v1271_v27  ;;  %v1276_v50 = vshll.u32 %v1275_v18, 23  ;;  %v1421_v30 = vsub.s32 32, %v1420_v56  ;;  %v4564_v54 = vshll.u32 %v1414_v44, 8 }
 0x26e   : > { %v2614_v2 = vsub.s32 %v2610_v60, %v2613_v22  ;;  %v1614_v59 = vand.u32 2147483647, %v4554_v4  ;;  %v1429_v46 = vshll.u32 %v3108_v48, %v1420_v56  ;;  %v1423_v0 = vshll.u32 %v3106_v61, %v1420_v56 }
 0x26f   : > { %v1277_v20 = vor.u32 4788187, %v1276_v50  ;;  %v1424_v24 = vshrl.u32 %v3107_v16, %v1421_v30  ;;  %v1427_v62 = vshrl.u32 %v3108_v48, %v1421_v30  ;;  %v1280_v37 = vcvt.s32.f32 %v1273_v28 }
 0x270   : > { %v2616_v35 = vsub.s32 0, %v2614_v2  ;;  %v1430_v33 = vshrl.u32 %v3109_v31, %v1421_v30  ;;  %v1433_v32 = vshrl.u32 %v3110_v21, %v1421_v30  ;;  %v1426_v40 = vshll.u32 %v3107_v16, %v1420_v56 }
 0x271   : > { %v1278_v3 = vand.u32 2147483647, %v1277_v20  ;;  %v1432_v58 = vshll.u32 %v3109_v31, %v1420_v56  ;;  %v2636_v5 = vsub.s32 4, %v4551_v7  ;;  %v1617_v60 = vand.u32 2139095040, %v4554_v4 }
 0x272   : > { %v2823_v9 = vmin.u32 %v2616_v35, %v2614_v2  ;;  %v1431_v45 = vor.u32 %v1430_v33, %v1429_v46  ;;  %vm2552_vm8 = vcmp.lt.s32.totalorder %v4352_v43, 0  ;;  %v1425_v14 = vor.u32 %v1424_v24, %v1423_v0 }
 0x273   : > { %v1281_v42 = vmul.f32 %v1280_v37, %v1278_v3  ;;  %v1428_v41 = vor.u32 %v1427_v62, %v1426_v40  ;;  %v1434_v17 = vor.u32 %v1433_v32, %v1432_v58  ;;  %v1422_v19 = vshrl.u32 %v3106_v61, %v1421_v30 }
 0x274   : > { %v2618_v55 = vclz %v2823_v9  ;;  %v1435_v34 = vshll.u32 %v3110_v21, %v1420_v56  ;;  %v1436_v51 = vshrl.u32 %v3111_v53, %v1421_v30  ;;  %vm1438_vm9 = vcmp.lt.s32.totalorder %v4562_v26, 1 }
 0x275   : > { %v1282_v8 = vxor.u32 2147483648, %v1281_v42  ;;  %vm1439_vm10 = vcmp.lt.s32.totalorder %v4562_v26, 2  ;;  %vm1441_vm11 = vcmp.lt.s32.totalorder %v4562_v26, 4  ;;  %vm1440_vm12 = vcmp.lt.s32.totalorder %v4562_v26, 3 }
 0x276   : > { %v2824_v6 = vadd.s32 4294967294, %v2618_v55  ;;  %v1437_v10 = vor.u32 %v1436_v51, %v1435_v34  ;;  %v1443_v44 = vsel %vm1441_vm11, %v1431_v45, 2102212464  ;;  %v1446_v25 = vsel %vm1438_vm9, %v1425_v14, %v1428_v41 }
 0x277   : > { %v1283_v29 = vsel %vm1200_vm1, %v1282_v8, %v1281_v42  ;;  %v1447_v27 = vsel %vm1441_vm11, %v1434_v17, 920167782  ;;  %v1442_v18 = vsel %vm1438_vm9, %v1422_v19, %v1425_v14  ;;  %v1444_v15 = vsel %vm1440_vm12, %v1428_v41, %v1443_v44 }
 0x278   : > { %v1286_v38 = vsel %vm4529_vm0, %v4319_v11, %v1283_v29  ;;  %vm2825_vm13 = vcmp.lt.s32.totalorder %v2824_v6, 0  ;;  %v1448_v56 = vsel %vm1440_vm12, %v1431_v45, %v1447_v27  ;;  %v1450_v20 = vsel %vm1438_vm9, %v1428_v41, %v1431_v45 }
 0x279   : > { %2999 = vcosq.f32 %v1286_v38  ;;  %v2621_v39 = vsel %vm2825_vm13, 0, %v2824_v6  ;;  %v1449_v30 = vsel %vm1439_vm10, %v1446_v25, %v1448_v56  ;;  %v1451_v35 = vsel %vm1441_vm11, %v1437_v10, 1326507024 }
 0x27a   : > { %3001 = vsinq.f32 %v1286_v38  ;;  %v2622_v22 = vsub.s32 32, %v2621_v39  ;;  %v2626_v28 = vsub.s32 4294967266, %v2621_v39  ;;  %v2623_v50 = vshll.u32 %v2614_v2, %v2621_v39 }
 0x27b   : > { %v1452_v46 = vsel %vm1440_vm12, %v1434_v17, %v1451_v35  ;;  %v1618_v3 = vshrl.u32 %v1617_v60, 23  ;;  %v2637_v37 = vsel %vm2552_vm8, %v2636_v5, %v4551_v7  ;;  %vm4626_vm14 = vcmp.le.f32.partialorder %v2550_v57, 0.7853982  ;;  %v924_v60 = vpop.permute.xlu1 %923 }
 0x27c   : > { %v2624_v24 = vshrl.u32 %v2606_v47, %v2622_v22  ;;  %v2627_v62 = vadd.s32 127, %v2626_v28  ;;  %v1453_v2 = vsel %vm1439_vm10, %v1450_v20, %v1452_v46  ;;  %v1445_v7 = vsel %vm1439_vm10, %v1442_v18, %v1444_v15 }
 0x27d   : > { %v4616_v33 = vmul.u32.u64.low %v4564_v54, %v1449_v30  ;;  %v4617_v32 = vmul.u32.u64.high %v4564_v54, %v1449_v30, %v4616_v33  ;;  %v4621_v47 = vmul.u32.u64.low %v4564_v54, %v1453_v2  ;;  %v4622_v40 = vmul.u32.u64.high %v4564_v54, %v1453_v2, %v4621_v47 }
 0x27e   : > { %v2625_v9 = vor.u32 %v2624_v24, %v2623_v50  ;;  %v2628_v0 = vshll.u32 %v2627_v62, 23  ;;  %v2786_v42 = vadd.s32 4294967169, %v1618_v3  ;;  %vm1290_vm15 = vweird.f32 %v4319_v11 }
 0x27f   : > { %v2639_v45 = vsel %vm4626_vm14, 0, %v2637_v37  ;;  %v1292_v55 = vand.u32 3, %v4559_v13  ;;  %v1464_v14 = vadd.s32 1, %v4617_v32  ;;  %v1621_v57 = vand.u32 8388607, %v1614_v59 }
 0x280   : > { %v2629_v5 = vor.u32 4788187, %v2628_v0  ;;  %v1624_v41 = vadd.s32 1, %v2786_v42  ;;  %v2632_v8 = vcvt.s32.f32 %v2625_v9  ;;  %v1461_v26 = vmul.u32 %v4564_v54, %v1445_v7  ;;  %v932_v42 = vpop.permute.xlu1 %931 }
 0x281   : > { %vm1463_vm0 = vc.u32 %v4622_v40, %v4616_v33  ;;  %v2643_v34 = vadd.s32 3, %v2639_v45  ;;  %v966_v13 = vmul.f32 %v4287_v23, %v924_v60  ;;  %vm1293_vm2 = vcmp.lt.s32.totalorder %v1292_v55, 2 }
 0x282   : > { %v2630_v17 = vand.u32 2147483647, %v2629_v5  ;;  %v1465_v51 = vsel %vm1463_vm0, %v1464_v14, %v4617_v32  ;;  %vm1625_vm1 = vcmp.gt.s32.totalorder %v1624_v41, 0  ;;  %vm1297_vm3 = vcmp.eq.s32.totalorder %v1292_v55, 2 }
 0x283   : > { %v3000_v19 = vpop.eup %2999  ;;  %v1466_v44 = vadd.s32 %v1465_v51, %v1461_v26  ;;  %v1626_v38 = vsel %vm1625_vm1, %v1624_v41, 0  ;;  %vm1294_vm5 = vcmp.eq.s32.totalorder %v1292_v55, 0  ;;  %v4644_v22 = vand.u32 3, %v2643_v34 }
 0x284   : > { %v3002_v6 = vpop.eup %3001  ;;  %v1298_v29 = vxor.u32 2147483648, %v3000_v19  ;;  %v2633_v10 = vmul.f32 %v2632_v8, %v2630_v17  ;;  %v1628_v27 = vand.u32 31, %v1626_v38  ;;  %v1622_v28 = vor.u32 8388608, %v1621_v57 }
 0x285   : > { %v1295_v25 = vxor.u32 2147483648, %v3002_v6  ;;  %v1467_v18 = vadd.s32 536870912, %v1466_v44  ;;  %v4651_v35 = vadd.f32 %v966_v13, %v3651_v63  ;;  %v4658_v46 = vshrl.u32 %v1626_v38, 5 }
 0x286   : > { %v1299_v54 = vsel %vm1297_vm3, %v1298_v29, %v3002_v6  ;;  %v2634_v39 = vxor.u32 2147483648, %v2633_v10  ;;  %v1629_v15 = vsub.s32 32, %v1628_v27  ;;  %v1631_v2 = vshll.u32 %v3106_v61, %v1628_v27 }
 0x287   : > { %v1296_v56 = vsel %vm1294_vm5, %v3000_v19, %v1295_v25  ;;  %v4648_v20 = vshrl.u32 %v1467_v18, 30  ;;  %v1634_v11 = vshll.u32 %v3107_v16, %v1628_v27  ;;  %v1637_v32 = vshll.u32 %v3108_v48, %v1628_v27 }
 0x288   : > { %v1300_v50 = vsel %vm1293_vm2, %v1296_v56, %v1299_v54  ;;  %v2635_v30 = vsel %vm2552_vm8, %v2634_v39, %v2633_v10  ;;  %v1632_v3 = vshrl.u32 %v3107_v16, %v1629_v15  ;;  %v1635_v63 = vshrl.u32 %v3108_v48, %v1629_v15 }
 0x289   : > { %v1301_v24 = vsel %vm1290_vm15, nan, %v1300_v50  ;;  %v2638_v62 = vsel %vm4626_vm14, %v4352_v43, %v2635_v30  ;;  %v1469_v37 = vshll.u32 %v4648_v20, 30  ;;  %v1638_v9 = vshrl.u32 %v3109_v31, %v1629_v15 }
 0x28a   : > { %2656 = vst [vmem:[%s3935_s27 + $0x10] sm:$0xff] %v1301_v24  ;;  %3003 = vcosq.f32 %v2638_v62  ;;  %v1633_v47 = vor.u32 %v1632_v3, %v1631_v2  ;;  %v1640_v58 = vshll.u32 %v3109_v31, %v1628_v27  ;;  %v1641_v7 = vshrl.u32 %v3110_v21, %v1629_v15 }
 0x28b   : > { %3005 = vsinq.f32 %v2638_v62  ;;  %v4668_v0 = vsub.s32 %v1466_v44, %v1469_v37  ;;  %v1636_v5 = vor.u32 %v1635_v63, %v1634_v11  ;;  %v1639_v45 = vor.u32 %v1638_v9, %v1637_v32 }
 0x28c   : > { %v1643_v60 = vshll.u32 %v3110_v21, %v1628_v27  ;;  %v1644_v55 = vshrl.u32 %v3111_v53, %v1629_v15  ;;  %vm2649_vm4 = vcmp.eq.s32.totalorder %v4644_v22, 2  ;;  %v1642_v57 = vor.u32 %v1641_v7, %v1640_v58 }
 0x28d   : > { %v1472_v14 = vsub.s32 0, %v4668_v0  ;;  %vm2646_vm6 = vcmp.eq.s32.totalorder %v4644_v22, 0  ;;  %v1662_v17 = vshll.u32 %v1622_v28, 8  ;;  %v1825_v8 = vand.u32 2139095040, %v4651_v35 }
 0x28e   : > { %v1645_v41 = vor.u32 %v1644_v55, %v1643_v60  ;;  %v4679_v26 = vmul.f32 %v4287_v23, %v932_v42  ;;  %vm2645_vm7 = vcmp.lt.s32.totalorder %v4644_v22, 2  ;;  %v1462_v19 = vadd.s32 %v4616_v33, %v4622_v40 }
 0x28f   : > { %v2779_v34 = vmin.u32 %v1472_v14, %v4668_v0  ;;  %vm1646_vm8 = vcmp.lt.s32.totalorder %v4658_v46, 1  ;;  %vm1649_vm9 = vcmp.lt.s32.totalorder %v4658_v46, 4  ;;  %vm2642_vm10 = vweird.f32 %v4352_v43 }
 0x290   : > { %v1630_v51 = vshrl.u32 %v3106_v61, %v1629_v15  ;;  %v1651_v13 = vsel %vm1649_vm9, %v1639_v45, 2102212464  ;;  %v1654_v6 = vsel %vm1646_vm8, %v1633_v47, %v1636_v5  ;;  %v1655_v29 = vsel %vm1649_vm9, %v1642_v57, 920167782 }
 0x291   : > { %vm1408_vm11 = vcmp.lt.s32.totalorder %v4496_v12, 0  ;;  %v1474_v23 = vclz %v2779_v34  ;;  %vm1647_vm12 = vcmp.lt.s32.totalorder %v4658_v46, 2  ;;  %vm1648_vm13 = vcmp.lt.s32.totalorder %v4658_v46, 3 }
 0x292   : > { %v1658_v33 = vsel %vm1646_vm8, %v1636_v5, %v1639_v45  ;;  %v1650_v40 = vsel %vm1646_vm8, %v1630_v51, %v1633_v47  ;;  %v1656_v10 = vsel %vm1648_vm13, %v1639_v45, %v1655_v29  ;;  %v1659_v44 = vsel %vm1649_vm9, %v1645_v41, 1326507024 }
 0x293   : > { %v1826_v38 = vshrl.u32 %v1825_v8, 23  ;;  %v2780_v27 = vadd.s32 4294967294, %v1474_v23  ;;  %v1652_v54 = vsel %vm1648_vm13, %v1636_v5, %v1651_v13  ;;  %v1657_v39 = vsel %vm1647_vm12, %v1654_v6, %v1656_v10 }
 0x294   : > { %v3004_v25 = vpop.eup %3003  ;;  %v1660_v18 = vsel %vm1648_vm13, %v1642_v57, %v1659_v44  ;;  %v4696_v50 = vmul.u32.u64.low %v1662_v17, %v1657_v39  ;;  %v4697_v30 = vmul.u32.u64.high %v1662_v17, %v1657_v39, %v4696_v50  ;;  %v1492_v63 = vsub.s32 4, %v4648_v20 }
 0x295   : > { %v3006_v56 = vpop.eup %3005  ;;  %v2650_v28 = vxor.u32 2147483648, %v3004_v25  ;;  %v1661_v15 = vsel %vm1647_vm12, %v1658_v33, %v1660_v18  ;;  %vm2781_vm14 = vcmp.lt.s32.totalorder %v2780_v27, 0  ;;  %v2794_v11 = vadd.s32 4294967169, %v1826_v38 }
 0x296   : > { %v2647_v24 = vxor.u32 2147483648, %v3006_v56  ;;  %v4700_v62 = vmul.u32.u64.low %v1662_v17, %v1661_v15  ;;  %v4701_v3 = vmul.u32.u64.high %v1662_v17, %v1661_v15, %v4700_v62  ;;  %v1477_v2 = vsel %vm2781_vm14, 0, %v2780_v27 }
 0x297   : > { %v2651_v37 = vsel %vm2649_vm4, %v2650_v28, %v3006_v56  ;;  %v1478_v9 = vsub.s32 32, %v1477_v2  ;;  %v1482_v47 = vsub.s32 4294967266, %v1477_v2  ;;  %v1653_v58 = vsel %vm1647_vm12, %v1650_v40, %v1652_v54 }
 0x298   : > { %v2648_v32 = vsel %vm2646_vm6, %v3004_v25, %v2647_v24  ;;  %v1672_v42 = vadd.s32 1, %v4697_v30  ;;  %v1822_v5 = vand.u32 2147483647, %v4651_v35  ;;  %v1832_v45 = vadd.s32 1, %v2794_v11 }
 0x299   : > { %v2652_v7 = vsel %vm2645_vm7, %v2648_v32, %v2651_v37  ;;  %v1479_v55 = vshll.u32 %v4668_v0, %v1477_v2  ;;  %v1480_v14 = vshrl.u32 %v1462_v19, %v1478_v9  ;;  %v1483_v57 = vadd.s32 127, %v1482_v47 }
 0x29a   : > { %v2653_v60 = vsel %vm2642_vm10, nan, %v2652_v7  ;;  %v1493_v46 = vsel %vm1408_vm11, %v1492_v63, %v4648_v20  ;;  %v1669_v41 = vmul.u32 %v1662_v17, %v1653_v58  ;;  %vm1671_vm15 = vc.u32 %v4701_v3, %v4696_v50 }
 0x29b   : > { %2669 = vst [vmem:[%s3935_s27 + $0x78] sm:$0xff] %v2653_v60  ;;  %vm1833_vm0 = vcmp.gt.s32.totalorder %v1832_v45, 0  ;;  %v1481_v22 = vor.u32 %v1480_v14, %v1479_v55  ;;  %v1484_v8 = vshll.u32 %v1483_v57, 23  ;;  %v1673_v34 = vsel %vm1671_vm15, %v1672_v42, %v4697_v30 }
 0x29c   : > { %v1834_v43 = vsel %vm1833_vm0, %v1832_v45, 0  ;;  %v1674_v51 = vadd.s32 %v1673_v34, %v1669_v41  ;;  %vm4726_vm1 = vcmp.le.f32.partialorder %v1406_v49, 0.7853982  ;;  %v4734_v29 = vadd.f32 %v4679_v26, %v3654_v36 }
 0x29d   : > { %v1836_v13 = vand.u32 31, %v1834_v43  ;;  %v1485_v19 = vor.u32 4788187, %v1484_v8  ;;  %v1495_v20 = vsel %vm4726_vm1, 0, %v1493_v46  ;;  %v1488_v33 = vcvt.s32.f32 %v1481_v22 }
 0x29e   : > { %v1675_v17 = vadd.s32 536870912, %v1674_v51  ;;  %v1829_v40 = vand.u32 8388607, %v1822_v5  ;;  %v1835_v10 = vshrl.u32 %v1834_v43, 5  ;;  %v1499_v30 = vadd.s32 3, %v1495_v20 }
 0x29f   : > { %v1837_v6 = vsub.s32 32, %v1836_v13  ;;  %v1486_v23 = vand.u32 2147483647, %v1485_v19  ;;  %v1848_v25 = vshll.u32 %v3109_v31, %v1836_v13  ;;  %v1839_v18 = vshll.u32 %v3106_v61, %v1836_v13 }
 0x2a0   : > { %v1676_v49 = vshrl.u32 %v1675_v17, 30  ;;  %v1842_v56 = vshll.u32 %v3107_v16, %v1836_v13  ;;  %v1845_v28 = vshll.u32 %v3108_v48, %v1836_v13  ;;  %v1851_v62 = vshll.u32 %v3110_v21, %v1836_v13 }
 0x2a1   : > { %v1840_v44 = vshrl.u32 %v3107_v16, %v1837_v6  ;;  %v1843_v38 = vshrl.u32 %v3108_v48, %v1837_v6  ;;  %v1489_v27 = vmul.f32 %v1488_v33, %v1486_v23  ;;  %v1846_v54 = vshrl.u32 %v3109_v31, %v1837_v6 }
 0x2a2   : > { %v1849_v39 = vshrl.u32 %v3110_v21, %v1837_v6  ;;  %v1852_v36 = vshrl.u32 %v3111_v53, %v1837_v6  ;;  %v1677_v26 = vshll.u32 %v1676_v49, 30  ;;  %vm1616_vm2 = vcmp.lt.s32.totalorder %v4554_v4, 0 }
 0x2a3   : > { %v1490_v15 = vxor.u32 2147483648, %v1489_v27  ;;  %v1841_v2 = vor.u32 %v1840_v44, %v1839_v18  ;;  %v1844_v63 = vor.u32 %v1843_v38, %v1842_v56  ;;  %v1847_v11 = vor.u32 %v1846_v54, %v1845_v28 }
 0x2a4   : > { %v1850_v24 = vor.u32 %v1849_v39, %v1848_v25  ;;  %v4749_v37 = vsub.s32 %v1674_v51, %v1677_v26  ;;  %v1830_v9 = vor.u32 8388608, %v1829_v40  ;;  %v1853_v47 = vor.u32 %v1852_v36, %v1851_v62  ;;  %v940_v36 = vpop.permute.xlu1 %939 }
 0x2a5   : > { %v1491_v32 = vsel %vm1408_vm11, %v1490_v15, %v1489_v27  ;;  %v2033_v58 = vand.u32 2139095040, %v4734_v29  ;;  %v1838_v45 = vshrl.u32 %v3106_v61, %v1837_v6  ;;  %vm1857_vm3 = vcmp.lt.s32.totalorder %v1835_v10, 4 }
 0x2a6   : > { %v1494_v7 = vsel %vm4726_vm1, %v4496_v12, %v1491_v32  ;;  %v1680_v42 = vsub.s32 0, %v4749_v37  ;;  %vm4761_vm5 = vcmp.le.f32.partialorder %v1614_v59, 0.7853982  ;;  %vm1854_vm4 = vcmp.lt.s32.totalorder %v1835_v10, 1 }
 0x2a7   : > { %3007 = vcosq.f32 %v1494_v7  ;;  %vm1856_vm6 = vcmp.lt.s32.totalorder %v1835_v10, 3  ;;  %v1863_v55 = vsel %vm1857_vm3, %v1850_v24, 920167782  ;;  %v1859_v57 = vsel %vm1857_vm3, %v1847_v11, 2102212464 }
 0x2a8   : > { %3009 = vsinq.f32 %v1494_v7  ;;  %v2787_v14 = vmin.u32 %v1680_v42, %v4749_v37  ;;  %v1862_v46 = vsel %vm1854_vm4, %v1841_v2, %v1844_v63  ;;  %v1700_v41 = vsub.s32 4, %v1676_v49 }
 0x2a9   : > { %v1864_v22 = vsel %vm1856_vm6, %v1847_v11, %v1863_v55  ;;  %v1866_v8 = vsel %vm1854_vm4, %v1844_v63, %v1847_v11  ;;  %v1867_v34 = vsel %vm1857_vm3, %v1853_v47, 1326507024  ;;  %v1500_v43 = vand.u32 3, %v1499_v30 }
 0x2aa   : > { %v1682_v51 = vclz %v2787_v14  ;;  %vm1855_vm7 = vcmp.lt.s32.totalorder %v1835_v10, 2  ;;  %v1870_v59 = vshll.u32 %v1830_v9, 8  ;;  %v1858_v13 = vsel %vm1854_vm4, %v1838_v45, %v1841_v2 }
 0x2ab   : > { %v1860_v0 = vsel %vm1856_vm6, %v1844_v63, %v1859_v57  ;;  %v1865_v19 = vsel %vm1855_vm7, %v1862_v46, %v1864_v22  ;;  %v1868_v20 = vsel %vm1856_vm6, %v1850_v24, %v1867_v34  ;;  %v1701_v40 = vsel %vm1616_vm2, %v1700_v41, %v1676_v49  ;;  %v948_v57 = vpop.permute.xlu1 %947 }
 0x2ac   : > { %v2788_v17 = vadd.s32 4294967294, %v1682_v51  ;;  %v1869_v6 = vsel %vm1855_vm7, %v1866_v8, %v1868_v20  ;;  %v4769_v23 = vmul.u32.u64.low %v1870_v59, %v1865_v19  ;;  %v4770_v33 = vmul.u32.u64.high %v1870_v59, %v1865_v19, %v4769_v23 }
 0x2ad   : > { %v4775_v44 = vmul.u32.u64.low %v1870_v59, %v1869_v6  ;;  %v4776_v38 = vmul.u32.u64.high %v1870_v59, %v1869_v6, %v4775_v44  ;;  %v2034_v25 = vshrl.u32 %v2033_v58, 23  ;;  %vm1501_vm8 = vcmp.lt.s32.totalorder %v1500_v43, 2 }
 0x2ae   : > { %vm1502_vm9 = vcmp.eq.s32.totalorder %v1500_v43, 0  ;;  %vm2789_vm10 = vcmp.lt.s32.totalorder %v2788_v17, 0  ;;  %v1861_v27 = vsel %vm1855_vm7, %v1858_v13, %v1860_v0  ;;  %vm1505_vm11 = vcmp.eq.s32.totalorder %v1500_v43, 2  ;;  %v3033_v0 = vld [vmem:[%s5064_s1 + $0x7] ss:$0 sm:$0xff] }
 0x2af   : > { %v1670_v10 = vadd.s32 %v4696_v50, %v4701_v3  ;;  %v1685_v54 = vsel %vm2789_vm10, 0, %v2788_v17  ;;  %v2802_v39 = vadd.s32 4294967169, %v2034_v25  ;;  %v1703_v49 = vsel %vm4761_vm5, 0, %v1701_v40 }
 0x2b0   : > { %v1686_v26 = vsub.s32 32, %v1685_v54  ;;  %v1690_v18 = vsub.s32 4294967266, %v1685_v54  ;;  %v1880_v56 = vadd.s32 1, %v4770_v33  ;;  %v1687_v15 = vshll.u32 %v4749_v37, %v1685_v54 }
 0x2b1   : > { %v3008_v28 = vpop.eup %3007  ;;  %v1877_v30 = vmul.u32 %v1870_v59, %v1861_v27  ;;  %vm1879_vm12 = vc.u32 %v4776_v38, %v4769_v23  ;;  %v2040_v24 = vadd.s32 1, %v2802_v39  ;;  %v2030_v9 = vand.u32 2147483647, %v4734_v29 }
 0x2b2   : > { %v3010_v62 = vpop.eup %3009  ;;  %v1506_v50 = vxor.u32 2147483648, %v3008_v28  ;;  %v1688_v3 = vshrl.u32 %v1670_v10, %v1686_v26  ;;  %v1691_v2 = vadd.s32 127, %v1690_v18  ;;  %v1881_v63 = vsel %vm1879_vm12, %v1880_v56, %v4770_v33 }
 0x2b3   : > { %v1503_v11 = vxor.u32 2147483648, %v3010_v62  ;;  %v1882_v32 = vadd.s32 %v1881_v63, %v1877_v30  ;;  %vm2041_vm13 = vcmp.gt.s32.totalorder %v2040_v24, 0  ;;  %v1707_v45 = vadd.s32 3, %v1703_v49 }
 0x2b4   : > { %v1507_v47 = vsel %vm1505_vm11, %v1506_v50, %v3010_v62  ;;  %v1689_v37 = vor.u32 %v1688_v3, %v1687_v15  ;;  %v1692_v58 = vshll.u32 %v1691_v2, 23  ;;  %v2042_v7 = vsel %vm2041_vm13, %v2040_v24, 0 }
 0x2b5   : > { %v1504_v42 = vsel %vm1502_vm9, %v3008_v28, %v1503_v11  ;;  %v1883_v55 = vadd.s32 536870912, %v1882_v32  ;;  %v2044_v14 = vand.u32 31, %v2042_v7  ;;  %vm1498_vm14 = vweird.f32 %v4496_v12 }
 0x2b6   : > { %v1508_v46 = vsel %vm1501_vm8, %v1504_v42, %v1507_v47  ;;  %v1693_v41 = vor.u32 4788187, %v1692_v58  ;;  %v2037_v34 = vand.u32 8388607, %v2030_v9  ;;  %v1696_v13 = vcvt.s32.f32 %v1689_v37 }
 0x2b7   : > { %v1509_v22 = vsel %vm1498_vm14, nan, %v1508_v46  ;;  %v4792_v8 = vshrl.u32 %v1883_v55, 30  ;;  %v2045_v51 = vsub.s32 32, %v2044_v14  ;;  %v970_v19 = vmul.f32 %v3033_v0, %v940_v36 }
 0x2b8   : > { %2658 = vst [vmem:[%s3935_s27 + $0x20] sm:$0xff] %v1509_v22  ;;  %v1694_v59 = vand.u32 2147483647, %v1693_v41  ;;  %v4800_v20 = vmul.f32 %v3033_v0, %v948_v57  ;;  %v4802_v12 = vand.u32 3, %v1707_v45  ;;  %v2047_v17 = vshll.u32 %v3106_v61, %v2044_v14 }
 0x2b9   : > { %v1885_v43 = vshll.u32 %v4792_v8, 30  ;;  %v2048_v6 = vshrl.u32 %v3107_v16, %v2045_v51  ;;  %v2051_v40 = vshrl.u32 %v3108_v48, %v2045_v51  ;;  %v2054_v44 = vshrl.u32 %v3109_v31, %v2045_v51 }
 0x2ba   : > { %v1697_v33 = vmul.f32 %v1696_v13, %v1694_v59  ;;  %v2057_v25 = vshrl.u32 %v3110_v21, %v2045_v51  ;;  %v2038_v10 = vor.u32 8388608, %v2037_v34  ;;  %v2043_v54 = vshrl.u32 %v2042_v7, 5 }
 0x2bb   : > { %v4810_v27 = vsub.s32 %v1882_v32, %v1885_v43  ;;  %v2050_v39 = vshll.u32 %v3107_v16, %v2044_v14  ;;  %v2049_v26 = vor.u32 %v2048_v6, %v2047_v17  ;;  %v2053_v18 = vshll.u32 %v3108_v48, %v2044_v14 }
 0x2bc   : > { %v1698_v36 = vxor.u32 2147483648, %v1697_v33  ;;  %v2056_v49 = vshll.u32 %v3109_v31, %v2044_v14  ;;  %v2059_v15 = vshll.u32 %v3110_v21, %v2044_v14  ;;  %v2060_v30 = vshrl.u32 %v3111_v53, %v2045_v51 }
 0x2bd   : > { %v1888_v56 = vsub.s32 0, %v4810_v27  ;;  %v2052_v28 = vor.u32 %v2051_v40, %v2050_v39  ;;  %v2055_v62 = vor.u32 %v2054_v44, %v2053_v18  ;;  %v4821_v3 = vadd.f32 %v970_v19, %v3660_v52 }
 0x2be   : > { %v1699_v24 = vsel %vm1616_vm2, %v1698_v36, %v1697_v33  ;;  %v2058_v50 = vor.u32 %v2057_v25, %v2056_v49  ;;  %vm1824_vm15 = vcmp.lt.s32.totalorder %v4651_v35, 0  ;;  %v2061_v11 = vor.u32 %v2060_v30, %v2059_v15 }
 0x2bf   : > { %v1702_v2 = vsel %vm4761_vm5, %v4554_v4, %v1699_v24  ;;  %v2795_v63 = vmin.u32 %v1888_v56, %v4810_v27  ;;  %v2078_v32 = vshll.u32 %v2038_v10, 8  ;;  %v1908_v47 = vsub.s32 4, %v4792_v8 }
 0x2c0   : > { %3011 = vcosq.f32 %v1702_v2  ;;  %v2046_v37 = vshrl.u32 %v3106_v61, %v2045_v51  ;;  %vm2062_vm0 = vcmp.lt.s32.totalorder %v2043_v54, 1  ;;  %vm2065_vm1 = vcmp.lt.s32.totalorder %v2043_v54, 4 }
 0x2c1   : > { %3013 = vsinq.f32 %v1702_v2  ;;  %v1890_v58 = vclz %v2795_v63  ;;  %v2070_v52 = vsel %vm2062_vm0, %v2049_v26, %v2052_v28  ;;  %vm2064_vm2 = vcmp.lt.s32.totalorder %v2043_v54, 3 }
 0x2c2   : > { %v2067_v7 = vsel %vm2065_vm1, %v2055_v62, 2102212464  ;;  %v2071_v60 = vsel %vm2065_vm1, %v2058_v50, 920167782  ;;  %v2074_v42 = vsel %vm2062_vm0, %v2052_v28, %v2055_v62  ;;  %vm4832_vm3 = vcmp.le.f32.partialorder %v1822_v5, 0.7853982 }
 0x2c3   : > { %v2796_v55 = vadd.s32 4294967294, %v1890_v58  ;;  %vm2063_vm5 = vcmp.lt.s32.totalorder %v2043_v54, 2  ;;  %v2072_v14 = vsel %vm2064_vm2, %v2055_v62, %v2071_v60  ;;  %v2075_v57 = vsel %vm2065_vm1, %v2061_v11, 1326507024 }
 0x2c4   : > { %v2066_v46 = vsel %vm2062_vm0, %v2046_v37, %v2049_v26  ;;  %v2068_v41 = vsel %vm2064_vm2, %v2052_v28, %v2067_v7  ;;  %v2073_v22 = vsel %vm2063_vm5, %v2070_v52, %v2072_v14  ;;  %v2076_v34 = vsel %vm2064_vm2, %v2058_v50, %v2075_v57 }
 0x2c5   : > { %vm2797_vm4 = vcmp.lt.s32.totalorder %v2796_v55, 0  ;;  %v2077_v51 = vsel %vm2063_vm5, %v2074_v42, %v2076_v34  ;;  %v4838_v59 = vmul.u32.u64.low %v2078_v32, %v2073_v22  ;;  %v4839_v13 = vmul.u32.u64.high %v2078_v32, %v2073_v22, %v4838_v59 }
 0x2c6   : > { %v1878_v5 = vadd.s32 %v4769_v23, %v4776_v38  ;;  %v1893_v0 = vsel %vm2797_vm4, 0, %v2796_v55  ;;  %v4843_v19 = vmul.u32.u64.low %v2078_v32, %v2077_v51  ;;  %v4844_v43 = vmul.u32.u64.high %v2078_v32, %v2077_v51, %v4843_v19 }
 0x2c7   : > { %vm1706_vm6 = vweird.f32 %v4554_v4  ;;  %v1894_v17 = vsub.s32 32, %v1893_v0  ;;  %v1898_v6 = vsub.s32 4294967266, %v1893_v0  ;;  %v2069_v33 = vsel %vm2063_vm5, %v2066_v46, %v2068_v41 }
 0x2c8   : > { %v2241_v40 = vand.u32 2139095040, %v4821_v3  ;;  %v1895_v44 = vshll.u32 %v4810_v27, %v1893_v0  ;;  %v1909_v25 = vsel %vm1824_vm15, %v1908_v47, %v4792_v8  ;;  %v2238_v23 = vand.u32 2147483647, %v4821_v3 }
 0x2c9   : > { %v4856_v38 = vadd.f32 %v4800_v20, %v3666_v1  ;;  %v1896_v10 = vshrl.u32 %v1878_v5, %v1894_v17  ;;  %v1899_v39 = vadd.s32 127, %v1898_v6  ;;  %v2088_v36 = vadd.s32 1, %v4839_v13 }
 0x2ca   : > { %v2242_v54 = vshrl.u32 %v2241_v40, 23  ;;  %v3012_v26 = vpop.eup %3011  ;;  %vm1710_vm7 = vcmp.eq.s32.totalorder %v4802_v12, 0  ;;  %vm1713_vm8 = vcmp.eq.s32.totalorder %v4802_v12, 2  ;;  %v2085_v27 = vmul.u32 %v2078_v32, %v2069_v33 }
 0x2cb   : > { %vm2087_vm9 = vc.u32 %v4844_v43, %v4838_v59  ;;  %v3014_v8 = vpop.eup %3013  ;;  %v1714_v18 = vxor.u32 2147483648, %v3012_v26  ;;  %v1897_v49 = vor.u32 %v1896_v10, %v1895_v44  ;;  %v1900_v56 = vshll.u32 %v1899_v39, 23 }
 0x2cc   : > { %v2089_v1 = vsel %vm2087_vm9, %v2088_v36, %v4839_v13  ;;  %v1711_v20 = vxor.u32 2147483648, %v3014_v8  ;;  %v1911_v28 = vsel %vm4832_vm3, 0, %v1909_v25  ;;  %v2810_v30 = vadd.s32 4294967169, %v2242_v54 }
 0x2cd   : > { %v2090_v15 = vadd.s32 %v2089_v1, %v2085_v27  ;;  %v1715_v24 = vsel %vm1713_vm8, %v1714_v18, %v3014_v8  ;;  %v1901_v62 = vor.u32 4788187, %v1900_v56  ;;  %v2245_v50 = vand.u32 8388607, %v2238_v23 }
 0x2ce   : > { %v2449_v2 = vand.u32 2139095040, %v4856_v38  ;;  %vm1709_vm10 = vcmp.lt.s32.totalorder %v4802_v12, 2  ;;  %v1712_v63 = vsel %vm1710_vm7, %v3012_v26, %v1711_v20  ;;  %v2248_v32 = vadd.s32 1, %v2810_v30 }
 0x2cf   : > { %v2091_v11 = vadd.s32 536870912, %v2090_v15  ;;  %v1716_v47 = vsel %vm1709_vm10, %v1712_v63, %v1715_v24  ;;  %v1902_v37 = vand.u32 2147483647, %v1901_v62  ;;  %v1904_v58 = vcvt.s32.f32 %v1897_v49 }
 0x2d0   : > { %v1915_v52 = vadd.s32 3, %v1911_v28  ;;  %v1717_v7 = vsel %vm1706_vm6, nan, %v1716_v47  ;;  %vm2249_vm11 = vcmp.gt.s32.totalorder %v2248_v32, 0  ;;  %v2246_v55 = vor.u32 8388608, %v2245_v50 }
 0x2d1   : > { %v4873_v60 = vshrl.u32 %v2091_v11, 30  ;;  %2660 = vst [vmem:[%s3935_s27 + $0x30] sm:$0xff] %v1717_v7  ;;  %v1905_v42 = vmul.f32 %v1904_v58, %v1902_v37  ;;  %v2250_v14 = vsel %vm2249_vm11, %v2248_v32, 0  ;;  %v2450_v57 = vshrl.u32 %v2449_v2, 23 }
 0x2d2   : > { %v2252_v46 = vand.u32 31, %v2250_v14  ;;  %v4877_v22 = vand.u32 3, %v1915_v52  ;;  %v2086_v34 = vadd.s32 %v4838_v59, %v4844_v43  ;;  %v2446_v13 = vand.u32 2147483647, %v4856_v38 }
 0x2d3   : > { %v2093_v12 = vshll.u32 %v4873_v60, 30  ;;  %v1906_v41 = vxor.u32 2147483648, %v1905_v42  ;;  %v4886_v19 = vshll.u32 %v2246_v55, 8  ;;  %v2818_v17 = vadd.s32 4294967169, %v2450_v57 }
 0x2d4   : > { %v2253_v4 = vsub.s32 32, %v2252_v46  ;;  %v2255_v0 = vshll.u32 %v3106_v61, %v2252_v46  ;;  %v2258_v59 = vshll.u32 %v3107_v16, %v2252_v46  ;;  %v2261_v43 = vshll.u32 %v3108_v48, %v2252_v46 }
 0x2d5   : > { %v4880_v51 = vsub.s32 %v2090_v15, %v2093_v12  ;;  %v1907_v5 = vsel %vm1824_vm15, %v1906_v41, %v1905_v42  ;;  %v2251_v39 = vshrl.u32 %v2250_v14, 5  ;;  %v2264_v45 = vshll.u32 %v3109_v31, %v2252_v46 }
 0x2d6   : > { %v1910_v6 = vsel %vm4832_vm3, %v4651_v35, %v1907_v5  ;;  %v2256_v40 = vshrl.u32 %v3107_v16, %v2253_v4  ;;  %v2259_v44 = vshrl.u32 %v3108_v48, %v2253_v4  ;;  %v2262_v25 = vshrl.u32 %v3109_v31, %v2253_v4 }
 0x2d7   : > { %v2096_v33 = vsub.s32 0, %v4880_v51  ;;  %3015 = vcosq.f32 %v1910_v6  ;;  %v2265_v27 = vshrl.u32 %v3110_v21, %v2253_v4  ;;  %v2116_v18 = vsub.s32 4, %v4873_v60 }
 0x2d8   : > { %3017 = vsinq.f32 %v1910_v6  ;;  %v2257_v36 = vor.u32 %v2256_v40, %v2255_v0  ;;  %v2260_v54 = vor.u32 %v2259_v44, %v2258_v59  ;;  %v2263_v26 = vor.u32 %v2262_v25, %v2261_v43 }
 0x2d9   : > { %v2803_v10 = vmin.u32 %v2096_v33, %v4880_v51  ;;  %v4903_v49 = vand.u32 8388607, %v2446_v13  ;;  %v2456_v56 = vadd.s32 1, %v2818_v17  ;;  %vm1921_vm12 = vcmp.eq.s32.totalorder %v4877_v22, 2 }
 0x2da   : > { %v2254_v1 = vshrl.u32 %v3106_v61, %v2253_v4  ;;  %v2266_v20 = vor.u32 %v2265_v27, %v2264_v45  ;;  %v2267_v28 = vshll.u32 %v3110_v21, %v2252_v46  ;;  %v2268_v15 = vshrl.u32 %v3111_v53, %v2253_v4 }
 0x2db   : > { %v2098_v8 = vclz %v2803_v10  ;;  %vm1918_vm13 = vcmp.eq.s32.totalorder %v4877_v22, 0  ;;  %vm2270_vm14 = vcmp.lt.s32.totalorder %v2251_v39, 1  ;;  %vm2272_vm15 = vcmp.lt.s32.totalorder %v2251_v39, 3 }
 0x2dc   : > { %vm2273_vm0 = vcmp.lt.s32.totalorder %v2251_v39, 4  ;;  %v2269_v24 = vor.u32 %v2268_v15, %v2267_v28  ;;  %v2274_v62 = vsel %vm2270_vm14, %v2254_v1, %v2257_v36  ;;  %v2278_v2 = vsel %vm2270_vm14, %v2257_v36, %v2260_v54 }
 0x2dd   : > { %v2804_v30 = vadd.s32 4294967294, %v2098_v8  ;;  %v2275_v50 = vsel %vm2273_vm0, %v2263_v26, 2102212464  ;;  %vm1914_vm1 = vweird.f32 %v4651_v35  ;;  %vm2271_vm3 = vcmp.lt.s32.totalorder %v2251_v39, 2 }
 0x2de   : > { %v2276_v63 = vsel %vm2272_vm15, %v2260_v54, %v2275_v50  ;;  %v2279_v11 = vsel %vm2273_vm0, %v2266_v20, 920167782  ;;  %vm2032_vm5 = vcmp.lt.s32.totalorder %v4734_v29, 0  ;;  %v2282_v37 = vsel %vm2270_vm14, %v2260_v54, %v2263_v26 }
 0x2df   : > { %vm2805_vm2 = vcmp.lt.s32.totalorder %v2804_v30, 0  ;;  %v2280_v47 = vsel %vm2272_vm15, %v2263_v26, %v2279_v11  ;;  %v2283_v58 = vsel %vm2273_vm0, %v2269_v24, 1326507024  ;;  %v2277_v42 = vsel %vm2271_vm3, %v2274_v62, %v2276_v63 }
 0x2e0   : > { %v2101_v32 = vsel %vm2805_vm2, 0, %v2804_v30  ;;  %v2281_v55 = vsel %vm2271_vm3, %v2278_v2, %v2280_v47  ;;  %v2284_v12 = vsel %vm2272_vm15, %v2266_v20, %v2283_v58  ;;  %vm2457_vm4 = vcmp.gt.s32.totalorder %v2456_v56, 0 }
 0x2e1   : > { %v2102_v52 = vsub.s32 32, %v2101_v32  ;;  %v2106_v7 = vsub.s32 4294967266, %v2101_v32  ;;  %v3016_v14 = vpop.eup %3015  ;;  %v2103_v57 = vshll.u32 %v4880_v51, %v2101_v32  ;;  %v2285_v6 = vsel %vm2271_vm3, %v2282_v37, %v2284_v12 }
 0x2e2   : > { %v4919_v46 = vmul.u32.u64.low %v4886_v19, %v2281_v55  ;;  %v4920_v41 = vmul.u32.u64.high %v4886_v19, %v2281_v55, %v4919_v46  ;;  %v3018_v4 = vpop.eup %3017  ;;  %v1922_v5 = vxor.u32 2147483648, %v3016_v14  ;;  %v2458_v25 = vsel %vm2457_vm4, %v2456_v56, 0 }
 0x2e3   : > { %v2104_v0 = vshrl.u32 %v2086_v34, %v2102_v52  ;;  %v2107_v17 = vadd.s32 127, %v2106_v7  ;;  %v1919_v33 = vxor.u32 2147483648, %v3018_v4  ;;  %vm1917_vm6 = vcmp.lt.s32.totalorder %v4877_v22, 2 }
 0x2e4   : > { %v4925_v59 = vmul.u32.u64.low %v4886_v19, %v2285_v6  ;;  %v4926_v43 = vmul.u32.u64.high %v4886_v19, %v2285_v6, %v4925_v59  ;;  %v1923_v51 = vsel %vm1921_vm12, %v1922_v5, %v3018_v4  ;;  %v2296_v10 = vadd.s32 1, %v4920_v41 }
 0x2e5   : > { %v2105_v40 = vor.u32 %v2104_v0, %v2103_v57  ;;  %v2108_v44 = vshll.u32 %v2107_v17, 23  ;;  %v1920_v34 = vsel %vm1918_vm13, %v3016_v14, %v1919_v33  ;;  %v2460_v39 = vand.u32 31, %v2458_v25 }
 0x2e6   : > { %v1924_v45 = vsel %vm1917_vm6, %v1920_v34, %v1923_v51  ;;  %vm4936_vm7 = vcmp.le.f32.partialorder %v2030_v9, 0.7853982  ;;  %v2454_v26 = vor.u32 8388608, %v4903_v49  ;;  %v2293_v8 = vmul.u32 %v4886_v19, %v2277_v42 }
 0x2e7   : > { %v2109_v54 = vor.u32 4788187, %v2108_v44  ;;  %v1925_v27 = vsel %vm1914_vm1, nan, %v1924_v45  ;;  %vm2295_vm8 = vc.u32 %v4926_v43, %v4919_v46  ;;  %v2461_v22 = vsub.s32 32, %v2460_v39 }
 0x2e8   : > { %2662 = vst [vmem:[%s3935_s27 + $0x40] sm:$0xff] %v1925_v27  ;;  %v2112_v1 = vcvt.s32.f32 %v2105_v40  ;;  %v2117_v9 = vsel %vm2032_vm5, %v2116_v18, %v4873_v60  ;;  %v2297_v49 = vsel %vm2295_vm8, %v2296_v10, %v4920_v41  ;;  %v2459_v35 = vshrl.u32 %v2458_v25, 5 }
 0x2e9   : > { %v2110_v56 = vand.u32 2147483647, %v2109_v54  ;;  %v2298_v20 = vadd.s32 %v2297_v49, %v2293_v8  ;;  %v2464_v28 = vshrl.u32 %v3107_v16, %v2461_v22  ;;  %v2467_v19 = vshrl.u32 %v3108_v48, %v2461_v22 }
 0x2ea   : > { %v2463_v30 = vshll.u32 %v3106_v61, %v2460_v39  ;;  %v2466_v24 = vshll.u32 %v3107_v16, %v2460_v39  ;;  %v2470_v62 = vshrl.u32 %v3109_v31, %v2461_v22  ;;  %v2469_v2 = vshll.u32 %v3108_v48, %v2460_v39 }
 0x2eb   : > { %v2113_v15 = vmul.f32 %v2112_v1, %v2110_v56  ;;  %v2299_v50 = vadd.s32 536870912, %v2298_v20  ;;  %v2472_v60 = vshll.u32 %v3109_v31, %v2460_v39  ;;  %v2473_v18 = vshrl.u32 %v3110_v21, %v2461_v22 }
 0x2ec   : > { %v2465_v11 = vor.u32 %v2464_v28, %v2463_v30  ;;  %v2468_v32 = vor.u32 %v2467_v19, %v2466_v24  ;;  %v2476_v47 = vshrl.u32 %v3111_v53, %v2461_v22  ;;  %v2471_v58 = vor.u32 %v2470_v62, %v2469_v2 }
 0x2ed   : > { %v2114_v63 = vxor.u32 2147483648, %v2113_v15  ;;  %v4962_v37 = vshrl.u32 %v2299_v50, 30  ;;  %v2474_v52 = vor.u32 %v2473_v18, %v2472_v60  ;;  %v2475_v16 = vshll.u32 %v3110_v21, %v2460_v39 }
 0x2ee   : > { %v2119_v48 = vsel %vm4936_vm7, 0, %v2117_v9  ;;  %vm2478_vm9 = vcmp.lt.s32.totalorder %v2459_v35, 1  ;;  %v2494_v31 = vshll.u32 %v2454_v26, 8  ;;  %vm2481_vm10 = vcmp.lt.s32.totalorder %v2459_v35, 4 }
 0x2ef   : > { %v2115_v7 = vsel %vm2032_vm5, %v2114_v63, %v2113_v15  ;;  %v2301_v53 = vshll.u32 %v4962_v37, 30  ;;  %v2477_v55 = vor.u32 %v2476_v47, %v2475_v16  ;;  %v2462_v14 = vshrl.u32 %v3106_v61, %v2461_v22 }
 0x2f0   : > { %v2118_v42 = vsel %vm4936_vm7, %v4734_v29, %v2115_v7  ;;  %v2486_v21 = vsel %vm2478_vm9, %v2465_v11, %v2468_v32  ;;  %v2487_v57 = vsel %vm2481_vm10, %v2474_v52, 920167782  ;;  %vm2480_vm11 = vcmp.lt.s32.totalorder %v2459_v35, 3 }
 0x2f1   : > { %3019 = vcosq.f32 %v2118_v42  ;;  %v2302_v12 = vsub.s32 %v2298_v20, %v2301_v53  ;;  %v2483_v41 = vsel %vm2481_vm10, %v2471_v58, 2102212464  ;;  %v2123_v4 = vadd.s32 3, %v2119_v48 }
 0x2f2   : > { %3021 = vsinq.f32 %v2118_v42  ;;  %vm2479_vm12 = vcmp.lt.s32.totalorder %v2459_v35, 2  ;;  %v2488_v5 = vsel %vm2480_vm11, %v2471_v58, %v2487_v57  ;;  %v2490_v0 = vsel %vm2478_vm9, %v2468_v32, %v2471_v58 }
 0x2f3   : > { %v2304_v17 = vsub.s32 0, %v2302_v12  ;;  %v2482_v6 = vsel %vm2478_vm9, %v2462_v14, %v2465_v11  ;;  %v2489_v33 = vsel %vm2479_vm12, %v2486_v21, %v2488_v5  ;;  %v2491_v61 = vsel %vm2481_vm10, %v2477_v55, 1326507024 }
 0x2f4   : > { %v2484_v59 = vsel %vm2480_vm11, %v2468_v32, %v2483_v41  ;;  %v2492_v51 = vsel %vm2480_vm11, %v2474_v52, %v2491_v61  ;;  %v4981_v40 = vmul.u32.u64.low %v2494_v31, %v2489_v33  ;;  %v4982_v44 = vmul.u32.u64.high %v2494_v31, %v2489_v33, %v4981_v40 }
 0x2f5   : > { %v2811_v25 = vmin.u32 %v2304_v17, %v2302_v12  ;;  %v2493_v34 = vsel %vm2479_vm12, %v2490_v0, %v2492_v51  ;;  %v2124_v45 = vand.u32 3, %v2123_v4  ;;  %v2485_v54 = vsel %vm2479_vm12, %v2482_v6, %v2484_v59 }
 0x2f6   : > { %v4985_v10 = vmul.u32.u64.low %v2494_v31, %v2493_v34  ;;  %v4986_v39 = vmul.u32.u64.high %v2494_v31, %v2493_v34, %v4985_v10  ;;  %v2504_v26 = vadd.s32 1, %v4982_v44  ;;  %v2501_v22 = vmul.u32 %v2494_v31, %v2485_v54 }
 0x2f7   : > { %v2306_v36 = vclz %v2811_v25  ;;  %vm2126_vm14 = vcmp.eq.s32.totalorder %v2124_v45, 0  ;;  %vm2129_vm0 = vcmp.eq.s32.totalorder %v2124_v45, 2  ;;  %v2294_v19 = vadd.s32 %v4919_v46, %v4926_v43 }
 0x2f8   : > { %vm2503_vm13 = vc.u32 %v4986_v39, %v4981_v40  ;;  %vm2122_vm1 = vweird.f32 %v4734_v29  ;;  %vm2125_vm2 = vcmp.lt.s32.totalorder %v2124_v45, 2  ;;  %v2324_v29 = vsub.s32 4, %v4962_v37 }
 0x2f9   : > { %v2812_v27 = vadd.s32 4294967294, %v2306_v36  ;;  %v2505_v9 = vsel %vm2503_vm13, %v2504_v26, %v4982_v44  ;;  %vm2240_vm3 = vcmp.lt.s32.totalorder %v4821_v3, 0  ;;  %vm2239_vm5 = vcmp.le.f32.partialorder %v2238_v23, 0.7853982 }
 0x2fa   : > { %v2506_v28 = vadd.s32 %v2505_v9, %v2501_v22  ;;  %v2325_v14 = vsel %vm2240_vm3, %v2324_v29, %v4962_v37  ;;  %v2502_v4 = vadd.s32 %v4981_v40, %v4986_v39  ;;  %vm2330_vm9 = vweird.f32 %v4821_v3 }
 0x2fb   : > { %v3020_v8 = vpop.eup %3019  ;;  %vm2813_vm15 = vcmp.lt.s32.totalorder %v2812_v27, 0  ;;  %vm2448_vm10 = vcmp.lt.s32.totalorder %v4856_v38, 0  ;;  %vm2447_vm11 = vcmp.le.f32.partialorder %v2446_v13, 0.7853982 }
 0x2fc   : > { %v3022_v56 = vpop.eup %3021  ;;  %v2130_v1 = vxor.u32 2147483648, %v3020_v8  ;;  %v2309_v20 = vsel %vm2813_vm15, 0, %v2812_v27  ;;  %v2507_v62 = vadd.s32 536870912, %v2506_v28  ;;  %vm2538_vm15 = vweird.f32 %v4856_v38 }
 0x2fd   : > { %v2127_v49 = vxor.u32 2147483648, %v3022_v56  ;;  %v2310_v15 = vsub.s32 32, %v2309_v20  ;;  %v2314_v30 = vsub.s32 4294967266, %v2309_v20  ;;  %v2311_v2 = vshll.u32 %v2302_v12, %v2309_v20 }
 0x2fe   : > { %v2131_v35 = vsel %vm2129_vm0, %v2130_v1, %v3022_v56  ;;  %v2508_v11 = vshrl.u32 %v2507_v62, 30  ;;  %v2327_v12 = vsel %vm2239_vm5, 0, %v2325_v14 }
 0x2ff   : > { %v2128_v24 = vsel %vm2126_vm14, %v3020_v8, %v2127_v49  ;;  %v2312_v60 = vshrl.u32 %v2294_v19, %v2310_v15  ;;  %v2315_v18 = vadd.s32 127, %v2314_v30  ;;  %v2331_v17 = vadd.s32 3, %v2327_v12 }
 0x300   : > { %v2132_v50 = vsel %vm2125_vm2, %v2128_v24, %v2131_v35  ;;  %v2509_v58 = vshll.u32 %v2508_v11, 30  ;;  %v2532_v54 = vsub.s32 4, %v2508_v11 }
 0x301   : > { %v2133_v63 = vsel %vm2122_vm1, nan, %v2132_v50  ;;  %v2313_v32 = vor.u32 %v2312_v60, %v2311_v2  ;;  %v2316_v47 = vshll.u32 %v2315_v18, 23  ;;  %v2332_v51 = vand.u32 3, %v2331_v17 }
 0x302   : > { %2664 = vst [vmem:[%s3935_s27 + $0x50] sm:$0xff] %v2133_v63  ;;  %v2510_v16 = vsub.s32 %v2506_v28, %v2509_v58  ;;  %v2533_v1 = vsel %vm2448_vm10, %v2532_v54, %v2508_v11 }
 0x303   : > { %v2317_v52 = vor.u32 4788187, %v2316_v47  ;;  %v2320_v43 = vcvt.s32.f32 %v2313_v32  ;;  %vm2337_vm6 = vcmp.eq.s32.totalorder %v2332_v51, 2  ;;  %vm2334_vm7 = vcmp.eq.s32.totalorder %v2332_v51, 0 }
 0x304   : > { %v2512_v7 = vsub.s32 0, %v2510_v16  ;;  %vm2333_vm8 = vcmp.lt.s32.totalorder %v2332_v51, 2  ;;  %v2535_v49 = vsel %vm2447_vm11, 0, %v2533_v1 }
 0x305   : > { %v2318_v46 = vand.u32 2147483647, %v2317_v52  ;;  %v2539_v20 = vadd.s32 3, %v2535_v49 }
 0x306   : > { %v2819_v31 = vmin.u32 %v2512_v7, %v2510_v16 }
 0x307   : > { %v2321_v48 = vmul.f32 %v2320_v43, %v2318_v46 }
 0x308   : > { %v2514_v53 = vclz %v2819_v31 }
 0x309   : > { %v2322_v42 = vxor.u32 2147483648, %v2321_v48 }
 0x30a   : > { %v2820_v57 = vadd.s32 4294967294, %v2514_v53 }
 0x30b   : > { %v2323_v55 = vsel %vm2240_vm3, %v2322_v42, %v2321_v48 }
 0x30c   : > { %v2326_v21 = vsel %vm2239_vm5, %v4821_v3, %v2323_v55  ;;  %vm2821_vm4 = vcmp.lt.s32.totalorder %v2820_v57, 0  ;;  %v2540_v3 = vand.u32 3, %v2539_v20 }
 0x30d   : > { %3023 = vcosq.f32 %v2326_v21  ;;  %v2517_v41 = vsel %vm2821_vm4, 0, %v2820_v57 }
 0x30e   : > { %3025 = vsinq.f32 %v2326_v21  ;;  %v2518_v5 = vsub.s32 32, %v2517_v41  ;;  %v2522_v0 = vsub.s32 4294967266, %v2517_v41  ;;  %v2519_v6 = vshll.u32 %v2510_v16, %v2517_v41 }
 0x30f   : > { %vm2545_vm12 = vcmp.eq.s32.totalorder %v2540_v3, 2  ;;  %vm2542_vm13 = vcmp.eq.s32.totalorder %v2540_v3, 0  ;;  %vm2541_vm14 = vcmp.lt.s32.totalorder %v2540_v3, 2 }
 0x310   : > { %v2520_v33 = vshrl.u32 %v2502_v4, %v2518_v5  ;;  %v2523_v61 = vadd.s32 127, %v2522_v0 }
 0x312   : > { %v2521_v23 = vor.u32 %v2520_v33, %v2519_v6  ;;  %v2524_v59 = vshll.u32 %v2523_v61, 23 }
 0x314   : > { %v2525_v37 = vor.u32 4788187, %v2524_v59  ;;  %v2528_v45 = vcvt.s32.f32 %v2521_v23 }
 0x316   : > { %v2526_v10 = vand.u32 2147483647, %v2525_v37 }
 0x317   : > { %v3024_v44 = vpop.eup %3023 }
 0x318   : > { %v3026_v25 = vpop.eup %3025  ;;  %v2338_v34 = vxor.u32 2147483648, %v3024_v44  ;;  %v2529_v39 = vmul.f32 %v2528_v45, %v2526_v10 }
 0x319   : > { %v2335_v36 = vxor.u32 2147483648, %v3026_v25 }
 0x31a   : > { %v2339_v40 = vsel %vm2337_vm6, %v2338_v34, %v3026_v25  ;;  %v2530_v8 = vxor.u32 2147483648, %v2529_v39 }
 0x31b   : > { %v2336_v26 = vsel %vm2334_vm7, %v3024_v44, %v2335_v36 }
 0x31c   : > { %v2340_v27 = vsel %vm2333_vm8, %v2336_v26, %v2339_v40  ;;  %v2531_v56 = vsel %vm2448_vm10, %v2530_v8, %v2529_v39 }
 0x31d   : > { %v2341_v22 = vsel %vm2330_vm9, nan, %v2340_v27  ;;  %v2534_v9 = vsel %vm2447_vm11, %v4856_v38, %v2531_v56 }
 0x31e   : > { %2666 = vst [vmem:[%s3935_s27 + $0x60] sm:$0xff] %v2341_v22  ;;  %3027 = vcosq.f32 %v2534_v9 }
 0x31f   : > { %3029 = vsinq.f32 %v2534_v9 }
 0x328   : > { %v3028_v28 = vpop.eup %3027 }
 0x329   : > { %v3030_v35 = vpop.eup %3029  ;;  %v2546_v19 = vxor.u32 2147483648, %v3028_v28 }
 0x32a   : > { %v2543_v15 = vxor.u32 2147483648, %v3030_v35 }
 0x32b   : > { %v2547_v13 = vsel %vm2545_vm12, %v2546_v19, %v3030_v35 }
 0x32c   : > { %v2544_v30 = vsel %vm2542_vm13, %v3028_v28, %v2543_v15 }
 0x32d   : > { %v2548_v24 = vsel %vm2541_vm14, %v2544_v30, %v2547_v13 }
 0x32e   : > { %v2549_v62 = vsel %vm2538_vm15, nan, %v2548_v24 }
 0x32f   : > { %2668 = vst [vmem:[%s3935_s27 + $0x70] sm:$0xff] %v2549_v62 }
 0x330   : > { %3047 = shalt.err (!%p3044_p3)
}
 0x331   : > { %s3048_s24 = scalar_lea.hbm %s5014_s16, 2048  ;;  %s3052_s27 = scalar_lea.hbm %s5065_s2, 8192 }
 0x332   : > { %p3049_p4 = scmp.ne.s32.totalorder %s5014_s16, %s3048_s24  ;;  %p3053_p9 = scmp.lt.u32.totalorder %s5014_s16, %s5065_s2 }
 0x333   : > { %p3054_p10 = scmp.lt.u32.totalorder %s3052_s27, %s3048_s24  ;;  %p3056_p12 = scmp.lt.u32.totalorder %s3048_s24, %s5014_s16 }
 0x334   : > { %p3050_p7 = pnand %p3049_p4, %p3168_p5 }
 0x335   : > { %p3055_p11 = por %p3054_p10, %p3053_p9 }
 0x336   : > { %p3051_p8 = pneg %p3050_p7 }
 0x337   : > { %p3057_p13 = por %p3056_p12, %p3055_p11 }
 0x339   : > { %p3058_p0 = pnand %p3057_p13, %p3051_p8 }
 0x33b   : > { %3061 = shalt.err (!%p3058_p0)
}
 0x33c   : > { %s3113_s30 = smov 128   ;;  %s3114_s3 = smov 8  }
 0x33d   : > { %2896 = dma.vmem_to_hbm [thread:$0]  (%p3168_p5), %s5016_s7, 2048, %s5014_s16, %s5022_s13, %s3113_s30, %s3113_s30, %s3114_s3  }
 0x33e PF: > { %p2902_p1 = scmp.ge.s32.totalorder %s3096_s12, 2  ;;  %s2699_s4 = sand.u32 1, %s3084_s9  }
 0x33f   : > { %s2700_s5 = scalar_lea.sflag [#allocation3], %s2699_s4 }
 0x340   : > { %p2899_p2 = pnand %p2902_p1, %p3172_p6 }
 0x342   : > { %3079 = dma.done.wait (!%p2899_p2), %s2700_s5, 2048  }
 0x343   : > { %3081 = vsyncadd (!%p2899_p2), %s2700_s5, 4294965248  ;;  %p12_p3 = scmp.ge.s32.totalorder %s3155_s15, 6   ;;  %s5096_s9 = smov %s3088_s10 }
 0x344   : > { %s5097_s10 = smov %s3092_s11  ;;  %s5098_s11 = smov %s3166_s18 }
 0x345   : > { %s5099_s12 = smov %s3155_s15  ;;  %14 = sbr.rel (!%p12_p3) target bundleno = 3 (0x3), region = 63 }
 0x34c   :  { %2705 = vsyncpa [#allocation3], 1 }
 0x34d   :  { %2707 = vsyncpa [#allocation3 + $0x1], 1 }

</bundles_post_ra>
